<compile_context>
chip_gen: v7x
topology: tpu7x:2x2x1
jax: 0.10.0
libtpu: 0.0.40
codegen_flags: <defaults>
</compile_context>

<pallas_src>
import functools

import jax
import jax.numpy as jnp
from jax import lax
from jax.experimental import pallas as pl
from jax.experimental.pallas import tpu as pltpu


# ---------------------------------------------------------------------------
# Helpers
# ---------------------------------------------------------------------------
def _matmul_dtype():
    # bf16 MXU inputs with f32 accumulation on TPU; f32 elsewhere (the CPU /
    # interpreter dot thunk does not support bf16 x bf16 -> f32).
    return jnp.bfloat16 if jax.default_backend() == "tpu" else jnp.float32


def _sigmoid(v):
    # sigmoid(x) == 0.5 * (tanh(x/2) + 1): a single EUP op on the serial
    # critical path instead of exp + divide.
    return 0.5 * (jnp.tanh(0.5 * v) + 1.0)


def _round_up(n, m):
    return ((n + m - 1) // m) * m


def _pad_to(a, shape):
    return jnp.pad(a, [(0, s - d) for d, s in zip(a.shape, shape)])


def _pad_gate_axis(w, H, Hp):
    """Pad last axis 4H -> 4Hp, padding each (i,f,g,o) block independently."""
    parts = jnp.split(w, 4, axis=-1)
    pads = [(0, 0)] * (w.ndim - 1) + [(0, Hp - H)]
    return jnp.concatenate([jnp.pad(p, pads) for p in parts], axis=-1)


# ---------------------------------------------------------------------------
# Kernel: serial recurrence over time, TT steps per grid iteration.
# ---------------------------------------------------------------------------
def _lstm_kernel(gx_ref, h0_ref, c0_ref, w_hh_ref, h_out_ref, h_sc, c_sc, *,
                 seq_len, needs_mask):
    t = pl.program_id(0)
    TT = gx_ref.shape[0]           # time steps in this chunk (static)
    Hp = h_sc.shape[1]             # padded hidden size (multiple of 128)
    chunk_base = t * TT

    # Initialize recurrent state on the first chunk.
    @pl.when(t == 0)
    def _():
        h_sc[...] = h0_ref[...]
        c_sc[...] = c0_ref[...]

    def step(s, carry):
        h, c = carry                                   # (Bp, Hp) f32
        # W_hh^T is loop-invariant (same ref / same slice every step), so the
        # MXU weight push can be hoisted out of the unrolled time loop.
        # TODO(synk): drive the MXU explicitly (pltpu.matmul_push_rhs once per
        # chunk + matmul_acc_lhs/matmul_pop per step) after bundle verification.
        gates = gx_ref[s].astype(jnp.float32) + jnp.dot(
            h.astype(w_hh_ref.dtype), w_hh_ref[...],
            preferred_element_type=jnp.float32)        # (Bp, 4Hp) f32

        # Consume each gate slice immediately to minimize live intermediates.
        f_g = _sigmoid(gates[:, 1 * Hp:2 * Hp])
        c_new = f_g * c
        i_g = _sigmoid(gates[:, 0 * Hp:1 * Hp])
        g_g = jnp.tanh(gates[:, 2 * Hp:3 * Hp])
        c_new = c_new + i_g * g_g
        o_g = _sigmoid(gates[:, 3 * Hp:4 * Hp])
        h_new = o_g * jnp.tanh(c_new)

        if needs_mask:
            # Tail-padded steps (zero gates_x) must not advance the state.
            valid = (chunk_base + s) < seq_len
            h_new = jnp.where(valid, h_new, h)
            c_new = jnp.where(valid, c_new, c)
        return h_new, c_new

    # Unrolled inner time loop; h/c stay in registers, scratch written once.
    # Cap the unroll factor at large Hp to keep the schedule spill-free.
    unroll = True if Hp <= 512 else 8
    h, c = lax.fori_loop(0, TT, step, (h_sc[...], c_sc[...]), unroll=unroll)
    h_sc[...] = h
    c_sc[...] = c

    # Constant-index output block: writing every chunk is a trivially cheap
    # vreg->VMEM store and only the final VMEM contents reach HBM, so this does
    # not rely on last-iteration-only revisit semantics.
    h_out_ref[...] = h.astype(h_out_ref.dtype)


# ---------------------------------------------------------------------------
# Wrapper
# ---------------------------------------------------------------------------
def lstm_forward(x, h0, c0, params, *, time_block=32):
    """x: (B, T, I) batch-first; h0/c0: (B, H).  Returns (B, O)."""
    B, T, I = x.shape
    H = h0.shape[-1]
    mm_dtype = _matmul_dtype()

    Bp = _round_up(max(B, 8), 8)          # sublane alignment
    Hp = _round_up(max(H, 128), 128)      # lane alignment (gate slices 128-wide)

    # Time chunking: single grid step when the whole gates_x stream fits
    # comfortably in VMEM (no per-chunk overhead / state round-trips);
    # otherwise `time_block`-step chunks with a zero-padded, masked tail.
    gx_itemsize = jnp.dtype(mm_dtype).itemsize
    if T * Bp * 4 * Hp * gx_itemsize <= 8 * 1024 * 1024:
        TT = T
    else:
        TT = min(time_block, T)
    num_chunks = pl.cdiv(T, TT)
    T_pad = num_chunks * TT
    needs_mask = T_pad != T

    # --- pad parameters / state to TPU-friendly shapes (exact padding) -----
    w_ih_p = _pad_gate_axis(params["w_ih_t"], H, Hp)                       # (I, 4Hp)
    w_hh_p = _pad_to(_pad_gate_axis(params["w_hh_t"], H, Hp), (Hp, 4 * Hp))
    b_p = _pad_gate_axis(params["b_comb"], H, Hp)                          # (1, 4Hp)

    x_p = _pad_to(x, (Bp, T_pad, I))
    h0_p = _pad_to(h0, (Bp, Hp)).astype(jnp.float32)
    c0_p = _pad_to(c0, (Bp, Hp)).astype(jnp.float32)

    # --- hoisted input projection: one big GEMM over all T steps -----------
    # Transpose x to time-major first (cheap, I is tiny) so no transpose of the
    # large (T_pad, Bp, 4Hp) gates tensor is ever materialized.
    x_tm = jnp.transpose(x_p, (1, 0, 2))                                   # (T_pad, Bp, I)
    gates_x = (
        jnp.einsum("tbi,ig->tbg",
                   x_tm.astype(mm_dtype), w_ih_p.astype(mm_dtype),
                   preferred_element_type=jnp.float32)
        + b_p[None]
    ).astype(mm_dtype)                                                     # stream in mm_dtype
    w_hh_mm = w_hh_p.astype(mm_dtype)                                      # (Hp, 4Hp)

    grid_spec = pltpu.PrefetchScalarGridSpec(
        num_scalar_prefetch=0,
        grid=(num_chunks,),
        in_specs=[
            pl.BlockSpec((TT, Bp, 4 * Hp), lambda t: (t, 0, 0)),   # gates_x chunk
            pl.BlockSpec((Bp, Hp), lambda t: (0, 0)),              # h0
            pl.BlockSpec((Bp, Hp), lambda t: (0, 0)),              # c0
            pl.BlockSpec((Hp, 4 * Hp), lambda t: (0, 0)),          # W_hh^T, VMEM resident
        ],
        out_specs=pl.BlockSpec((Bp, Hp), lambda t: (0, 0)),        # h_T (lane-dense)
        scratch_shapes=[
            pltpu.VMEM((Bp, Hp), jnp.float32),                     # h state
            pltpu.VMEM((Bp, Hp), jnp.float32),                     # c state
        ],
    )
    # TODO(synk): single-buffer (pl.Buffered(1)) the loop-invariant W_hh/h0/c0
    # blocks for large Hp, and add a "parallel" batch grid axis on v7x when
    # Bp >= 16 so both TensorCores run half the batch each.

    kernel = functools.partial(_lstm_kernel, seq_len=T, needs_mask=needs_mask)
    h_T = pl.pallas_call(
        kernel,
        out_shape=jax.ShapeDtypeStruct((Bp, Hp), jnp.float32),
        grid_spec=grid_spec,
        compiler_params=pltpu.CompilerParams(
            dimension_semantics=("arbitrary",),        # time recurrence is serial
            vmem_limit_bytes=32 * 1024 * 1024,         # fits all generations w/ headroom
        ),
    )(gates_x, h0_p, c0_p, w_hh_mm)

    # Final FC applied once by XLA on the unpadded slice of h_T.
    return h_T[:B, :H] @ params["w_fc_t"] + params["b_fc"]


# ---------------------------------------------------------------------------
# Parameter init (PyTorch shapes, stored transposed) and pure-JAX reference.
# ---------------------------------------------------------------------------
def init_params(key, input_size, hidden_size, output_size):
    k = 1.0 / jnp.sqrt(hidden_size)
    ks = jax.random.split(key, 6)
    # nn.LSTM params: weight_ih (4H, I), weight_hh (4H, H), biases (4H,)
    w_ih = jax.random.uniform(ks[0], (4 * hidden_size, input_size), jnp.float32, -k, k)
    w_hh = jax.random.uniform(ks[1], (4 * hidden_size, hidden_size), jnp.float32, -k, k)
    b_ih = jax.random.uniform(ks[2], (4 * hidden_size,), jnp.float32, -k, k)
    b_hh = jax.random.uniform(ks[3], (4 * hidden_size,), jnp.float32, -k, k)
    # nn.Linear params: weight (O, H), bias (O,)
    w_fc = jax.random.uniform(ks[4], (output_size, hidden_size), jnp.float32, -k, k)
    b_fc = jax.random.uniform(ks[5], (output_size,), jnp.float32, -k, k)
    return dict(
        w_ih_t=w_ih.T,                       # (I, 4H)
        w_hh_t=w_hh.T,                       # (H, 4H)
        b_comb=(b_ih + b_hh)[None, :],       # (1, 4H)
        w_fc_t=w_fc.T,                       # (H, O)
        b_fc=b_fc[None, :],                  # (1, O)
    )


def reference_lstm(x, h0, c0, p, mm_dtype):
    """Pure-JAX reference (PyTorch nn.LSTM gate order, i/f/g/o), mirroring the
    kernel's matmul-dtype / gates_x-storage precision policy."""
    B, T, I = x.shape
    H = h0.shape[-1]
    w_ih = p["w_ih_t"].astype(mm_dtype)
    w_hh = p["w_hh_t"].astype(mm_dtype)
    h, c = h0, c0
    for t in range(T):
        gx = (jnp.dot(x[:, t, :].astype(mm_dtype), w_ih,
                      preferred_element_type=jnp.float32)
              + p["b_comb"]).astype(mm_dtype).astype(jnp.float32)
        gates = gx + jnp.dot(h.astype(mm_dtype), w_hh,
                             preferred_element_type=jnp.float32)
        i_g = jax.nn.sigmoid(gates[:, 0 * H:1 * H])
        f_g = jax.nn.sigmoid(gates[:, 1 * H:2 * H])
        g_g = jnp.tanh(gates[:, 2 * H:3 * H])
        o_g = jax.nn.sigmoid(gates[:, 3 * H:4 * H])
        c = f_g * c + i_g * g_g
        h = o_g * jnp.tanh(c)
    return h @ p["w_fc_t"] + p["b_fc"]


if __name__ == "__main__":
    # Small shapes consistent with the module: x is (B, T, input_size).
    B, T, INPUT, HIDDEN, OUT = 2, 16, 4, 32, 12

    root = jax.random.PRNGKey(0)
    k_x, k_h0, k_c0, k_p = jax.random.split(root, 4)

    x = jax.random.normal(k_x, (B, T, INPUT), jnp.float32)
    # The PyTorch module draws random h0/c0 inside forward (torch.randn);
    # we draw them deterministically here.
    h0 = jax.random.normal(k_h0, (B, HIDDEN), jnp.float32)
    c0 = jax.random.normal(k_c0, (B, HIDDEN), jnp.float32)

    params = init_params(k_p, INPUT, HIDDEN, OUT)

    out = jax.block_until_ready(lstm_forward(x, h0, c0, params))
    ref = reference_lstm(x, h0, c0, params, _matmul_dtype())

    assert out.shape == (B, OUT), out.shape
    assert jnp.allclose(out, ref, atol=2e-3, rtol=2e-3), (
        float(jnp.max(jnp.abs(out - ref))))

    print("KERNEL_OK")
</pallas_src>

<mosaic_0001>
module attributes {stable_mosaic.version = 11 : i64} {
  func.func @_lstm_kernel(%arg0: i32, %arg1: memref<16x8x512xf32, #tpu.memory_space<vmem>>, %arg2: memref<8x128xf32, #tpu.memory_space<vmem>>, %arg3: memref<8x128xf32, #tpu.memory_space<vmem>>, %arg4: memref<128x512xf32, #tpu.memory_space<vmem>>, %arg5: memref<8x128xf32, #tpu.memory_space<vmem>>, %arg6: memref<8x128xf32, #tpu.memory_space<vmem>>, %arg7: memref<8x128xf32, #tpu.memory_space<vmem>>) attributes {dimension_semantics = [#tpu.dimension_semantics<arbitrary>], iteration_bounds = array<i64: 1>, scalar_prefetch = 0 : i64, scratch_operands = 2 : i64, tpu.core_type = #tpu.core_type<tc>, window_params = [{transform_indices = @transform_0, window_bounds = array<i64: 16, 8, 512>}, {pipeline_mode = #tpu.pipeline_mode<synchronous>, transform_indices = @transform_1, window_bounds = array<i64: 8, 128>}, {pipeline_mode = #tpu.pipeline_mode<synchronous>, transform_indices = @transform_2, window_bounds = array<i64: 8, 128>}, {pipeline_mode = #tpu.pipeline_mode<synchronous>, transform_indices = @transform_3, window_bounds = array<i64: 128, 512>}, {pipeline_mode = #tpu.pipeline_mode<synchronous>, transform_indices = @transform_4, window_bounds = array<i64: 8, 128>}]} {
    %c0_i32 = arith.constant 0 : i32
    %0 = arith.cmpi eq, %arg0, %c0_i32 : i32
    %1 = arith.extui %0 : i1 to i32
    %c0_i32_0 = arith.constant 0 : i32
    %2 = arith.cmpi ne, %1, %c0_i32_0 : i32
    scf.if %2 {
      %c0_234 = arith.constant 0 : index
      %c0_235 = arith.constant 0 : index
      %600 = vector.load %arg2[%c0_234, %c0_235] : memref<8x128xf32, #tpu.memory_space<vmem>>, vector<8x128xf32>
      %c0_236 = arith.constant 0 : index
      %c0_237 = arith.constant 0 : index
      %601 = vector.load %arg6[%c0_236, %c0_237] : memref<8x128xf32, #tpu.memory_space<vmem>>, vector<8x128xf32>
      tpu.vector_store %arg6[%c0_236, %c0_237], %600 {strides = array<i32>} : memref<8x128xf32, #tpu.memory_space<vmem>>, vector<8x128xf32>,
      %c0_238 = arith.constant 0 : index
      %c0_239 = arith.constant 0 : index
      %602 = vector.load %arg3[%c0_238, %c0_239] : memref<8x128xf32, #tpu.memory_space<vmem>>, vector<8x128xf32>
      %c0_240 = arith.constant 0 : index
      %c0_241 = arith.constant 0 : index
      %603 = vector.load %arg7[%c0_240, %c0_241] : memref<8x128xf32, #tpu.memory_space<vmem>>, vector<8x128xf32>
      tpu.vector_store %arg7[%c0_240, %c0_241], %602 {strides = array<i32>} : memref<8x128xf32, #tpu.memory_space<vmem>>, vector<8x128xf32>,
    } else {
    }
    %c0 = arith.constant 0 : index
    %c0_1 = arith.constant 0 : index
    %3 = vector.load %arg6[%c0, %c0_1] : memref<8x128xf32, #tpu.memory_space<vmem>>, vector<8x128xf32>
    %c0_2 = arith.constant 0 : index
    %c0_3 = arith.constant 0 : index
    %4 = vector.load %arg7[%c0_2, %c0_3] : memref<8x128xf32, #tpu.memory_space<vmem>>, vector<8x128xf32>
    %c0_i32_4 = arith.constant 0 : i32
    %5 = arith.index_cast %c0_i32_4 : i32 to index
    %c0_5 = arith.constant 0 : index
    %c0_6 = arith.constant 0 : index
    %6 = vector.load %arg1[%5, %c0_5, %c0_6] : memref<16x8x512xf32, #tpu.memory_space<vmem>>, vector<1x8x512xf32>
    %7 = vector.shape_cast %6 : vector<1x8x512xf32> to vector<8x512xf32>
    %c0_7 = arith.constant 0 : index
    %c0_8 = arith.constant 0 : index
    %8 = vector.load %arg4[%c0_7, %c0_8] : memref<128x512xf32, #tpu.memory_space<vmem>>, vector<128x512xf32>
    %cst = arith.constant dense<0.000000e+00> : vector<8x512xf32>
    %9 = tpu.matmul %3, %8, %cst {dimension_numbers = #tpu.dot_dimension_numbers<[1], [0], [0], [1], [0, 0, 1, 1], [], []>} : vector<8x128xf32>, vector<128x512xf32>, vector<8x512xf32> -> vector<8x512xf32>
    %10 = arith.addf %7, %9 : vector<8x512xf32>
    %11 = vector.extract_strided_slice %10 {offsets = [0, 128], sizes = [8, 128], strides = [1, 1]} : vector<8x512xf32> to vector<8x128xf32>
    %cst_9 = arith.constant 5.000000e-01 : f32
    %12 = vector.broadcast %cst_9 : f32 to vector<8x128xf32>
    %13 = arith.mulf %12, %11 : vector<8x128xf32>
    %14 = math.tanh %13 : vector<8x128xf32>
    %cst_10 = arith.constant 1.000000e+00 : f32
    %15 = vector.broadcast %cst_10 : f32 to vector<8x128xf32>
    %16 = arith.addf %14, %15 : vector<8x128xf32>
    %cst_11 = arith.constant 5.000000e-01 : f32
    %17 = vector.broadcast %cst_11 : f32 to vector<8x128xf32>
    %18 = arith.mulf %17, %16 : vector<8x128xf32>
    %19 = arith.mulf %18, %4 : vector<8x128xf32>
    %20 = vector.extract_strided_slice %10 {offsets = [0, 0], sizes = [8, 128], strides = [1, 1]} : vector<8x512xf32> to vector<8x128xf32>
    %cst_12 = arith.constant 5.000000e-01 : f32
    %21 = vector.broadcast %cst_12 : f32 to vector<8x128xf32>
    %22 = arith.mulf %21, %20 : vector<8x128xf32>
    %23 = math.tanh %22 : vector<8x128xf32>
    %cst_13 = arith.constant 1.000000e+00 : f32
    %24 = vector.broadcast %cst_13 : f32 to vector<8x128xf32>
    %25 = arith.addf %23, %24 : vector<8x128xf32>
    %cst_14 = arith.constant 5.000000e-01 : f32
    %26 = vector.broadcast %cst_14 : f32 to vector<8x128xf32>
    %27 = arith.mulf %26, %25 : vector<8x128xf32>
    %28 = vector.extract_strided_slice %10 {offsets = [0, 256], sizes = [8, 128], strides = [1, 1]} : vector<8x512xf32> to vector<8x128xf32>
    %29 = math.tanh %28 : vector<8x128xf32>
    %30 = arith.mulf %27, %29 : vector<8x128xf32>
    %31 = arith.addf %19, %30 : vector<8x128xf32>
    %32 = vector.extract_strided_slice %10 {offsets = [0, 384], sizes = [8, 128], strides = [1, 1]} : vector<8x512xf32> to vector<8x128xf32>
    %cst_15 = arith.constant 5.000000e-01 : f32
    %33 = vector.broadcast %cst_15 : f32 to vector<8x128xf32>
    %34 = arith.mulf %33, %32 : vector<8x128xf32>
    %35 = math.tanh %34 : vector<8x128xf32>
    %cst_16 = arith.constant 1.000000e+00 : f32
    %36 = vector.broadcast %cst_16 : f32 to vector<8x128xf32>
    %37 = arith.addf %35, %36 : vector<8x128xf32>
    %cst_17 = arith.constant 5.000000e-01 : f32
    %38 = vector.broadcast %cst_17 : f32 to vector<8x128xf32>
    %39 = arith.mulf %38, %37 : vector<8x128xf32>
    %40 = math.tanh %31 : vector<8x128xf32>
    %41 = arith.mulf %39, %40 : vector<8x128xf32>
    %c1_i32 = arith.constant 1 : i32
    %42 = arith.index_cast %c1_i32 : i32 to index
    %c0_18 = arith.constant 0 : index
    %c0_19 = arith.constant 0 : index
    %43 = vector.load %arg1[%42, %c0_18, %c0_19] : memref<16x8x512xf32, #tpu.memory_space<vmem>>, vector<1x8x512xf32>
    %44 = vector.shape_cast %43 : vector<1x8x512xf32> to vector<8x512xf32>
    %c0_20 = arith.constant 0 : index
    %c0_21 = arith.constant 0 : index
    %45 = vector.load %arg4[%c0_20, %c0_21] : memref<128x512xf32, #tpu.memory_space<vmem>>, vector<128x512xf32>
    %cst_22 = arith.constant dense<0.000000e+00> : vector<8x512xf32>
    %46 = tpu.matmul %41, %45, %cst_22 {dimension_numbers = #tpu.dot_dimension_numbers<[1], [0], [0], [1], [0, 0, 1, 1], [], []>} : vector<8x128xf32>, vector<128x512xf32>, vector<8x512xf32> -> vector<8x512xf32>
    %47 = arith.addf %44, %46 : vector<8x512xf32>
    %48 = vector.extract_strided_slice %47 {offsets = [0, 128], sizes = [8, 128], strides = [1, 1]} : vector<8x512xf32> to vector<8x128xf32>
    %cst_23 = arith.constant 5.000000e-01 : f32
    %49 = vector.broadcast %cst_23 : f32 to vector<8x128xf32>
    %50 = arith.mulf %49, %48 : vector<8x128xf32>
    %51 = math.tanh %50 : vector<8x128xf32>
    %cst_24 = arith.constant 1.000000e+00 : f32
    %52 = vector.broadcast %cst_24 : f32 to vector<8x128xf32>
    %53 = arith.addf %51, %52 : vector<8x128xf32>
    %cst_25 = arith.constant 5.000000e-01 : f32
    %54 = vector.broadcast %cst_25 : f32 to vector<8x128xf32>
    %55 = arith.mulf %54, %53 : vector<8x128xf32>
    %56 = arith.mulf %55, %31 : vector<8x128xf32>
    %57 = vector.extract_strided_slice %47 {offsets = [0, 0], sizes = [8, 128], strides = [1, 1]} : vector<8x512xf32> to vector<8x128xf32>
    %cst_26 = arith.constant 5.000000e-01 : f32
    %58 = vector.broadcast %cst_26 : f32 to vector<8x128xf32>
    %59 = arith.mulf %58, %57 : vector<8x128xf32>
    %60 = math.tanh %59 : vector<8x128xf32>
    %cst_27 = arith.constant 1.000000e+00 : f32
    %61 = vector.broadcast %cst_27 : f32 to vector<8x128xf32>
    %62 = arith.addf %60, %61 : vector<8x128xf32>
    %cst_28 = arith.constant 5.000000e-01 : f32
    %63 = vector.broadcast %cst_28 : f32 to vector<8x128xf32>
    %64 = arith.mulf %63, %62 : vector<8x128xf32>
    %65 = vector.extract_strided_slice %47 {offsets = [0, 256], sizes = [8, 128], strides = [1, 1]} : vector<8x512xf32> to vector<8x128xf32>
    %66 = math.tanh %65 : vector<8x128xf32>
    %67 = arith.mulf %64, %66 : vector<8x128xf32>
    %68 = arith.addf %56, %67 : vector<8x128xf32>
    %69 = vector.extract_strided_slice %47 {offsets = [0, 384], sizes = [8, 128], strides = [1, 1]} : vector<8x512xf32> to vector<8x128xf32>
    %cst_29 = arith.constant 5.000000e-01 : f32
    %70 = vector.broadcast %cst_29 : f32 to vector<8x128xf32>
    %71 = arith.mulf %70, %69 : vector<8x128xf32>
    %72 = math.tanh %71 : vector<8x128xf32>
    %cst_30 = arith.constant 1.000000e+00 : f32
    %73 = vector.broadcast %cst_30 : f32 to vector<8x128xf32>
    %74 = arith.addf %72, %73 : vector<8x128xf32>
    %cst_31 = arith.constant 5.000000e-01 : f32
    %75 = vector.broadcast %cst_31 : f32 to vector<8x128xf32>
    %76 = arith.mulf %75, %74 : vector<8x128xf32>
    %77 = math.tanh %68 : vector<8x128xf32>
    %78 = arith.mulf %76, %77 : vector<8x128xf32>
    %c2_i32 = arith.constant 2 : i32
    %79 = arith.index_cast %c2_i32 : i32 to index
    %c0_32 = arith.constant 0 : index
    %c0_33 = arith.constant 0 : index
    %80 = vector.load %arg1[%79, %c0_32, %c0_33] : memref<16x8x512xf32, #tpu.memory_space<vmem>>, vector<1x8x512xf32>
    %81 = vector.shape_cast %80 : vector<1x8x512xf32> to vector<8x512xf32>
    %c0_34 = arith.constant 0 : index
    %c0_35 = arith.constant 0 : index
    %82 = vector.load %arg4[%c0_34, %c0_35] : memref<128x512xf32, #tpu.memory_space<vmem>>, vector<128x512xf32>
    %cst_36 = arith.constant dense<0.000000e+00> : vector<8x512xf32>
    %83 = tpu.matmul %78, %82, %cst_36 {dimension_numbers = #tpu.dot_dimension_numbers<[1], [0], [0], [1], [0, 0, 1, 1], [], []>} : vector<8x128xf32>, vector<128x512xf32>, vector<8x512xf32> -> vector<8x512xf32>
    %84 = arith.addf %81, %83 : vector<8x512xf32>
    %85 = vector.extract_strided_slice %84 {offsets = [0, 128], sizes = [8, 128], strides = [1, 1]} : vector<8x512xf32> to vector<8x128xf32>
    %cst_37 = arith.constant 5.000000e-01 : f32
    %86 = vector.broadcast %cst_37 : f32 to vector<8x128xf32>
    %87 = arith.mulf %86, %85 : vector<8x128xf32>
    %88 = math.tanh %87 : vector<8x128xf32>
    %cst_38 = arith.constant 1.000000e+00 : f32
    %89 = vector.broadcast %cst_38 : f32 to vector<8x128xf32>
    %90 = arith.addf %88, %89 : vector<8x128xf32>
    %cst_39 = arith.constant 5.000000e-01 : f32
    %91 = vector.broadcast %cst_39 : f32 to vector<8x128xf32>
    %92 = arith.mulf %91, %90 : vector<8x128xf32>
    %93 = arith.mulf %92, %68 : vector<8x128xf32>
    %94 = vector.extract_strided_slice %84 {offsets = [0, 0], sizes = [8, 128], strides = [1, 1]} : vector<8x512xf32> to vector<8x128xf32>
    %cst_40 = arith.constant 5.000000e-01 : f32
    %95 = vector.broadcast %cst_40 : f32 to vector<8x128xf32>
    %96 = arith.mulf %95, %94 : vector<8x128xf32>
    %97 = math.tanh %96 : vector<8x128xf32>
    %cst_41 = arith.constant 1.000000e+00 : f32
    %98 = vector.broadcast %cst_41 : f32 to vector<8x128xf32>
    %99 = arith.addf %97, %98 : vector<8x128xf32>
    %cst_42 = arith.constant 5.000000e-01 : f32
    %100 = vector.broadcast %cst_42 : f32 to vector<8x128xf32>
    %101 = arith.mulf %100, %99 : vector<8x128xf32>
    %102 = vector.extract_strided_slice %84 {offsets = [0, 256], sizes = [8, 128], strides = [1, 1]} : vector<8x512xf32> to vector<8x128xf32>
    %103 = math.tanh %102 : vector<8x128xf32>
    %104 = arith.mulf %101, %103 : vector<8x128xf32>
    %105 = arith.addf %93, %104 : vector<8x128xf32>
    %106 = vector.extract_strided_slice %84 {offsets = [0, 384], sizes = [8, 128], strides = [1, 1]} : vector<8x512xf32> to vector<8x128xf32>
    %cst_43 = arith.constant 5.000000e-01 : f32
    %107 = vector.broadcast %cst_43 : f32 to vector<8x128xf32>
    %108 = arith.mulf %107, %106 : vector<8x128xf32>
    %109 = math.tanh %108 : vector<8x128xf32>
    %cst_44 = arith.constant 1.000000e+00 : f32
    %110 = vector.broadcast %cst_44 : f32 to vector<8x128xf32>
    %111 = arith.addf %109, %110 : vector<8x128xf32>
    %cst_45 = arith.constant 5.000000e-01 : f32
    %112 = vector.broadcast %cst_45 : f32 to vector<8x128xf32>
    %113 = arith.mulf %112, %111 : vector<8x128xf32>
    %114 = math.tanh %105 : vector<8x128xf32>
    %115 = arith.mulf %113, %114 : vector<8x128xf32>
    %c3_i32 = arith.constant 3 : i32
    %116 = arith.index_cast %c3_i32 : i32 to index
    %c0_46 = arith.constant 0 : index
    %c0_47 = arith.constant 0 : index
    %117 = vector.load %arg1[%116, %c0_46, %c0_47] : memref<16x8x512xf32, #tpu.memory_space<vmem>>, vector<1x8x512xf32>
    %118 = vector.shape_cast %117 : vector<1x8x512xf32> to vector<8x512xf32>
    %c0_48 = arith.constant 0 : index
    %c0_49 = arith.constant 0 : index
    %119 = vector.load %arg4[%c0_48, %c0_49] : memref<128x512xf32, #tpu.memory_space<vmem>>, vector<128x512xf32>
    %cst_50 = arith.constant dense<0.000000e+00> : vector<8x512xf32>
    %120 = tpu.matmul %115, %119, %cst_50 {dimension_numbers = #tpu.dot_dimension_numbers<[1], [0], [0], [1], [0, 0, 1, 1], [], []>} : vector<8x128xf32>, vector<128x512xf32>, vector<8x512xf32> -> vector<8x512xf32>
    %121 = arith.addf %118, %120 : vector<8x512xf32>
    %122 = vector.extract_strided_slice %121 {offsets = [0, 128], sizes = [8, 128], strides = [1, 1]} : vector<8x512xf32> to vector<8x128xf32>
    %cst_51 = arith.constant 5.000000e-01 : f32
    %123 = vector.broadcast %cst_51 : f32 to vector<8x128xf32>
    %124 = arith.mulf %123, %122 : vector<8x128xf32>
    %125 = math.tanh %124 : vector<8x128xf32>
    %cst_52 = arith.constant 1.000000e+00 : f32
    %126 = vector.broadcast %cst_52 : f32 to vector<8x128xf32>
    %127 = arith.addf %125, %126 : vector<8x128xf32>
    %cst_53 = arith.constant 5.000000e-01 : f32
    %128 = vector.broadcast %cst_53 : f32 to vector<8x128xf32>
    %129 = arith.mulf %128, %127 : vector<8x128xf32>
    %130 = arith.mulf %129, %105 : vector<8x128xf32>
    %131 = vector.extract_strided_slice %121 {offsets = [0, 0], sizes = [8, 128], strides = [1, 1]} : vector<8x512xf32> to vector<8x128xf32>
    %cst_54 = arith.constant 5.000000e-01 : f32
    %132 = vector.broadcast %cst_54 : f32 to vector<8x128xf32>
    %133 = arith.mulf %132, %131 : vector<8x128xf32>
    %134 = math.tanh %133 : vector<8x128xf32>
    %cst_55 = arith.constant 1.000000e+00 : f32
    %135 = vector.broadcast %cst_55 : f32 to vector<8x128xf32>
    %136 = arith.addf %134, %135 : vector<8x128xf32>
    %cst_56 = arith.constant 5.000000e-01 : f32
    %137 = vector.broadcast %cst_56 : f32 to vector<8x128xf32>
    %138 = arith.mulf %137, %136 : vector<8x128xf32>
    %139 = vector.extract_strided_slice %121 {offsets = [0, 256], sizes = [8, 128], strides = [1, 1]} : vector<8x512xf32> to vector<8x128xf32>
    %140 = math.tanh %139 : vector<8x128xf32>
    %141 = arith.mulf %138, %140 : vector<8x128xf32>
    %142 = arith.addf %130, %141 : vector<8x128xf32>
    %143 = vector.extract_strided_slice %121 {offsets = [0, 384], sizes = [8, 128], strides = [1, 1]} : vector<8x512xf32> to vector<8x128xf32>
    %cst_57 = arith.constant 5.000000e-01 : f32
    %144 = vector.broadcast %cst_57 : f32 to vector<8x128xf32>
    %145 = arith.mulf %144, %143 : vector<8x128xf32>
    %146 = math.tanh %145 : vector<8x128xf32>
    %cst_58 = arith.constant 1.000000e+00 : f32
    %147 = vector.broadcast %cst_58 : f32 to vector<8x128xf32>
    %148 = arith.addf %146, %147 : vector<8x128xf32>
    %cst_59 = arith.constant 5.000000e-01 : f32
    %149 = vector.broadcast %cst_59 : f32 to vector<8x128xf32>
    %150 = arith.mulf %149, %148 : vector<8x128xf32>
    %151 = math.tanh %142 : vector<8x128xf32>
    %152 = arith.mulf %150, %151 : vector<8x128xf32>
    %c4_i32 = arith.constant 4 : i32
    %153 = arith.index_cast %c4_i32 : i32 to index
    %c0_60 = arith.constant 0 : index
    %c0_61 = arith.constant 0 : index
    %154 = vector.load %arg1[%153, %c0_60, %c0_61] : memref<16x8x512xf32, #tpu.memory_space<vmem>>, vector<1x8x512xf32>
    %155 = vector.shape_cast %154 : vector<1x8x512xf32> to vector<8x512xf32>
    %c0_62 = arith.constant 0 : index
    %c0_63 = arith.constant 0 : index
    %156 = vector.load %arg4[%c0_62, %c0_63] : memref<128x512xf32, #tpu.memory_space<vmem>>, vector<128x512xf32>
    %cst_64 = arith.constant dense<0.000000e+00> : vector<8x512xf32>
    %157 = tpu.matmul %152, %156, %cst_64 {dimension_numbers = #tpu.dot_dimension_numbers<[1], [0], [0], [1], [0, 0, 1, 1], [], []>} : vector<8x128xf32>, vector<128x512xf32>, vector<8x512xf32> -> vector<8x512xf32>
    %158 = arith.addf %155, %157 : vector<8x512xf32>
    %159 = vector.extract_strided_slice %158 {offsets = [0, 128], sizes = [8, 128], strides = [1, 1]} : vector<8x512xf32> to vector<8x128xf32>
    %cst_65 = arith.constant 5.000000e-01 : f32
    %160 = vector.broadcast %cst_65 : f32 to vector<8x128xf32>
    %161 = arith.mulf %160, %159 : vector<8x128xf32>
    %162 = math.tanh %161 : vector<8x128xf32>
    %cst_66 = arith.constant 1.000000e+00 : f32
    %163 = vector.broadcast %cst_66 : f32 to vector<8x128xf32>
    %164 = arith.addf %162, %163 : vector<8x128xf32>
    %cst_67 = arith.constant 5.000000e-01 : f32
    %165 = vector.broadcast %cst_67 : f32 to vector<8x128xf32>
    %166 = arith.mulf %165, %164 : vector<8x128xf32>
    %167 = arith.mulf %166, %142 : vector<8x128xf32>
    %168 = vector.extract_strided_slice %158 {offsets = [0, 0], sizes = [8, 128], strides = [1, 1]} : vector<8x512xf32> to vector<8x128xf32>
    %cst_68 = arith.constant 5.000000e-01 : f32
    %169 = vector.broadcast %cst_68 : f32 to vector<8x128xf32>
    %170 = arith.mulf %169, %168 : vector<8x128xf32>
    %171 = math.tanh %170 : vector<8x128xf32>
    %cst_69 = arith.constant 1.000000e+00 : f32
    %172 = vector.broadcast %cst_69 : f32 to vector<8x128xf32>
    %173 = arith.addf %171, %172 : vector<8x128xf32>
    %cst_70 = arith.constant 5.000000e-01 : f32
    %174 = vector.broadcast %cst_70 : f32 to vector<8x128xf32>
    %175 = arith.mulf %174, %173 : vector<8x128xf32>
    %176 = vector.extract_strided_slice %158 {offsets = [0, 256], sizes = [8, 128], strides = [1, 1]} : vector<8x512xf32> to vector<8x128xf32>
    %177 = math.tanh %176 : vector<8x128xf32>
    %178 = arith.mulf %175, %177 : vector<8x128xf32>
    %179 = arith.addf %167, %178 : vector<8x128xf32>
    %180 = vector.extract_strided_slice %158 {offsets = [0, 384], sizes = [8, 128], strides = [1, 1]} : vector<8x512xf32> to vector<8x128xf32>
    %cst_71 = arith.constant 5.000000e-01 : f32
    %181 = vector.broadcast %cst_71 : f32 to vector<8x128xf32>
    %182 = arith.mulf %181, %180 : vector<8x128xf32>
    %183 = math.tanh %182 : vector<8x128xf32>
    %cst_72 = arith.constant 1.000000e+00 : f32
    %184 = vector.broadcast %cst_72 : f32 to vector<8x128xf32>
    %185 = arith.addf %183, %184 : vector<8x128xf32>
    %cst_73 = arith.constant 5.000000e-01 : f32
    %186 = vector.broadcast %cst_73 : f32 to vector<8x128xf32>
    %187 = arith.mulf %186, %185 : vector<8x128xf32>
    %188 = math.tanh %179 : vector<8x128xf32>
    %189 = arith.mulf %187, %188 : vector<8x128xf32>
    %c5_i32 = arith.constant 5 : i32
    %190 = arith.index_cast %c5_i32 : i32 to index
    %c0_74 = arith.constant 0 : index
    %c0_75 = arith.constant 0 : index
    %191 = vector.load %arg1[%190, %c0_74, %c0_75] : memref<16x8x512xf32, #tpu.memory_space<vmem>>, vector<1x8x512xf32>
    %192 = vector.shape_cast %191 : vector<1x8x512xf32> to vector<8x512xf32>
    %c0_76 = arith.constant 0 : index
    %c0_77 = arith.constant 0 : index
    %193 = vector.load %arg4[%c0_76, %c0_77] : memref<128x512xf32, #tpu.memory_space<vmem>>, vector<128x512xf32>
    %cst_78 = arith.constant dense<0.000000e+00> : vector<8x512xf32>
    %194 = tpu.matmul %189, %193, %cst_78 {dimension_numbers = #tpu.dot_dimension_numbers<[1], [0], [0], [1], [0, 0, 1, 1], [], []>} : vector<8x128xf32>, vector<128x512xf32>, vector<8x512xf32> -> vector<8x512xf32>
    %195 = arith.addf %192, %194 : vector<8x512xf32>
    %196 = vector.extract_strided_slice %195 {offsets = [0, 128], sizes = [8, 128], strides = [1, 1]} : vector<8x512xf32> to vector<8x128xf32>
    %cst_79 = arith.constant 5.000000e-01 : f32
    %197 = vector.broadcast %cst_79 : f32 to vector<8x128xf32>
    %198 = arith.mulf %197, %196 : vector<8x128xf32>
    %199 = math.tanh %198 : vector<8x128xf32>
    %cst_80 = arith.constant 1.000000e+00 : f32
    %200 = vector.broadcast %cst_80 : f32 to vector<8x128xf32>
    %201 = arith.addf %199, %200 : vector<8x128xf32>
    %cst_81 = arith.constant 5.000000e-01 : f32
    %202 = vector.broadcast %cst_81 : f32 to vector<8x128xf32>
    %203 = arith.mulf %202, %201 : vector<8x128xf32>
    %204 = arith.mulf %203, %179 : vector<8x128xf32>
    %205 = vector.extract_strided_slice %195 {offsets = [0, 0], sizes = [8, 128], strides = [1, 1]} : vector<8x512xf32> to vector<8x128xf32>
    %cst_82 = arith.constant 5.000000e-01 : f32
    %206 = vector.broadcast %cst_82 : f32 to vector<8x128xf32>
    %207 = arith.mulf %206, %205 : vector<8x128xf32>
    %208 = math.tanh %207 : vector<8x128xf32>
    %cst_83 = arith.constant 1.000000e+00 : f32
    %209 = vector.broadcast %cst_83 : f32 to vector<8x128xf32>
    %210 = arith.addf %208, %209 : vector<8x128xf32>
    %cst_84 = arith.constant 5.000000e-01 : f32
    %211 = vector.broadcast %cst_84 : f32 to vector<8x128xf32>
    %212 = arith.mulf %211, %210 : vector<8x128xf32>
    %213 = vector.extract_strided_slice %195 {offsets = [0, 256], sizes = [8, 128], strides = [1, 1]} : vector<8x512xf32> to vector<8x128xf32>
    %214 = math.tanh %213 : vector<8x128xf32>
    %215 = arith.mulf %212, %214 : vector<8x128xf32>
    %216 = arith.addf %204, %215 : vector<8x128xf32>
    %217 = vector.extract_strided_slice %195 {offsets = [0, 384], sizes = [8, 128], strides = [1, 1]} : vector<8x512xf32> to vector<8x128xf32>
    %cst_85 = arith.constant 5.000000e-01 : f32
    %218 = vector.broadcast %cst_85 : f32 to vector<8x128xf32>
    %219 = arith.mulf %218, %217 : vector<8x128xf32>
    %220 = math.tanh %219 : vector<8x128xf32>
    %cst_86 = arith.constant 1.000000e+00 : f32
    %221 = vector.broadcast %cst_86 : f32 to vector<8x128xf32>
    %222 = arith.addf %220, %221 : vector<8x128xf32>
    %cst_87 = arith.constant 5.000000e-01 : f32
    %223 = vector.broadcast %cst_87 : f32 to vector<8x128xf32>
    %224 = arith.mulf %223, %222 : vector<8x128xf32>
    %225 = math.tanh %216 : vector<8x128xf32>
    %226 = arith.mulf %224, %225 : vector<8x128xf32>
    %c6_i32 = arith.constant 6 : i32
    %227 = arith.index_cast %c6_i32 : i32 to index
    %c0_88 = arith.constant 0 : index
    %c0_89 = arith.constant 0 : index
    %228 = vector.load %arg1[%227, %c0_88, %c0_89] : memref<16x8x512xf32, #tpu.memory_space<vmem>>, vector<1x8x512xf32>
    %229 = vector.shape_cast %228 : vector<1x8x512xf32> to vector<8x512xf32>
    %c0_90 = arith.constant 0 : index
    %c0_91 = arith.constant 0 : index
    %230 = vector.load %arg4[%c0_90, %c0_91] : memref<128x512xf32, #tpu.memory_space<vmem>>, vector<128x512xf32>
    %cst_92 = arith.constant dense<0.000000e+00> : vector<8x512xf32>
    %231 = tpu.matmul %226, %230, %cst_92 {dimension_numbers = #tpu.dot_dimension_numbers<[1], [0], [0], [1], [0, 0, 1, 1], [], []>} : vector<8x128xf32>, vector<128x512xf32>, vector<8x512xf32> -> vector<8x512xf32>
    %232 = arith.addf %229, %231 : vector<8x512xf32>
    %233 = vector.extract_strided_slice %232 {offsets = [0, 128], sizes = [8, 128], strides = [1, 1]} : vector<8x512xf32> to vector<8x128xf32>
    %cst_93 = arith.constant 5.000000e-01 : f32
    %234 = vector.broadcast %cst_93 : f32 to vector<8x128xf32>
    %235 = arith.mulf %234, %233 : vector<8x128xf32>
    %236 = math.tanh %235 : vector<8x128xf32>
    %cst_94 = arith.constant 1.000000e+00 : f32
    %237 = vector.broadcast %cst_94 : f32 to vector<8x128xf32>
    %238 = arith.addf %236, %237 : vector<8x128xf32>
    %cst_95 = arith.constant 5.000000e-01 : f32
    %239 = vector.broadcast %cst_95 : f32 to vector<8x128xf32>
    %240 = arith.mulf %239, %238 : vector<8x128xf32>
    %241 = arith.mulf %240, %216 : vector<8x128xf32>
    %242 = vector.extract_strided_slice %232 {offsets = [0, 0], sizes = [8, 128], strides = [1, 1]} : vector<8x512xf32> to vector<8x128xf32>
    %cst_96 = arith.constant 5.000000e-01 : f32
    %243 = vector.broadcast %cst_96 : f32 to vector<8x128xf32>
    %244 = arith.mulf %243, %242 : vector<8x128xf32>
    %245 = math.tanh %244 : vector<8x128xf32>
    %cst_97 = arith.constant 1.000000e+00 : f32
    %246 = vector.broadcast %cst_97 : f32 to vector<8x128xf32>
    %247 = arith.addf %245, %246 : vector<8x128xf32>
    %cst_98 = arith.constant 5.000000e-01 : f32
    %248 = vector.broadcast %cst_98 : f32 to vector<8x128xf32>
    %249 = arith.mulf %248, %247 : vector<8x128xf32>
    %250 = vector.extract_strided_slice %232 {offsets = [0, 256], sizes = [8, 128], strides = [1, 1]} : vector<8x512xf32> to vector<8x128xf32>
    %251 = math.tanh %250 : vector<8x128xf32>
    %252 = arith.mulf %249, %251 : vector<8x128xf32>
    %253 = arith.addf %241, %252 : vector<8x128xf32>
    %254 = vector.extract_strided_slice %232 {offsets = [0, 384], sizes = [8, 128], strides = [1, 1]} : vector<8x512xf32> to vector<8x128xf32>
    %cst_99 = arith.constant 5.000000e-01 : f32
    %255 = vector.broadcast %cst_99 : f32 to vector<8x128xf32>
    %256 = arith.mulf %255, %254 : vector<8x128xf32>
    %257 = math.tanh %256 : vector<8x128xf32>
    %cst_100 = arith.constant 1.000000e+00 : f32
    %258 = vector.broadcast %cst_100 : f32 to vector<8x128xf32>
    %259 = arith.addf %257, %258 : vector<8x128xf32>
    %cst_101 = arith.constant 5.000000e-01 : f32
    %260 = vector.broadcast %cst_101 : f32 to vector<8x128xf32>
    %261 = arith.mulf %260, %259 : vector<8x128xf32>
    %262 = math.tanh %253 : vector<8x128xf32>
    %263 = arith.mulf %261, %262 : vector<8x128xf32>
    %c7_i32 = arith.constant 7 : i32
    %264 = arith.index_cast %c7_i32 : i32 to index
    %c0_102 = arith.constant 0 : index
    %c0_103 = arith.constant 0 : index
    %265 = vector.load %arg1[%264, %c0_102, %c0_103] : memref<16x8x512xf32, #tpu.memory_space<vmem>>, vector<1x8x512xf32>
    %266 = vector.shape_cast %265 : vector<1x8x512xf32> to vector<8x512xf32>
    %c0_104 = arith.constant 0 : index
    %c0_105 = arith.constant 0 : index
    %267 = vector.load %arg4[%c0_104, %c0_105] : memref<128x512xf32, #tpu.memory_space<vmem>>, vector<128x512xf32>
    %cst_106 = arith.constant dense<0.000000e+00> : vector<8x512xf32>
    %268 = tpu.matmul %263, %267, %cst_106 {dimension_numbers = #tpu.dot_dimension_numbers<[1], [0], [0], [1], [0, 0, 1, 1], [], []>} : vector<8x128xf32>, vector<128x512xf32>, vector<8x512xf32> -> vector<8x512xf32>
    %269 = arith.addf %266, %268 : vector<8x512xf32>
    %270 = vector.extract_strided_slice %269 {offsets = [0, 128], sizes = [8, 128], strides = [1, 1]} : vector<8x512xf32> to vector<8x128xf32>
    %cst_107 = arith.constant 5.000000e-01 : f32
    %271 = vector.broadcast %cst_107 : f32 to vector<8x128xf32>
    %272 = arith.mulf %271, %270 : vector<8x128xf32>
    %273 = math.tanh %272 : vector<8x128xf32>
    %cst_108 = arith.constant 1.000000e+00 : f32
    %274 = vector.broadcast %cst_108 : f32 to vector<8x128xf32>
    %275 = arith.addf %273, %274 : vector<8x128xf32>
    %cst_109 = arith.constant 5.000000e-01 : f32
    %276 = vector.broadcast %cst_109 : f32 to vector<8x128xf32>
    %277 = arith.mulf %276, %275 : vector<8x128xf32>
    %278 = arith.mulf %277, %253 : vector<8x128xf32>
    %279 = vector.extract_strided_slice %269 {offsets = [0, 0], sizes = [8, 128], strides = [1, 1]} : vector<8x512xf32> to vector<8x128xf32>
    %cst_110 = arith.constant 5.000000e-01 : f32
    %280 = vector.broadcast %cst_110 : f32 to vector<8x128xf32>
    %281 = arith.mulf %280, %279 : vector<8x128xf32>
    %282 = math.tanh %281 : vector<8x128xf32>
    %cst_111 = arith.constant 1.000000e+00 : f32
    %283 = vector.broadcast %cst_111 : f32 to vector<8x128xf32>
    %284 = arith.addf %282, %283 : vector<8x128xf32>
    %cst_112 = arith.constant 5.000000e-01 : f32
    %285 = vector.broadcast %cst_112 : f32 to vector<8x128xf32>
    %286 = arith.mulf %285, %284 : vector<8x128xf32>
    %287 = vector.extract_strided_slice %269 {offsets = [0, 256], sizes = [8, 128], strides = [1, 1]} : vector<8x512xf32> to vector<8x128xf32>
    %288 = math.tanh %287 : vector<8x128xf32>
    %289 = arith.mulf %286, %288 : vector<8x128xf32>
    %290 = arith.addf %278, %289 : vector<8x128xf32>
    %291 = vector.extract_strided_slice %269 {offsets = [0, 384], sizes = [8, 128], strides = [1, 1]} : vector<8x512xf32> to vector<8x128xf32>
    %cst_113 = arith.constant 5.000000e-01 : f32
    %292 = vector.broadcast %cst_113 : f32 to vector<8x128xf32>
    %293 = arith.mulf %292, %291 : vector<8x128xf32>
    %294 = math.tanh %293 : vector<8x128xf32>
    %cst_114 = arith.constant 1.000000e+00 : f32
    %295 = vector.broadcast %cst_114 : f32 to vector<8x128xf32>
    %296 = arith.addf %294, %295 : vector<8x128xf32>
    %cst_115 = arith.constant 5.000000e-01 : f32
    %297 = vector.broadcast %cst_115 : f32 to vector<8x128xf32>
    %298 = arith.mulf %297, %296 : vector<8x128xf32>
    %299 = math.tanh %290 : vector<8x128xf32>
    %300 = arith.mulf %298, %299 : vector<8x128xf32>
    %c8_i32 = arith.constant 8 : i32
    %301 = arith.index_cast %c8_i32 : i32 to index
    %c0_116 = arith.constant 0 : index
    %c0_117 = arith.constant 0 : index
    %302 = vector.load %arg1[%301, %c0_116, %c0_117] : memref<16x8x512xf32, #tpu.memory_space<vmem>>, vector<1x8x512xf32>
    %303 = vector.shape_cast %302 : vector<1x8x512xf32> to vector<8x512xf32>
    %c0_118 = arith.constant 0 : index
    %c0_119 = arith.constant 0 : index
    %304 = vector.load %arg4[%c0_118, %c0_119] : memref<128x512xf32, #tpu.memory_space<vmem>>, vector<128x512xf32>
    %cst_120 = arith.constant dense<0.000000e+00> : vector<8x512xf32>
    %305 = tpu.matmul %300, %304, %cst_120 {dimension_numbers = #tpu.dot_dimension_numbers<[1], [0], [0], [1], [0, 0, 1, 1], [], []>} : vector<8x128xf32>, vector<128x512xf32>, vector<8x512xf32> -> vector<8x512xf32>
    %306 = arith.addf %303, %305 : vector<8x512xf32>
    %307 = vector.extract_strided_slice %306 {offsets = [0, 128], sizes = [8, 128], strides = [1, 1]} : vector<8x512xf32> to vector<8x128xf32>
    %cst_121 = arith.constant 5.000000e-01 : f32
    %308 = vector.broadcast %cst_121 : f32 to vector<8x128xf32>
    %309 = arith.mulf %308, %307 : vector<8x128xf32>
    %310 = math.tanh %309 : vector<8x128xf32>
    %cst_122 = arith.constant 1.000000e+00 : f32
    %311 = vector.broadcast %cst_122 : f32 to vector<8x128xf32>
    %312 = arith.addf %310, %311 : vector<8x128xf32>
    %cst_123 = arith.constant 5.000000e-01 : f32
    %313 = vector.broadcast %cst_123 : f32 to vector<8x128xf32>
    %314 = arith.mulf %313, %312 : vector<8x128xf32>
    %315 = arith.mulf %314, %290 : vector<8x128xf32>
    %316 = vector.extract_strided_slice %306 {offsets = [0, 0], sizes = [8, 128], strides = [1, 1]} : vector<8x512xf32> to vector<8x128xf32>
    %cst_124 = arith.constant 5.000000e-01 : f32
    %317 = vector.broadcast %cst_124 : f32 to vector<8x128xf32>
    %318 = arith.mulf %317, %316 : vector<8x128xf32>
    %319 = math.tanh %318 : vector<8x128xf32>
    %cst_125 = arith.constant 1.000000e+00 : f32
    %320 = vector.broadcast %cst_125 : f32 to vector<8x128xf32>
    %321 = arith.addf %319, %320 : vector<8x128xf32>
    %cst_126 = arith.constant 5.000000e-01 : f32
    %322 = vector.broadcast %cst_126 : f32 to vector<8x128xf32>
    %323 = arith.mulf %322, %321 : vector<8x128xf32>
    %324 = vector.extract_strided_slice %306 {offsets = [0, 256], sizes = [8, 128], strides = [1, 1]} : vector<8x512xf32> to vector<8x128xf32>
    %325 = math.tanh %324 : vector<8x128xf32>
    %326 = arith.mulf %323, %325 : vector<8x128xf32>
    %327 = arith.addf %315, %326 : vector<8x128xf32>
    %328 = vector.extract_strided_slice %306 {offsets = [0, 384], sizes = [8, 128], strides = [1, 1]} : vector<8x512xf32> to vector<8x128xf32>
    %cst_127 = arith.constant 5.000000e-01 : f32
    %329 = vector.broadcast %cst_127 : f32 to vector<8x128xf32>
    %330 = arith.mulf %329, %328 : vector<8x128xf32>
    %331 = math.tanh %330 : vector<8x128xf32>
    %cst_128 = arith.constant 1.000000e+00 : f32
    %332 = vector.broadcast %cst_128 : f32 to vector<8x128xf32>
    %333 = arith.addf %331, %332 : vector<8x128xf32>
    %cst_129 = arith.constant 5.000000e-01 : f32
    %334 = vector.broadcast %cst_129 : f32 to vector<8x128xf32>
    %335 = arith.mulf %334, %333 : vector<8x128xf32>
    %336 = math.tanh %327 : vector<8x128xf32>
    %337 = arith.mulf %335, %336 : vector<8x128xf32>
    %c9_i32 = arith.constant 9 : i32
    %338 = arith.index_cast %c9_i32 : i32 to index
    %c0_130 = arith.constant 0 : index
    %c0_131 = arith.constant 0 : index
    %339 = vector.load %arg1[%338, %c0_130, %c0_131] : memref<16x8x512xf32, #tpu.memory_space<vmem>>, vector<1x8x512xf32>
    %340 = vector.shape_cast %339 : vector<1x8x512xf32> to vector<8x512xf32>
    %c0_132 = arith.constant 0 : index
    %c0_133 = arith.constant 0 : index
    %341 = vector.load %arg4[%c0_132, %c0_133] : memref<128x512xf32, #tpu.memory_space<vmem>>, vector<128x512xf32>
    %cst_134 = arith.constant dense<0.000000e+00> : vector<8x512xf32>
    %342 = tpu.matmul %337, %341, %cst_134 {dimension_numbers = #tpu.dot_dimension_numbers<[1], [0], [0], [1], [0, 0, 1, 1], [], []>} : vector<8x128xf32>, vector<128x512xf32>, vector<8x512xf32> -> vector<8x512xf32>
    %343 = arith.addf %340, %342 : vector<8x512xf32>
    %344 = vector.extract_strided_slice %343 {offsets = [0, 128], sizes = [8, 128], strides = [1, 1]} : vector<8x512xf32> to vector<8x128xf32>
    %cst_135 = arith.constant 5.000000e-01 : f32
    %345 = vector.broadcast %cst_135 : f32 to vector<8x128xf32>
    %346 = arith.mulf %345, %344 : vector<8x128xf32>
    %347 = math.tanh %346 : vector<8x128xf32>
    %cst_136 = arith.constant 1.000000e+00 : f32
    %348 = vector.broadcast %cst_136 : f32 to vector<8x128xf32>
    %349 = arith.addf %347, %348 : vector<8x128xf32>
    %cst_137 = arith.constant 5.000000e-01 : f32
    %350 = vector.broadcast %cst_137 : f32 to vector<8x128xf32>
    %351 = arith.mulf %350, %349 : vector<8x128xf32>
    %352 = arith.mulf %351, %327 : vector<8x128xf32>
    %353 = vector.extract_strided_slice %343 {offsets = [0, 0], sizes = [8, 128], strides = [1, 1]} : vector<8x512xf32> to vector<8x128xf32>
    %cst_138 = arith.constant 5.000000e-01 : f32
    %354 = vector.broadcast %cst_138 : f32 to vector<8x128xf32>
    %355 = arith.mulf %354, %353 : vector<8x128xf32>
    %356 = math.tanh %355 : vector<8x128xf32>
    %cst_139 = arith.constant 1.000000e+00 : f32
    %357 = vector.broadcast %cst_139 : f32 to vector<8x128xf32>
    %358 = arith.addf %356, %357 : vector<8x128xf32>
    %cst_140 = arith.constant 5.000000e-01 : f32
    %359 = vector.broadcast %cst_140 : f32 to vector<8x128xf32>
    %360 = arith.mulf %359, %358 : vector<8x128xf32>
    %361 = vector.extract_strided_slice %343 {offsets = [0, 256], sizes = [8, 128], strides = [1, 1]} : vector<8x512xf32> to vector<8x128xf32>
    %362 = math.tanh %361 : vector<8x128xf32>
    %363 = arith.mulf %360, %362 : vector<8x128xf32>
    %364 = arith.addf %352, %363 : vector<8x128xf32>
    %365 = vector.extract_strided_slice %343 {offsets = [0, 384], sizes = [8, 128], strides = [1, 1]} : vector<8x512xf32> to vector<8x128xf32>
    %cst_141 = arith.constant 5.000000e-01 : f32
    %366 = vector.broadcast %cst_141 : f32 to vector<8x128xf32>
    %367 = arith.mulf %366, %365 : vector<8x128xf32>
    %368 = math.tanh %367 : vector<8x128xf32>
    %cst_142 = arith.constant 1.000000e+00 : f32
    %369 = vector.broadcast %cst_142 : f32 to vector<8x128xf32>
    %370 = arith.addf %368, %369 : vector<8x128xf32>
    %cst_143 = arith.constant 5.000000e-01 : f32
    %371 = vector.broadcast %cst_143 : f32 to vector<8x128xf32>
    %372 = arith.mulf %371, %370 : vector<8x128xf32>
    %373 = math.tanh %364 : vector<8x128xf32>
    %374 = arith.mulf %372, %373 : vector<8x128xf32>
    %c10_i32 = arith.constant 10 : i32
    %375 = arith.index_cast %c10_i32 : i32 to index
    %c0_144 = arith.constant 0 : index
    %c0_145 = arith.constant 0 : index
    %376 = vector.load %arg1[%375, %c0_144, %c0_145] : memref<16x8x512xf32, #tpu.memory_space<vmem>>, vector<1x8x512xf32>
    %377 = vector.shape_cast %376 : vector<1x8x512xf32> to vector<8x512xf32>
    %c0_146 = arith.constant 0 : index
    %c0_147 = arith.constant 0 : index
    %378 = vector.load %arg4[%c0_146, %c0_147] : memref<128x512xf32, #tpu.memory_space<vmem>>, vector<128x512xf32>
    %cst_148 = arith.constant dense<0.000000e+00> : vector<8x512xf32>
    %379 = tpu.matmul %374, %378, %cst_148 {dimension_numbers = #tpu.dot_dimension_numbers<[1], [0], [0], [1], [0, 0, 1, 1], [], []>} : vector<8x128xf32>, vector<128x512xf32>, vector<8x512xf32> -> vector<8x512xf32>
    %380 = arith.addf %377, %379 : vector<8x512xf32>
    %381 = vector.extract_strided_slice %380 {offsets = [0, 128], sizes = [8, 128], strides = [1, 1]} : vector<8x512xf32> to vector<8x128xf32>
    %cst_149 = arith.constant 5.000000e-01 : f32
    %382 = vector.broadcast %cst_149 : f32 to vector<8x128xf32>
    %383 = arith.mulf %382, %381 : vector<8x128xf32>
    %384 = math.tanh %383 : vector<8x128xf32>
    %cst_150 = arith.constant 1.000000e+00 : f32
    %385 = vector.broadcast %cst_150 : f32 to vector<8x128xf32>
    %386 = arith.addf %384, %385 : vector<8x128xf32>
    %cst_151 = arith.constant 5.000000e-01 : f32
    %387 = vector.broadcast %cst_151 : f32 to vector<8x128xf32>
    %388 = arith.mulf %387, %386 : vector<8x128xf32>
    %389 = arith.mulf %388, %364 : vector<8x128xf32>
    %390 = vector.extract_strided_slice %380 {offsets = [0, 0], sizes = [8, 128], strides = [1, 1]} : vector<8x512xf32> to vector<8x128xf32>
    %cst_152 = arith.constant 5.000000e-01 : f32
    %391 = vector.broadcast %cst_152 : f32 to vector<8x128xf32>
    %392 = arith.mulf %391, %390 : vector<8x128xf32>
    %393 = math.tanh %392 : vector<8x128xf32>
    %cst_153 = arith.constant 1.000000e+00 : f32
    %394 = vector.broadcast %cst_153 : f32 to vector<8x128xf32>
    %395 = arith.addf %393, %394 : vector<8x128xf32>
    %cst_154 = arith.constant 5.000000e-01 : f32
    %396 = vector.broadcast %cst_154 : f32 to vector<8x128xf32>
    %397 = arith.mulf %396, %395 : vector<8x128xf32>
    %398 = vector.extract_strided_slice %380 {offsets = [0, 256], sizes = [8, 128], strides = [1, 1]} : vector<8x512xf32> to vector<8x128xf32>
    %399 = math.tanh %398 : vector<8x128xf32>
    %400 = arith.mulf %397, %399 : vector<8x128xf32>
    %401 = arith.addf %389, %400 : vector<8x128xf32>
    %402 = vector.extract_strided_slice %380 {offsets = [0, 384], sizes = [8, 128], strides = [1, 1]} : vector<8x512xf32> to vector<8x128xf32>
    %cst_155 = arith.constant 5.000000e-01 : f32
    %403 = vector.broadcast %cst_155 : f32 to vector<8x128xf32>
    %404 = arith.mulf %403, %402 : vector<8x128xf32>
    %405 = math.tanh %404 : vector<8x128xf32>
    %cst_156 = arith.constant 1.000000e+00 : f32
    %406 = vector.broadcast %cst_156 : f32 to vector<8x128xf32>
    %407 = arith.addf %405, %406 : vector<8x128xf32>
    %cst_157 = arith.constant 5.000000e-01 : f32
    %408 = vector.broadcast %cst_157 : f32 to vector<8x128xf32>
    %409 = arith.mulf %408, %407 : vector<8x128xf32>
    %410 = math.tanh %401 : vector<8x128xf32>
    %411 = arith.mulf %409, %410 : vector<8x128xf32>
    %c11_i32 = arith.constant 11 : i32
    %412 = arith.index_cast %c11_i32 : i32 to index
    %c0_158 = arith.constant 0 : index
    %c0_159 = arith.constant 0 : index
    %413 = vector.load %arg1[%412, %c0_158, %c0_159] : memref<16x8x512xf32, #tpu.memory_space<vmem>>, vector<1x8x512xf32>
    %414 = vector.shape_cast %413 : vector<1x8x512xf32> to vector<8x512xf32>
    %c0_160 = arith.constant 0 : index
    %c0_161 = arith.constant 0 : index
    %415 = vector.load %arg4[%c0_160, %c0_161] : memref<128x512xf32, #tpu.memory_space<vmem>>, vector<128x512xf32>
    %cst_162 = arith.constant dense<0.000000e+00> : vector<8x512xf32>
    %416 = tpu.matmul %411, %415, %cst_162 {dimension_numbers = #tpu.dot_dimension_numbers<[1], [0], [0], [1], [0, 0, 1, 1], [], []>} : vector<8x128xf32>, vector<128x512xf32>, vector<8x512xf32> -> vector<8x512xf32>
    %417 = arith.addf %414, %416 : vector<8x512xf32>
    %418 = vector.extract_strided_slice %417 {offsets = [0, 128], sizes = [8, 128], strides = [1, 1]} : vector<8x512xf32> to vector<8x128xf32>
    %cst_163 = arith.constant 5.000000e-01 : f32
    %419 = vector.broadcast %cst_163 : f32 to vector<8x128xf32>
    %420 = arith.mulf %419, %418 : vector<8x128xf32>
    %421 = math.tanh %420 : vector<8x128xf32>
    %cst_164 = arith.constant 1.000000e+00 : f32
    %422 = vector.broadcast %cst_164 : f32 to vector<8x128xf32>
    %423 = arith.addf %421, %422 : vector<8x128xf32>
    %cst_165 = arith.constant 5.000000e-01 : f32
    %424 = vector.broadcast %cst_165 : f32 to vector<8x128xf32>
    %425 = arith.mulf %424, %423 : vector<8x128xf32>
    %426 = arith.mulf %425, %401 : vector<8x128xf32>
    %427 = vector.extract_strided_slice %417 {offsets = [0, 0], sizes = [8, 128], strides = [1, 1]} : vector<8x512xf32> to vector<8x128xf32>
    %cst_166 = arith.constant 5.000000e-01 : f32
    %428 = vector.broadcast %cst_166 : f32 to vector<8x128xf32>
    %429 = arith.mulf %428, %427 : vector<8x128xf32>
    %430 = math.tanh %429 : vector<8x128xf32>
    %cst_167 = arith.constant 1.000000e+00 : f32
    %431 = vector.broadcast %cst_167 : f32 to vector<8x128xf32>
    %432 = arith.addf %430, %431 : vector<8x128xf32>
    %cst_168 = arith.constant 5.000000e-01 : f32
    %433 = vector.broadcast %cst_168 : f32 to vector<8x128xf32>
    %434 = arith.mulf %433, %432 : vector<8x128xf32>
    %435 = vector.extract_strided_slice %417 {offsets = [0, 256], sizes = [8, 128], strides = [1, 1]} : vector<8x512xf32> to vector<8x128xf32>
    %436 = math.tanh %435 : vector<8x128xf32>
    %437 = arith.mulf %434, %436 : vector<8x128xf32>
    %438 = arith.addf %426, %437 : vector<8x128xf32>
    %439 = vector.extract_strided_slice %417 {offsets = [0, 384], sizes = [8, 128], strides = [1, 1]} : vector<8x512xf32> to vector<8x128xf32>
    %cst_169 = arith.constant 5.000000e-01 : f32
    %440 = vector.broadcast %cst_169 : f32 to vector<8x128xf32>
    %441 = arith.mulf %440, %439 : vector<8x128xf32>
    %442 = math.tanh %441 : vector<8x128xf32>
    %cst_170 = arith.constant 1.000000e+00 : f32
    %443 = vector.broadcast %cst_170 : f32 to vector<8x128xf32>
    %444 = arith.addf %442, %443 : vector<8x128xf32>
    %cst_171 = arith.constant 5.000000e-01 : f32
    %445 = vector.broadcast %cst_171 : f32 to vector<8x128xf32>
    %446 = arith.mulf %445, %444 : vector<8x128xf32>
    %447 = math.tanh %438 : vector<8x128xf32>
    %448 = arith.mulf %446, %447 : vector<8x128xf32>
    %c12_i32 = arith.constant 12 : i32
    %449 = arith.index_cast %c12_i32 : i32 to index
    %c0_172 = arith.constant 0 : index
    %c0_173 = arith.constant 0 : index
    %450 = vector.load %arg1[%449, %c0_172, %c0_173] : memref<16x8x512xf32, #tpu.memory_space<vmem>>, vector<1x8x512xf32>
    %451 = vector.shape_cast %450 : vector<1x8x512xf32> to vector<8x512xf32>
    %c0_174 = arith.constant 0 : index
    %c0_175 = arith.constant 0 : index
    %452 = vector.load %arg4[%c0_174, %c0_175] : memref<128x512xf32, #tpu.memory_space<vmem>>, vector<128x512xf32>
    %cst_176 = arith.constant dense<0.000000e+00> : vector<8x512xf32>
    %453 = tpu.matmul %448, %452, %cst_176 {dimension_numbers = #tpu.dot_dimension_numbers<[1], [0], [0], [1], [0, 0, 1, 1], [], []>} : vector<8x128xf32>, vector<128x512xf32>, vector<8x512xf32> -> vector<8x512xf32>
    %454 = arith.addf %451, %453 : vector<8x512xf32>
    %455 = vector.extract_strided_slice %454 {offsets = [0, 128], sizes = [8, 128], strides = [1, 1]} : vector<8x512xf32> to vector<8x128xf32>
    %cst_177 = arith.constant 5.000000e-01 : f32
    %456 = vector.broadcast %cst_177 : f32 to vector<8x128xf32>
    %457 = arith.mulf %456, %455 : vector<8x128xf32>
    %458 = math.tanh %457 : vector<8x128xf32>
    %cst_178 = arith.constant 1.000000e+00 : f32
    %459 = vector.broadcast %cst_178 : f32 to vector<8x128xf32>
    %460 = arith.addf %458, %459 : vector<8x128xf32>
    %cst_179 = arith.constant 5.000000e-01 : f32
    %461 = vector.broadcast %cst_179 : f32 to vector<8x128xf32>
    %462 = arith.mulf %461, %460 : vector<8x128xf32>
    %463 = arith.mulf %462, %438 : vector<8x128xf32>
    %464 = vector.extract_strided_slice %454 {offsets = [0, 0], sizes = [8, 128], strides = [1, 1]} : vector<8x512xf32> to vector<8x128xf32>
    %cst_180 = arith.constant 5.000000e-01 : f32
    %465 = vector.broadcast %cst_180 : f32 to vector<8x128xf32>
    %466 = arith.mulf %465, %464 : vector<8x128xf32>
    %467 = math.tanh %466 : vector<8x128xf32>
    %cst_181 = arith.constant 1.000000e+00 : f32
    %468 = vector.broadcast %cst_181 : f32 to vector<8x128xf32>
    %469 = arith.addf %467, %468 : vector<8x128xf32>
    %cst_182 = arith.constant 5.000000e-01 : f32
    %470 = vector.broadcast %cst_182 : f32 to vector<8x128xf32>
    %471 = arith.mulf %470, %469 : vector<8x128xf32>
    %472 = vector.extract_strided_slice %454 {offsets = [0, 256], sizes = [8, 128], strides = [1, 1]} : vector<8x512xf32> to vector<8x128xf32>
    %473 = math.tanh %472 : vector<8x128xf32>
    %474 = arith.mulf %471, %473 : vector<8x128xf32>
    %475 = arith.addf %463, %474 : vector<8x128xf32>
    %476 = vector.extract_strided_slice %454 {offsets = [0, 384], sizes = [8, 128], strides = [1, 1]} : vector<8x512xf32> to vector<8x128xf32>
    %cst_183 = arith.constant 5.000000e-01 : f32
    %477 = vector.broadcast %cst_183 : f32 to vector<8x128xf32>
    %478 = arith.mulf %477, %476 : vector<8x128xf32>
    %479 = math.tanh %478 : vector<8x128xf32>
    %cst_184 = arith.constant 1.000000e+00 : f32
    %480 = vector.broadcast %cst_184 : f32 to vector<8x128xf32>
    %481 = arith.addf %479, %480 : vector<8x128xf32>
    %cst_185 = arith.constant 5.000000e-01 : f32
    %482 = vector.broadcast %cst_185 : f32 to vector<8x128xf32>
    %483 = arith.mulf %482, %481 : vector<8x128xf32>
    %484 = math.tanh %475 : vector<8x128xf32>
    %485 = arith.mulf %483, %484 : vector<8x128xf32>
    %c13_i32 = arith.constant 13 : i32
    %486 = arith.index_cast %c13_i32 : i32 to index
    %c0_186 = arith.constant 0 : index
    %c0_187 = arith.constant 0 : index
    %487 = vector.load %arg1[%486, %c0_186, %c0_187] : memref<16x8x512xf32, #tpu.memory_space<vmem>>, vector<1x8x512xf32>
    %488 = vector.shape_cast %487 : vector<1x8x512xf32> to vector<8x512xf32>
    %c0_188 = arith.constant 0 : index
    %c0_189 = arith.constant 0 : index
    %489 = vector.load %arg4[%c0_188, %c0_189] : memref<128x512xf32, #tpu.memory_space<vmem>>, vector<128x512xf32>
    %cst_190 = arith.constant dense<0.000000e+00> : vector<8x512xf32>
    %490 = tpu.matmul %485, %489, %cst_190 {dimension_numbers = #tpu.dot_dimension_numbers<[1], [0], [0], [1], [0, 0, 1, 1], [], []>} : vector<8x128xf32>, vector<128x512xf32>, vector<8x512xf32> -> vector<8x512xf32>
    %491 = arith.addf %488, %490 : vector<8x512xf32>
    %492 = vector.extract_strided_slice %491 {offsets = [0, 128], sizes = [8, 128], strides = [1, 1]} : vector<8x512xf32> to vector<8x128xf32>
    %cst_191 = arith.constant 5.000000e-01 : f32
    %493 = vector.broadcast %cst_191 : f32 to vector<8x128xf32>
    %494 = arith.mulf %493, %492 : vector<8x128xf32>
    %495 = math.tanh %494 : vector<8x128xf32>
    %cst_192 = arith.constant 1.000000e+00 : f32
    %496 = vector.broadcast %cst_192 : f32 to vector<8x128xf32>
    %497 = arith.addf %495, %496 : vector<8x128xf32>
    %cst_193 = arith.constant 5.000000e-01 : f32
    %498 = vector.broadcast %cst_193 : f32 to vector<8x128xf32>
    %499 = arith.mulf %498, %497 : vector<8x128xf32>
    %500 = arith.mulf %499, %475 : vector<8x128xf32>
    %501 = vector.extract_strided_slice %491 {offsets = [0, 0], sizes = [8, 128], strides = [1, 1]} : vector<8x512xf32> to vector<8x128xf32>
    %cst_194 = arith.constant 5.000000e-01 : f32
    %502 = vector.broadcast %cst_194 : f32 to vector<8x128xf32>
    %503 = arith.mulf %502, %501 : vector<8x128xf32>
    %504 = math.tanh %503 : vector<8x128xf32>
    %cst_195 = arith.constant 1.000000e+00 : f32
    %505 = vector.broadcast %cst_195 : f32 to vector<8x128xf32>
    %506 = arith.addf %504, %505 : vector<8x128xf32>
    %cst_196 = arith.constant 5.000000e-01 : f32
    %507 = vector.broadcast %cst_196 : f32 to vector<8x128xf32>
    %508 = arith.mulf %507, %506 : vector<8x128xf32>
    %509 = vector.extract_strided_slice %491 {offsets = [0, 256], sizes = [8, 128], strides = [1, 1]} : vector<8x512xf32> to vector<8x128xf32>
    %510 = math.tanh %509 : vector<8x128xf32>
    %511 = arith.mulf %508, %510 : vector<8x128xf32>
    %512 = arith.addf %500, %511 : vector<8x128xf32>
    %513 = vector.extract_strided_slice %491 {offsets = [0, 384], sizes = [8, 128], strides = [1, 1]} : vector<8x512xf32> to vector<8x128xf32>
    %cst_197 = arith.constant 5.000000e-01 : f32
    %514 = vector.broadcast %cst_197 : f32 to vector<8x128xf32>
    %515 = arith.mulf %514, %513 : vector<8x128xf32>
    %516 = math.tanh %515 : vector<8x128xf32>
    %cst_198 = arith.constant 1.000000e+00 : f32
    %517 = vector.broadcast %cst_198 : f32 to vector<8x128xf32>
    %518 = arith.addf %516, %517 : vector<8x128xf32>
    %cst_199 = arith.constant 5.000000e-01 : f32
    %519 = vector.broadcast %cst_199 : f32 to vector<8x128xf32>
    %520 = arith.mulf %519, %518 : vector<8x128xf32>
    %521 = math.tanh %512 : vector<8x128xf32>
    %522 = arith.mulf %520, %521 : vector<8x128xf32>
    %c14_i32 = arith.constant 14 : i32
    %523 = arith.index_cast %c14_i32 : i32 to index
    %c0_200 = arith.constant 0 : index
    %c0_201 = arith.constant 0 : index
    %524 = vector.load %arg1[%523, %c0_200, %c0_201] : memref<16x8x512xf32, #tpu.memory_space<vmem>>, vector<1x8x512xf32>
    %525 = vector.shape_cast %524 : vector<1x8x512xf32> to vector<8x512xf32>
    %c0_202 = arith.constant 0 : index
    %c0_203 = arith.constant 0 : index
    %526 = vector.load %arg4[%c0_202, %c0_203] : memref<128x512xf32, #tpu.memory_space<vmem>>, vector<128x512xf32>
    %cst_204 = arith.constant dense<0.000000e+00> : vector<8x512xf32>
    %527 = tpu.matmul %522, %526, %cst_204 {dimension_numbers = #tpu.dot_dimension_numbers<[1], [0], [0], [1], [0, 0, 1, 1], [], []>} : vector<8x128xf32>, vector<128x512xf32>, vector<8x512xf32> -> vector<8x512xf32>
    %528 = arith.addf %525, %527 : vector<8x512xf32>
    %529 = vector.extract_strided_slice %528 {offsets = [0, 128], sizes = [8, 128], strides = [1, 1]} : vector<8x512xf32> to vector<8x128xf32>
    %cst_205 = arith.constant 5.000000e-01 : f32
    %530 = vector.broadcast %cst_205 : f32 to vector<8x128xf32>
    %531 = arith.mulf %530, %529 : vector<8x128xf32>
    %532 = math.tanh %531 : vector<8x128xf32>
    %cst_206 = arith.constant 1.000000e+00 : f32
    %533 = vector.broadcast %cst_206 : f32 to vector<8x128xf32>
    %534 = arith.addf %532, %533 : vector<8x128xf32>
    %cst_207 = arith.constant 5.000000e-01 : f32
    %535 = vector.broadcast %cst_207 : f32 to vector<8x128xf32>
    %536 = arith.mulf %535, %534 : vector<8x128xf32>
    %537 = arith.mulf %536, %512 : vector<8x128xf32>
    %538 = vector.extract_strided_slice %528 {offsets = [0, 0], sizes = [8, 128], strides = [1, 1]} : vector<8x512xf32> to vector<8x128xf32>
    %cst_208 = arith.constant 5.000000e-01 : f32
    %539 = vector.broadcast %cst_208 : f32 to vector<8x128xf32>
    %540 = arith.mulf %539, %538 : vector<8x128xf32>
    %541 = math.tanh %540 : vector<8x128xf32>
    %cst_209 = arith.constant 1.000000e+00 : f32
    %542 = vector.broadcast %cst_209 : f32 to vector<8x128xf32>
    %543 = arith.addf %541, %542 : vector<8x128xf32>
    %cst_210 = arith.constant 5.000000e-01 : f32
    %544 = vector.broadcast %cst_210 : f32 to vector<8x128xf32>
    %545 = arith.mulf %544, %543 : vector<8x128xf32>
    %546 = vector.extract_strided_slice %528 {offsets = [0, 256], sizes = [8, 128], strides = [1, 1]} : vector<8x512xf32> to vector<8x128xf32>
    %547 = math.tanh %546 : vector<8x128xf32>
    %548 = arith.mulf %545, %547 : vector<8x128xf32>
    %549 = arith.addf %537, %548 : vector<8x128xf32>
    %550 = vector.extract_strided_slice %528 {offsets = [0, 384], sizes = [8, 128], strides = [1, 1]} : vector<8x512xf32> to vector<8x128xf32>
    %cst_211 = arith.constant 5.000000e-01 : f32
    %551 = vector.broadcast %cst_211 : f32 to vector<8x128xf32>
    %552 = arith.mulf %551, %550 : vector<8x128xf32>
    %553 = math.tanh %552 : vector<8x128xf32>
    %cst_212 = arith.constant 1.000000e+00 : f32
    %554 = vector.broadcast %cst_212 : f32 to vector<8x128xf32>
    %555 = arith.addf %553, %554 : vector<8x128xf32>
    %cst_213 = arith.constant 5.000000e-01 : f32
    %556 = vector.broadcast %cst_213 : f32 to vector<8x128xf32>
    %557 = arith.mulf %556, %555 : vector<8x128xf32>
    %558 = math.tanh %549 : vector<8x128xf32>
    %559 = arith.mulf %557, %558 : vector<8x128xf32>
    %c15_i32 = arith.constant 15 : i32
    %560 = arith.index_cast %c15_i32 : i32 to index
    %c0_214 = arith.constant 0 : index
    %c0_215 = arith.constant 0 : index
    %561 = vector.load %arg1[%560, %c0_214, %c0_215] : memref<16x8x512xf32, #tpu.memory_space<vmem>>, vector<1x8x512xf32>
    %562 = vector.shape_cast %561 : vector<1x8x512xf32> to vector<8x512xf32>
    %c0_216 = arith.constant 0 : index
    %c0_217 = arith.constant 0 : index
    %563 = vector.load %arg4[%c0_216, %c0_217] : memref<128x512xf32, #tpu.memory_space<vmem>>, vector<128x512xf32>
    %cst_218 = arith.constant dense<0.000000e+00> : vector<8x512xf32>
    %564 = tpu.matmul %559, %563, %cst_218 {dimension_numbers = #tpu.dot_dimension_numbers<[1], [0], [0], [1], [0, 0, 1, 1], [], []>} : vector<8x128xf32>, vector<128x512xf32>, vector<8x512xf32> -> vector<8x512xf32>
    %565 = arith.addf %562, %564 : vector<8x512xf32>
    %566 = vector.extract_strided_slice %565 {offsets = [0, 128], sizes = [8, 128], strides = [1, 1]} : vector<8x512xf32> to vector<8x128xf32>
    %cst_219 = arith.constant 5.000000e-01 : f32
    %567 = vector.broadcast %cst_219 : f32 to vector<8x128xf32>
    %568 = arith.mulf %567, %566 : vector<8x128xf32>
    %569 = math.tanh %568 : vector<8x128xf32>
    %cst_220 = arith.constant 1.000000e+00 : f32
    %570 = vector.broadcast %cst_220 : f32 to vector<8x128xf32>
    %571 = arith.addf %569, %570 : vector<8x128xf32>
    %cst_221 = arith.constant 5.000000e-01 : f32
    %572 = vector.broadcast %cst_221 : f32 to vector<8x128xf32>
    %573 = arith.mulf %572, %571 : vector<8x128xf32>
    %574 = arith.mulf %573, %549 : vector<8x128xf32>
    %575 = vector.extract_strided_slice %565 {offsets = [0, 0], sizes = [8, 128], strides = [1, 1]} : vector<8x512xf32> to vector<8x128xf32>
    %cst_222 = arith.constant 5.000000e-01 : f32
    %576 = vector.broadcast %cst_222 : f32 to vector<8x128xf32>
    %577 = arith.mulf %576, %575 : vector<8x128xf32>
    %578 = math.tanh %577 : vector<8x128xf32>
    %cst_223 = arith.constant 1.000000e+00 : f32
    %579 = vector.broadcast %cst_223 : f32 to vector<8x128xf32>
    %580 = arith.addf %578, %579 : vector<8x128xf32>
    %cst_224 = arith.constant 5.000000e-01 : f32
    %581 = vector.broadcast %cst_224 : f32 to vector<8x128xf32>
    %582 = arith.mulf %581, %580 : vector<8x128xf32>
    %583 = vector.extract_strided_slice %565 {offsets = [0, 256], sizes = [8, 128], strides = [1, 1]} : vector<8x512xf32> to vector<8x128xf32>
    %584 = math.tanh %583 : vector<8x128xf32>
    %585 = arith.mulf %582, %584 : vector<8x128xf32>
    %586 = arith.addf %574, %585 : vector<8x128xf32>
    %587 = vector.extract_strided_slice %565 {offsets = [0, 384], sizes = [8, 128], strides = [1, 1]} : vector<8x512xf32> to vector<8x128xf32>
    %cst_225 = arith.constant 5.000000e-01 : f32
    %588 = vector.broadcast %cst_225 : f32 to vector<8x128xf32>
    %589 = arith.mulf %588, %587 : vector<8x128xf32>
    %590 = math.tanh %589 : vector<8x128xf32>
    %cst_226 = arith.constant 1.000000e+00 : f32
    %591 = vector.broadcast %cst_226 : f32 to vector<8x128xf32>
    %592 = arith.addf %590, %591 : vector<8x128xf32>
    %cst_227 = arith.constant 5.000000e-01 : f32
    %593 = vector.broadcast %cst_227 : f32 to vector<8x128xf32>
    %594 = arith.mulf %593, %592 : vector<8x128xf32>
    %595 = math.tanh %586 : vector<8x128xf32>
    %596 = arith.mulf %594, %595 : vector<8x128xf32>
    %c16_i32 = arith.constant 16 : i32
    %c0_228 = arith.constant 0 : index
    %c0_229 = arith.constant 0 : index
    %597 = vector.load %arg6[%c0_228, %c0_229] : memref<8x128xf32, #tpu.memory_space<vmem>>, vector<8x128xf32>
    tpu.vector_store %arg6[%c0_228, %c0_229], %596 {strides = array<i32>} : memref<8x128xf32, #tpu.memory_space<vmem>>, vector<8x128xf32>,
    %c0_230 = arith.constant 0 : index
    %c0_231 = arith.constant 0 : index
    %598 = vector.load %arg7[%c0_230, %c0_231] : memref<8x128xf32, #tpu.memory_space<vmem>>, vector<8x128xf32>
    tpu.vector_store %arg7[%c0_230, %c0_231], %586 {strides = array<i32>} : memref<8x128xf32, #tpu.memory_space<vmem>>, vector<8x128xf32>,
    %c0_232 = arith.constant 0 : index
    %c0_233 = arith.constant 0 : index
    %599 = vector.load %arg5[%c0_232, %c0_233] : memref<8x128xf32, #tpu.memory_space<vmem>>, vector<8x128xf32>
    tpu.vector_store %arg5[%c0_232, %c0_233], %596 {strides = array<i32>} : memref<8x128xf32, #tpu.memory_space<vmem>>, vector<8x128xf32>,
    return
  }
  func.func @transform_0(%arg0: i32) -> (i32, i32, i32) {
    %c0_i32 = arith.constant 0 : i32
    %c0_i32_0 = arith.constant 0 : i32
    %c0_i32_1 = arith.constant 0 : i32
    return %arg0, %c0_i32, %c0_i32_0 : i32, i32, i32
  }
  func.func @transform_1(%arg0: i32) -> (i32, i32) {
    %c0_i32 = arith.constant 0 : i32
    %c0_i32_0 = arith.constant 0 : i32
    %c0_i32_1 = arith.constant 0 : i32
    return %c0_i32, %c0_i32_0 : i32, i32
  }
  func.func @transform_2(%arg0: i32) -> (i32, i32) {
    %c0_i32 = arith.constant 0 : i32
    %c0_i32_0 = arith.constant 0 : i32
    %c0_i32_1 = arith.constant 0 : i32
    return %c0_i32, %c0_i32_0 : i32, i32
  }
  func.func @transform_3(%arg0: i32) -> (i32, i32) {
    %c0_i32 = arith.constant 0 : i32
    %c0_i32_0 = arith.constant 0 : i32
    %c0_i32_1 = arith.constant 0 : i32
    return %c0_i32, %c0_i32_0 : i32, i32
  }
  func.func @transform_4(%arg0: i32) -> (i32, i32) {
    %c0_i32 = arith.constant 0 : i32
    %c0_i32_0 = arith.constant 0 : i32
    %c0_i32_1 = arith.constant 0 : i32
    return %c0_i32, %c0_i32_0 : i32, i32
  }
}

</mosaic_0001>

<bundles_post_ra>
// kernel: tpu_custom_call.1
= control target key start
LH: loop header
LB: loop body
LE: loop exit
PB: predicated region body
PF: predicated region fallthrough
CT: control target
= control target key end

     0   :  { %9 = vsyncpa [#allocation5], 0  ;;  %s4953_s0 = inlined_call_operand.hbm [shape: f32[16,8,512], index: 0, kind: input, shape index: {}]   ;;  %s4954_s1 = inlined_call_operand.hbm [shape: f32[8,128], index: 1, kind: input, shape index: {}]   ;;  %s4955_s2 = inlined_call_operand.hbm [shape: f32[8,128], index: 2, kind: input, shape index: {}]   ;;  %s4956_s3 = inlined_call_operand.hbm [shape: f32[128,512], index: 3, kind: input, shape index: {}]   ;;  %s4957_s4 = inlined_call_operand.hbm [shape: f32[8,128], index: 4, kind: output, shape index: {}]  }
   0x1   :  { %10 = vsyncpa [#allocation8], 0 }
   0x2   :  { %11 = vsyncpa [#allocation11], 0 }
   0x3   :  { %12 = vsyncpa [#allocation6], 0  ;;  %s4176_s15 = smov [#allocation7]   ;;  %s4177_s17 = smov [#allocation4]  }
   0x4   :  { %s31_s16 = sshll.u32 %s4176_s15, 4  ;;  %s18_s18 = sshll.u32 %s4177_s17, 4  ;;  %s32_s16 = int_to_ptr.vmem [resolvable:$true] %s31_s16  ;;  %s4209_s18 = int_to_ptr.vmem [resolvable:$true] %s18_s18 }
   0x5   :  { %s4058_s21 = scalar_lea.hbm %s4954_s1, 128 }
   0x6   :  { %p4059_p0 = scmp.ne.s32.totalorder %s4954_s1, %s4058_s21  ;;  %p4062_p1 = scmp.lt.u32.totalorder %s4058_s21, %s4954_s1 }
   0x8   :  { %p4064_p2 = pnand %p4062_p1, %p4059_p0 }
   0xa   :  { %4067 = shalt.err (!%p4064_p2)
}
   0xb   :  { %s4068_s26 = scalar_lea.vmem %s32_s16, 128  ;;  %p4073_p4 = scmp.lt.s32.totalorder %s32_s16, %s32_s16 }
   0xc   :  { %p4069_p3 = scmp.ne.s32.totalorder %s32_s16, %s4068_s26  ;;  %p4074_p5 = scmp.lt.s32.totalorder %s4068_s26, %s4068_s26 }
   0xe   :  { %p4075_p6 = por %p4074_p5, %p4073_p4 }
  0x10   :  { %p4076_p7 = pnand %p4075_p6, %p4069_p3 }
  0x12   :  { %4079 = shalt.err (!%p4076_p7)
}
  0x13   :  { %34 = dma.hbm_to_vmem [thread:$0]  %s4954_s1, 128, %s32_s16, [#allocation8]  }
  0x14   :  { %s4080_s5 = scalar_lea.hbm %s4953_s0, 8192 }
  0x15   :  { %p4081_p8 = scmp.ne.s32.totalorder %s4953_s0, %s4080_s5  ;;  %p4084_p9 = scmp.lt.u32.totalorder %s4080_s5, %s4953_s0 }
  0x17   :  { %p4086_p10 = pnand %p4084_p9, %p4081_p8 }
  0x19   :  { %4089 = shalt.err (!%p4086_p10)
}
  0x1a   :  { %s4090_s10 = scalar_lea.vmem %s4209_s18, 8192  ;;  %p4095_p12 = scmp.lt.s32.totalorder %s4209_s18, %s4209_s18 }
  0x1b   :  { %p4091_p11 = scmp.ne.s32.totalorder %s4209_s18, %s4090_s10  ;;  %p4096_p13 = scmp.lt.s32.totalorder %s4090_s10, %s4090_s10 }
  0x1d   :  { %p4097_p0 = por %p4096_p13, %p4095_p12 }
  0x1f   :  { %p4098_p1 = pnand %p4097_p0, %p4091_p11 }
  0x21   :  { %4101 = shalt.err (!%p4098_p1)
}
  0x22   :  { %s4178_s1 = smov 512   ;;  %s4179_s11 = smov 32  }
  0x23   :  { %24 = dma.hbm_to_vmem [thread:$0]  %s4953_s0, 8192, %s4209_s18, [#allocation5], %s4178_s1, %s4178_s1, %s4179_s11  }
  0x24   :  { %s4180_s14 = smov [#allocation9]   ;;  %s4181_s16 = smov [#allocation10]  }
  0x25   :  { %s41_s15 = sshll.u32 %s4180_s14, 4  ;;  %s50_s17 = sshll.u32 %s4181_s16, 4  ;;  %s42_s15 = int_to_ptr.vmem [resolvable:$true] %s41_s15  ;;  %s4243_s17 = int_to_ptr.vmem [resolvable:$true] %s50_s17 }
  0x26   :  { %s4102_s21 = scalar_lea.hbm %s4955_s2, 128 }
  0x27   :  { %p4103_p2 = scmp.ne.s32.totalorder %s4955_s2, %s4102_s21  ;;  %p4106_p3 = scmp.lt.u32.totalorder %s4102_s21, %s4955_s2 }
  0x29   :  { %p4108_p4 = pnand %p4106_p3, %p4103_p2 }
  0x2b   :  { %4111 = shalt.err (!%p4108_p4)
}
  0x2c   :  { %s4112_s0 = scalar_lea.vmem %s42_s15, 128  ;;  %p4117_p6 = scmp.lt.s32.totalorder %s42_s15, %s42_s15 }
  0x2d   :  { %p4113_p5 = scmp.ne.s32.totalorder %s42_s15, %s4112_s0  ;;  %p4118_p7 = scmp.lt.s32.totalorder %s4112_s0, %s4112_s0 }
  0x2f   :  { %p4119_p8 = por %p4118_p7, %p4117_p6 }
  0x31   :  { %p4120_p9 = pnand %p4119_p8, %p4113_p5 }
  0x33   :  { %4123 = shalt.err (!%p4120_p9)
}
  0x34   :  { %44 = dma.hbm_to_vmem [thread:$0]  %s4955_s2, 128, %s42_s15, [#allocation8]  }
  0x35   :  { %s4124_s29 = scalar_lea.hbm %s4956_s3, 8192 }
  0x36   :  { %p4125_p10 = scmp.ne.s32.totalorder %s4956_s3, %s4124_s29  ;;  %p4128_p11 = scmp.lt.u32.totalorder %s4124_s29, %s4956_s3 }
  0x38   :  { %p4130_p12 = pnand %p4128_p11, %p4125_p10 }
  0x3a   :  { %4133 = shalt.err (!%p4130_p12)
}
  0x3b   :  { %s4134_s8 = scalar_lea.vmem %s4243_s17, 8192  ;;  %p4139_p0 = scmp.lt.s32.totalorder %s4243_s17, %s4243_s17 }
  0x3c   :  { %p4135_p13 = scmp.ne.s32.totalorder %s4243_s17, %s4134_s8  ;;  %p4140_p1 = scmp.lt.s32.totalorder %s4134_s8, %s4134_s8 }
  0x3e   :  { %p4141_p2 = por %p4140_p1, %p4139_p0 }
  0x40   :  { %p4142_p3 = pnand %p4141_p2, %p4135_p13 }
  0x42   :  { %4145 = shalt.err (!%p4142_p3)
}
  0x43   :  { %56 = dma.hbm_to_vmem [thread:$0]  %s4956_s3, 8192, %s4243_s17, [#allocation11], %s4178_s1, %s4178_s1, %s4179_s11  }
  0x44   :  { %4168 = dma.done.wait [#allocation5], 8192  }
  0x45   :  { %4169 = vsyncadd [#allocation5], 4294959104 }
  0x46   :  { %4170 = dma.done.wait [#allocation8], 256  }
  0x47   :  { %4171 = vsyncadd [#allocation8], 4294967040 }
  0x48   :  { %4172 = dma.done.wait [#allocation11], 8192  }
  0x49   :  { %4173 = vsyncadd [#allocation11], 4294959104  ;;  %v4182_v0 = vmov 0.0   ;;  %v84_v1 = vld [vmem:[#allocation10 + $0x8] sm:$0xff]  ;;  %v83_v3 = vld [vmem:[#allocation10] sm:$0xff]  ;;  %s4183_s3 = smov [#allocation12]  }
  0x4a   :  { %211 = vmatprep.mubr.f32.mxu0 %v4182_v0  ;;  %282 = vmatprep.mubr.f32.mxu1 %v4182_v0  ;;  %v88_v2 = vld [vmem:[#allocation10 + $0x28] sm:$0xff]  ;;  %v87_v5 = vld [vmem:[#allocation10 + $0x20] sm:$0xff]  ;;  %v86_v12 = vld [vmem:[#allocation10 + $0x18] sm:$0xff]  ;;  %s2855_s10 = sshll.u32 %s4183_s3, 4  ;;  %s2856_s10 = int_to_ptr.vmem [resolvable:$true] %s2855_s10 }
  0x4b   :  { %v4279_v4 = vpack.c.bf16 %v88_v2, %v84_v1  ;;  %v92_v6 = vld [vmem:[#allocation10 + $0x48] sm:$0xff]  ;;  %v4281_v8 = vpack.c.bf16 %v87_v5, %v83_v3  ;;  %v91_v10 = vld [vmem:[#allocation10 + $0x40] sm:$0xff]  ;;  %v90_v13 = vld [vmem:[#allocation10 + $0x38] sm:$0xff]  ;;  %s4146_s1 = scalar_lea.vmem %s2856_s10, 128  ;;  %p4151_p5 = scmp.lt.s32.totalorder %s2856_s10, %s2856_s10 }
  0x4c   :  { %v96_v7 = vld [vmem:[#allocation10 + $0x68] sm:$0xff]  ;;  %v95_v11 = vld [vmem:[#allocation10 + $0x60] sm:$0xff]  ;;  %v85_v14 = vld [vmem:[#allocation10 + $0x10] sm:$0xff]  ;;  %v4289_v17 = vpack.c.bf16 %v90_v13, %v86_v12  ;;  %p4147_p4 = scmp.ne.s32.totalorder %s2856_s10, %s4146_s1  ;;  %p4152_p6 = scmp.lt.s32.totalorder %s4146_s1, %s4146_s1 }
  0x4d   :  { %v4283_v9 = vpack.c.bf16 %v96_v7, %v92_v6  ;;  %2867 = vmatprep.subr.bf16.mxu0 %v4279_v4  ;;  %v89_v15 = vld [vmem:[#allocation10 + $0x30] sm:$0xff]  ;;  %v4287_v16 = vpack.c.bf16 %v95_v11, %v91_v10  ;;  %v100_v19 = vld [vmem:[#allocation10 + $0x88] sm:$0xff]  ;;  %v99_v21 = vld [vmem:[#allocation10 + $0x80] sm:$0xff] }
  0x4e   :  { %2869 = vmatpush1.bf16.msra.mxu0 %v4281_v8  ;;  %v4291_v18 = vpack.c.bf16 %v89_v15, %v85_v14  ;;  %v104_v20 = vld [vmem:[#allocation10 + $0xa8] sm:$0xff]  ;;  %v103_v23 = vld [vmem:[#allocation10 + $0xa0] sm:$0xff]  ;;  %v94_v24 = vld [vmem:[#allocation10 + $0x58] sm:$0xff]  ;;  %2899 = vmatprep.subr.bf16.mxu1 %v4289_v17  ;;  %p4153_p7 = por %p4152_p6, %p4151_p5 }
  0x4f   :  { %2871 = vmatprep.subr.bf16.mxu0 %v4283_v9  ;;  %v4294_v22 = vpack.c.bf16 %v104_v20, %v100_v19  ;;  %v98_v25 = vld [vmem:[#allocation10 + $0x78] sm:$0xff]  ;;  %v93_v27 = vld [vmem:[#allocation10 + $0x50] sm:$0xff]  ;;  %v108_v29 = vld [vmem:[#allocation10 + $0xc8] sm:$0xff]  ;;  %v4303_v32 = vpack.c.bf16 %v103_v23, %v99_v21 }
  0x50   :  { %v4297_v26 = vpack.c.bf16 %v98_v25, %v94_v24  ;;  %v97_v28 = vld [vmem:[#allocation10 + $0x70] sm:$0xff]  ;;  %2901 = vmatpush1.bf16.msra.mxu1 %v4291_v18  ;;  %v112_v31 = vld [vmem:[#allocation10 + $0xe8] sm:$0xff]  ;;  %v102_v33 = vld [vmem:[#allocation10 + $0x98] sm:$0xff]  ;;  %p4154_p8 = pnand %p4153_p7, %p4147_p4 }
  0x51   :  { %v4300_v30 = vpack.c.bf16 %v97_v28, %v93_v27  ;;  %v106_v34 = vld [vmem:[#allocation10 + $0xb8] sm:$0xff]  ;;  %v101_v35 = vld [vmem:[#allocation10 + $0x90] sm:$0xff]  ;;  %v4307_v36 = vpack.c.bf16 %v112_v31, %v108_v29  ;;  %v107_v37 = vld [vmem:[#allocation10 + $0xc0] sm:$0xff] }
  0x52   :  { %2873 = vmatpush1.bf16.msra.mxu0 %v4287_v16  ;;  %2903 = vmatprep.subr.bf16.mxu1 %v4297_v26  ;;  %v111_v38 = vld [vmem:[#allocation10 + $0xe0] sm:$0xff]  ;;  %v4309_v39 = vpack.c.bf16 %v106_v34, %v102_v33  ;;  %v105_v40 = vld [vmem:[#allocation10 + $0xb0] sm:$0xff]  ;;  %v116_v41 = vld [vmem:[#allocation10 + $0x108] sm:$0xff] }
  0x53   :  { %2875 = vmatprep.subr.bf16.mxu0 %v4294_v22  ;;  %v120_v42 = vld [vmem:[#allocation10 + $0x128] sm:$0xff]  ;;  %v110_v43 = vld [vmem:[#allocation10 + $0xd8] sm:$0xff]  ;;  %v4312_v44 = vpack.c.bf16 %v105_v40, %v101_v35  ;;  %v4315_v46 = vpack.c.bf16 %v111_v38, %v107_v37  ;;  %v115_v47 = vld [vmem:[#allocation10 + $0x100] sm:$0xff] }
  0x54   :  { %2905 = vmatpush1.bf16.msra.mxu1 %v4300_v30  ;;  %v114_v45 = vld [vmem:[#allocation10 + $0xf8] sm:$0xff]  ;;  %v109_v49 = vld [vmem:[#allocation10 + $0xd0] sm:$0xff]  ;;  %v4321_v51 = vpack.c.bf16 %v120_v42, %v116_v41  ;;  %v119_v52 = vld [vmem:[#allocation10 + $0x120] sm:$0xff] }
  0x55   :  { %2907 = vmatprep.subr.bf16.mxu1 %v4309_v39  ;;  %v4318_v48 = vpack.c.bf16 %v114_v45, %v110_v43  ;;  %v113_v50 = vld [vmem:[#allocation10 + $0xf0] sm:$0xff]  ;;  %v118_v53 = vld [vmem:[#allocation10 + $0x118] sm:$0xff]  ;;  %v124_v55 = vld [vmem:[#allocation10 + $0x148] sm:$0xff]  ;;  %v4327_v58 = vpack.c.bf16 %v119_v52, %v115_v47 }
  0x56   :  { %2877 = vmatpush1.bf16.msra.mxu0 %v4303_v32  ;;  %v122_v54 = vld [vmem:[#allocation10 + $0x138] sm:$0xff]  ;;  %v128_v56 = vld [vmem:[#allocation10 + $0x168] sm:$0xff]  ;;  %v4324_v57 = vpack.c.bf16 %v113_v50, %v109_v49  ;;  %v123_v59 = vld [vmem:[#allocation10 + $0x140] sm:$0xff] }
  0x57   :  { %2879 = vmatprep.subr.bf16.mxu0 %v4307_v36  ;;  %v4330_v60 = vpack.c.bf16 %v122_v54, %v118_v53  ;;  %v117_v61 = vld [vmem:[#allocation10 + $0x110] sm:$0xff]  ;;  %v4333_v63 = vpack.c.bf16 %v128_v56, %v124_v55  ;;  %v127_v1 = vld [vmem:[#allocation10 + $0x160] sm:$0xff]  ;;  %v126_v2 = vld [vmem:[#allocation10 + $0x158] sm:$0xff] }
  0x58   :  { %2909 = vmatpush1.bf16.msra.mxu1 %v4312_v44  ;;  %v121_v62 = vld [vmem:[#allocation10 + $0x130] sm:$0xff]  ;;  %v130_v3 = vld [vmem:[#allocation10 + $0x178] sm:$0xff]  ;;  %v132_v5 = vld [vmem:[#allocation10 + $0x188] sm:$0xff]  ;;  %v4339_v10 = vpack.c.bf16 %v127_v1, %v123_v59 }
  0x59   :  { %2911 = vmatprep.subr.bf16.mxu1 %v4318_v48  ;;  %v136_v6 = vld [vmem:[#allocation10 + $0x1a8] sm:$0xff]  ;;  %v4336_v7 = vpack.c.bf16 %v121_v62, %v117_v61  ;;  %v131_v11 = vld [vmem:[#allocation10 + $0x180] sm:$0xff]  ;;  %v4342_v12 = vpack.c.bf16 %v130_v3, %v126_v2  ;;  %v125_v13 = vld [vmem:[#allocation10 + $0x150] sm:$0xff] }
  0x5a   :  { %2881 = vmatpush1.bf16.msra.mxu0 %v4315_v46  ;;  %v129_v14 = vld [vmem:[#allocation10 + $0x170] sm:$0xff]  ;;  %v4345_v15 = vpack.c.bf16 %v136_v6, %v132_v5  ;;  %v135_v19 = vld [vmem:[#allocation10 + $0x1a0] sm:$0xff]  ;;  %v134_v20 = vld [vmem:[#allocation10 + $0x198] sm:$0xff] }
  0x5b   :  { %2883 = vmatprep.subr.bf16.mxu0 %v4321_v51  ;;  %v138_v21 = vld [vmem:[#allocation10 + $0x1b8] sm:$0xff]  ;;  %v140_v23 = vld [vmem:[#allocation10 + $0x1c8] sm:$0xff]  ;;  %v4348_v25 = vpack.c.bf16 %v129_v14, %v125_v13  ;;  %v4351_v27 = vpack.c.bf16 %v135_v19, %v131_v11  ;;  %v139_v28 = vld [vmem:[#allocation10 + $0x1c0] sm:$0xff] }
  0x5c   :  { %2913 = vmatpush1.bf16.msra.mxu1 %v4324_v57  ;;  %v144_v24 = vld [vmem:[#allocation10 + $0x1e8] sm:$0xff]  ;;  %v4354_v29 = vpack.c.bf16 %v138_v21, %v134_v20  ;;  %v133_v31 = vld [vmem:[#allocation10 + $0x190] sm:$0xff]  ;;  %v143_v35 = vld [vmem:[#allocation10 + $0x1e0] sm:$0xff] }
  0x5d   :  { %2915 = vmatprep.subr.bf16.mxu1 %v4330_v60  ;;  %v137_v33 = vld [vmem:[#allocation10 + $0x1b0] sm:$0xff]  ;;  %v4357_v34 = vpack.c.bf16 %v144_v24, %v140_v23  ;;  %v142_v37 = vld [vmem:[#allocation10 + $0x1d8] sm:$0xff]  ;;  %v4363_v41 = vpack.c.bf16 %v143_v35, %v139_v28  ;;  %v81_v56 = vld [vmem:[#allocation4 + $0x10] sm:$0xff] }
  0x5e   :  { %2885 = vmatpush1.bf16.msra.mxu0 %v4327_v58  ;;  %v146_v38 = vld [vmem:[#allocation10 + $0x1f8] sm:$0xff]  ;;  %v4360_v40 = vpack.c.bf16 %v137_v33, %v133_v31  ;;  %v141_v43 = vld [vmem:[#allocation10 + $0x1d0] sm:$0xff]  ;;  %v82_v5 = vld [vmem:[#allocation4 + $0x18] sm:$0xff] }
  0x5f   :  { %2887 = vmatprep.subr.bf16.mxu0 %v4333_v63  ;;  %v4366_v42 = vpack.c.bf16 %v146_v38, %v142_v37  ;;  %v145_v45 = vld [vmem:[#allocation10 + $0x1f0] sm:$0xff]  ;;  %v80_v52 = vld [vmem:[#allocation4 + $0x8] sm:$0xff] }
  0x60   :  { %2917 = vmatpush1.bf16.msra.mxu1 %v4336_v7  ;;  %v4370_v47 = vpack.c.bf16 %v145_v45, %v141_v43  ;;  %v73_v49 = vld [vmem:[#allocation7] sm:$0xff]  ;;  %v75_v24 = vld [vmem:[#allocation9] sm:$0xff] }
  0x61   :  { %2919 = vmatprep.subr.bf16.mxu1 %v4342_v12  ;;  %v79_v50 = vld [vmem:[#allocation4] sm:$0xff] }
  0x62   :  { %2889 = vmatpush1.bf16.msra.mxu0 %v4339_v10 }
  0x63   :  { %2891 = vmatprep.subr.bf16.mxu0 %v4345_v15 }
  0x64   :  { %2921 = vmatpush1.bf16.msra.mxu1 %v4348_v25 }
  0x65   :  { %2923 = vmatprep.subr.bf16.mxu1 %v4354_v29 }
  0x66   :  { %2893 = vmatpush1.bf16.msra.mxu0 %v4351_v27 }
  0x67   :  { %2895 = vmatprep.subr.bf16.mxu0 %v4357_v34 }
  0x68   :  { %2925 = vmatpush1.bf16.msra.mxu1 %v4360_v40 }
  0x69   :  { %2927 = vmatprep.subr.bf16.mxu1 %v4366_v42 }
  0x6a   :  { %2897 = vmatpush1.bf16.msra.mxu0 %v4363_v41 }
  0x6b   :  { %2931 = vmatprep.subr.bf16.mxu0 %v4279_v4 }
  0x6c   :  { %2929 = vmatpush1.bf16.msra.mxu1 %v4370_v47 }
  0x6d   :  { %212 = vmatmul.mubr.f32.vlgmr.msra.gmra.mrb[0].mxu0 %v73_v49  ;;  %2963 = vmatprep.subr.bf16.mxu1 %v4289_v17 }
  0x6e   :  { %2933 = vmatpush1.bf16.msra.mxu0 %v4281_v8  ;;  %380 = vmatprep.mubr.f32.mxu0 %v4182_v0 }
  0x6f   :  { %2935 = vmatprep.subr.bf16.mxu0 %v4283_v9  ;;  %283 = vmatmul.mubr.f32.vlgmr.msra.gmra.mrb[0].mxu1 %v73_v49 }
  0x70   :  { %2965 = vmatpush1.bf16.msra.mxu1 %v4291_v18  ;;  %451 = vmatprep.mubr.f32.mxu1 %v4182_v0 }
  0x71   :  { %2967 = vmatprep.subr.bf16.mxu1 %v4297_v26 }
  0x72   :  { %2937 = vmatpush1.bf16.msra.mxu0 %v4287_v16 }
  0x73   :  { %2939 = vmatprep.subr.bf16.mxu0 %v4294_v22 }
  0x74   :  { %2969 = vmatpush1.bf16.msra.mxu1 %v4300_v30 }
  0x75   :  { %2971 = vmatprep.subr.bf16.mxu1 %v4309_v39 }
  0x76   :  { %2941 = vmatpush1.bf16.msra.mxu0 %v4303_v32 }
  0x77   :  { %2943 = vmatprep.subr.bf16.mxu0 %v4307_v36 }
  0x78   :  { %2973 = vmatpush1.bf16.msra.mxu1 %v4312_v44 }
  0x79   :  { %2975 = vmatprep.subr.bf16.mxu1 %v4318_v48 }
  0x7a   :  { %2945 = vmatpush1.bf16.msra.mxu0 %v4315_v46 }
  0x7b   :  { %2947 = vmatprep.subr.bf16.mxu0 %v4321_v51 }
  0x7c   :  { %2977 = vmatpush1.bf16.msra.mxu1 %v4324_v57 }
  0x7d   :  { %2979 = vmatprep.subr.bf16.mxu1 %v4330_v60 }
  0x7e   :  { %2949 = vmatpush1.bf16.msra.mxu0 %v4327_v58 }
  0x7f   :  { %2951 = vmatprep.subr.bf16.mxu0 %v4333_v63 }
  0x80   :  { %2981 = vmatpush1.bf16.msra.mxu1 %v4336_v7 }
  0x81   :  { %2983 = vmatprep.subr.bf16.mxu1 %v4342_v12 }
  0x82   :  { %2953 = vmatpush1.bf16.msra.mxu0 %v4339_v10 }
  0x83   :  { %2955 = vmatprep.subr.bf16.mxu0 %v4345_v15 }
  0x84   :  { %2985 = vmatpush1.bf16.msra.mxu1 %v4348_v25 }
  0x85   :  { %2987 = vmatprep.subr.bf16.mxu1 %v4354_v29 }
  0x86   :  { %2957 = vmatpush1.bf16.msra.mxu0 %v4351_v27 }
  0x87   :  { %2959 = vmatprep.subr.bf16.mxu0 %v4357_v34 }
  0x88   :  { %2989 = vmatpush1.bf16.msra.mxu1 %v4360_v40 }
  0x89   :  { %2991 = vmatprep.subr.bf16.mxu1 %v4366_v42 }
  0x8a   :  { %2961 = vmatpush1.bf16.msra.mxu0 %v4363_v41 }
  0x8b   :  { %2995 = vmatprep.subr.bf16.mxu0 %v4279_v4 }
  0x8c   :  { %2993 = vmatpush1.bf16.msra.mxu1 %v4370_v47 }
  0x8d   :  { %3027 = vmatprep.subr.bf16.mxu1 %v4289_v17 }
 0x140   :  { %v213_v53 = vpop.f32.mrb[0].mxu0 }
 0x141   :  { %v289_v54 = vadd.f32 %v213_v53, %v79_v50  ;;  %v215_v55 = vpop.f32.mrb[1].mxu0  ;;  %v312_v50 = vld [vmem:[#allocation4 + $0x20] sm:$0xff] }
 0x142   :  { %v290_v59 = vadd.f32 %v215_v55, %v80_v52  ;;  %v284_v62 = vpop.f32.mrb[0].mxu1  ;;  %v313_v52 = vld [vmem:[#allocation4 + $0x28] sm:$0xff] }
 0x143   :  { %v298_v61 = vmul.f32 0.5, %v289_v54  ;;  %v291_v2 = vadd.f32 %v284_v62, %v81_v56  ;;  %v286_v3 = vpop.f32.mrb[1].mxu1 }
 0x144   :  { %v293_v1 = vmul.f32 0.5, %v290_v59  ;;  %v292_v6 = vadd.f32 %v286_v3, %v82_v5  ;;  %v315_v5 = vld [vmem:[#allocation4 + $0x38] sm:$0xff] }
 0x145   :  { %3898 = vtanh.f32 %v298_v61  ;;  %v314_v61 = vld [vmem:[#allocation4 + $0x30] sm:$0xff] }
 0x146   :  { %3900 = vtanh.f32 %v293_v1  ;;  %v305_v11 = vmul.f32 0.5, %v292_v6 }
 0x147   :  { %3902 = vtanh.f32 %v291_v2 }
 0x148   :  { %3904 = vtanh.f32 %v305_v11 }
 0x14f   :  { %v3899_v13 = vpop.eup %3898 }
 0x150   :  { %v3901_v14 = vpop.eup %3900  ;;  %v300_v19 = vadd.f32 1.0, %v3899_v13 }
 0x151   :  { %v3903_v20 = vpop.eup %3902  ;;  %v295_v21 = vadd.f32 1.0, %v3901_v14 }
 0x152   :  { %v301_v23 = vmul.f32 0.5, %v300_v19  ;;  %v3905_v37 = vpop.eup %3904 }
 0x153   :  { %v296_v28 = vmul.f32 0.5, %v295_v21  ;;  %v307_v38 = vadd.f32 1.0, %v3905_v37 }
 0x154   :  { %v303_v31 = vmul.f32 %v3903_v20, %v301_v23 }
 0x155   :  { %v297_v33 = vmul.f32 %v296_v28, %v75_v24  ;;  %v308_v43 = vmul.f32 0.5, %v307_v38 }
 0x157   :  { %v4411_v35 = vadd.f32 %v303_v31, %v297_v33 }
 0x159   :  { %3906 = vtanh.f32 %v4411_v35 }
 0x163   :  { %v3907_v45 = vpop.eup %3906 }
 0x164   :  { %v310_v49 = vmul.f32 %v3907_v45, %v308_v43 }
 0x166   :  { %381 = vmatmul.mubr.f32.vlgmr.msra.gmra.mrb[2].mxu0 %v310_v49  ;;  %452 = vmatmul.mubr.f32.vlgmr.msra.gmra.mrb[2].mxu1 %v310_v49 }
 0x167   :  { %2997 = vmatpush1.bf16.msra.mxu0 %v4281_v8  ;;  %3029 = vmatpush1.bf16.msra.mxu1 %v4291_v18 }
 0x168   :  { %2999 = vmatprep.subr.bf16.mxu0 %v4283_v9  ;;  %3031 = vmatprep.subr.bf16.mxu1 %v4297_v26 }
 0x169   :  { %549 = vmatprep.mubr.f32.mxu0 %v4182_v0  ;;  %620 = vmatprep.mubr.f32.mxu1 %v4182_v0 }
 0x16b   :  { %3001 = vmatpush1.bf16.msra.mxu0 %v4287_v16  ;;  %3033 = vmatpush1.bf16.msra.mxu1 %v4300_v30 }
 0x16c   :  { %3003 = vmatprep.subr.bf16.mxu0 %v4294_v22  ;;  %3035 = vmatprep.subr.bf16.mxu1 %v4309_v39 }
 0x16f   :  { %3005 = vmatpush1.bf16.msra.mxu0 %v4303_v32  ;;  %3037 = vmatpush1.bf16.msra.mxu1 %v4312_v44 }
 0x170   :  { %3007 = vmatprep.subr.bf16.mxu0 %v4307_v36  ;;  %3039 = vmatprep.subr.bf16.mxu1 %v4318_v48 }
 0x173   :  { %3009 = vmatpush1.bf16.msra.mxu0 %v4315_v46  ;;  %3041 = vmatpush1.bf16.msra.mxu1 %v4324_v57 }
 0x174   :  { %3011 = vmatprep.subr.bf16.mxu0 %v4321_v51  ;;  %3043 = vmatprep.subr.bf16.mxu1 %v4330_v60 }
 0x177   :  { %3013 = vmatpush1.bf16.msra.mxu0 %v4327_v58  ;;  %3045 = vmatpush1.bf16.msra.mxu1 %v4336_v7 }
 0x178   :  { %3015 = vmatprep.subr.bf16.mxu0 %v4333_v63  ;;  %3047 = vmatprep.subr.bf16.mxu1 %v4342_v12 }
 0x17b   :  { %3017 = vmatpush1.bf16.msra.mxu0 %v4339_v10  ;;  %3049 = vmatpush1.bf16.msra.mxu1 %v4348_v25 }
 0x17c   :  { %3019 = vmatprep.subr.bf16.mxu0 %v4345_v15  ;;  %3051 = vmatprep.subr.bf16.mxu1 %v4354_v29 }
 0x17f   :  { %3021 = vmatpush1.bf16.msra.mxu0 %v4351_v27  ;;  %3053 = vmatpush1.bf16.msra.mxu1 %v4360_v40 }
 0x180   :  { %3023 = vmatprep.subr.bf16.mxu0 %v4357_v34  ;;  %3055 = vmatprep.subr.bf16.mxu1 %v4366_v42 }
 0x183   :  { %3025 = vmatpush1.bf16.msra.mxu0 %v4363_v41  ;;  %3057 = vmatpush1.bf16.msra.mxu1 %v4370_v47 }
 0x184   :  { %3059 = vmatprep.subr.bf16.mxu0 %v4279_v4  ;;  %3091 = vmatprep.subr.bf16.mxu1 %v4289_v17 }
 0x239   :  { %v382_v53 = vpop.f32.mrb[2].mxu0  ;;  %v453_v54 = vpop.f32.mrb[2].mxu1 }
 0x23a   :  { %v458_v55 = vadd.f32 %v382_v53, %v312_v50  ;;  %v384_v56 = vpop.f32.mrb[3].mxu0  ;;  %v455_v59 = vpop.f32.mrb[3].mxu1  ;;  %v460_v3 = vadd.f32 %v453_v54, %v314_v61  ;;  %v482_v50 = vld [vmem:[#allocation4 + $0x48] sm:$0xff] }
 0x23b   :  { %v459_v62 = vadd.f32 %v384_v56, %v313_v52  ;;  %v461_v6 = vadd.f32 %v455_v59, %v315_v5  ;;  %v483_v59 = vld [vmem:[#allocation4 + $0x50] sm:$0xff] }
 0x23c   :  { %v467_v1 = vmul.f32 0.5, %v458_v55 }
 0x23d   :  { %v462_v2 = vmul.f32 0.5, %v459_v62  ;;  %v474_v11 = vmul.f32 0.5, %v461_v6 }
 0x23e   :  { %3908 = vtanh.f32 %v467_v1 }
 0x23f   :  { %3910 = vtanh.f32 %v462_v2 }
 0x240   :  { %3912 = vtanh.f32 %v460_v3  ;;  %v484_v3 = vld [vmem:[#allocation4 + $0x58] sm:$0xff] }
 0x241   :  { %3914 = vtanh.f32 %v474_v11 }
 0x248   :  { %v3909_v13 = vpop.eup %3908 }
 0x249   :  { %v3911_v14 = vpop.eup %3910  ;;  %v469_v19 = vadd.f32 1.0, %v3909_v13 }
 0x24a   :  { %v464_v20 = vadd.f32 1.0, %v3911_v14  ;;  %v3913_v23 = vpop.eup %3912 }
 0x24b   :  { %v470_v21 = vmul.f32 0.5, %v469_v19  ;;  %v3915_v37 = vpop.eup %3914 }
 0x24c   :  { %v465_v24 = vmul.f32 0.5, %v464_v20  ;;  %v476_v38 = vadd.f32 1.0, %v3915_v37 }
 0x24d   :  { %v472_v28 = vmul.f32 %v3913_v23, %v470_v21 }
 0x24e   :  { %v466_v31 = vmul.f32 %v465_v24, %v4411_v35  ;;  %v477_v43 = vmul.f32 0.5, %v476_v38  ;;  %v481_v35 = vld [vmem:[#allocation4 + $0x40] sm:$0xff] }
 0x250   :  { %v4449_v33 = vadd.f32 %v472_v28, %v466_v31 }
 0x252   :  { %3916 = vtanh.f32 %v4449_v33 }
 0x25c   :  { %v3917_v45 = vpop.eup %3916 }
 0x25d   :  { %v479_v49 = vmul.f32 %v3917_v45, %v477_v43 }
 0x25f   :  { %550 = vmatmul.mubr.f32.vlgmr.msra.gmra.mrb[4].mxu0 %v479_v49  ;;  %621 = vmatmul.mubr.f32.vlgmr.msra.gmra.mrb[4].mxu1 %v479_v49 }
 0x260   :  { %3061 = vmatpush1.bf16.msra.mxu0 %v4281_v8  ;;  %3093 = vmatpush1.bf16.msra.mxu1 %v4291_v18 }
 0x261   :  { %3063 = vmatprep.subr.bf16.mxu0 %v4283_v9  ;;  %3095 = vmatprep.subr.bf16.mxu1 %v4297_v26 }
 0x262   :  { %718 = vmatprep.mubr.f32.mxu0 %v4182_v0  ;;  %789 = vmatprep.mubr.f32.mxu1 %v4182_v0 }
 0x264   :  { %3065 = vmatpush1.bf16.msra.mxu0 %v4287_v16  ;;  %3097 = vmatpush1.bf16.msra.mxu1 %v4300_v30 }
 0x265   :  { %3067 = vmatprep.subr.bf16.mxu0 %v4294_v22  ;;  %3099 = vmatprep.subr.bf16.mxu1 %v4309_v39 }
 0x268   :  { %3069 = vmatpush1.bf16.msra.mxu0 %v4303_v32  ;;  %3101 = vmatpush1.bf16.msra.mxu1 %v4312_v44 }
 0x269   :  { %3071 = vmatprep.subr.bf16.mxu0 %v4307_v36  ;;  %3103 = vmatprep.subr.bf16.mxu1 %v4318_v48 }
 0x26c   :  { %3073 = vmatpush1.bf16.msra.mxu0 %v4315_v46  ;;  %3105 = vmatpush1.bf16.msra.mxu1 %v4324_v57 }
 0x26d   :  { %3075 = vmatprep.subr.bf16.mxu0 %v4321_v51  ;;  %3107 = vmatprep.subr.bf16.mxu1 %v4330_v60 }
 0x270   :  { %3077 = vmatpush1.bf16.msra.mxu0 %v4327_v58  ;;  %3109 = vmatpush1.bf16.msra.mxu1 %v4336_v7 }
 0x271   :  { %3079 = vmatprep.subr.bf16.mxu0 %v4333_v63  ;;  %3111 = vmatprep.subr.bf16.mxu1 %v4342_v12 }
 0x274   :  { %3081 = vmatpush1.bf16.msra.mxu0 %v4339_v10  ;;  %3113 = vmatpush1.bf16.msra.mxu1 %v4348_v25 }
 0x275   :  { %3083 = vmatprep.subr.bf16.mxu0 %v4345_v15  ;;  %3115 = vmatprep.subr.bf16.mxu1 %v4354_v29 }
 0x278   :  { %3085 = vmatpush1.bf16.msra.mxu0 %v4351_v27  ;;  %3117 = vmatpush1.bf16.msra.mxu1 %v4360_v40 }
 0x279   :  { %3087 = vmatprep.subr.bf16.mxu0 %v4357_v34  ;;  %3119 = vmatprep.subr.bf16.mxu1 %v4366_v42 }
 0x27c   :  { %3089 = vmatpush1.bf16.msra.mxu0 %v4363_v41  ;;  %3121 = vmatpush1.bf16.msra.mxu1 %v4370_v47 }
 0x27d   :  { %3123 = vmatprep.subr.bf16.mxu0 %v4279_v4  ;;  %3155 = vmatprep.subr.bf16.mxu1 %v4289_v17 }
 0x332   :  { %v551_v52 = vpop.f32.mrb[4].mxu0  ;;  %v622_v53 = vpop.f32.mrb[4].mxu1 }
 0x333   :  { %v627_v54 = vadd.f32 %v551_v52, %v481_v35  ;;  %v553_v55 = vpop.f32.mrb[5].mxu0  ;;  %v624_v56 = vpop.f32.mrb[5].mxu1  ;;  %v629_v2 = vadd.f32 %v622_v53, %v483_v59  ;;  %v651_v35 = vld [vmem:[#allocation4 + $0x68] sm:$0xff] }
 0x334   :  { %v628_v61 = vadd.f32 %v553_v55, %v482_v50  ;;  %v630_v5 = vadd.f32 %v624_v56, %v484_v3  ;;  %v652_v56 = vld [vmem:[#allocation4 + $0x70] sm:$0xff] }
 0x335   :  { %v636_v62 = vmul.f32 0.5, %v627_v54 }
 0x336   :  { %v631_v1 = vmul.f32 0.5, %v628_v61  ;;  %v643_v6 = vmul.f32 0.5, %v630_v5 }
 0x337   :  { %3918 = vtanh.f32 %v636_v62 }
 0x338   :  { %3920 = vtanh.f32 %v631_v1 }
 0x339   :  { %3922 = vtanh.f32 %v629_v2  ;;  %v653_v2 = vld [vmem:[#allocation4 + $0x78] sm:$0xff] }
 0x33a   :  { %3924 = vtanh.f32 %v643_v6 }
 0x341   :  { %v3919_v11 = vpop.eup %3918 }
 0x342   :  { %v3921_v13 = vpop.eup %3920  ;;  %v638_v14 = vadd.f32 1.0, %v3919_v11 }
 0x343   :  { %v633_v19 = vadd.f32 1.0, %v3921_v13  ;;  %v3923_v21 = vpop.eup %3922 }
 0x344   :  { %v639_v20 = vmul.f32 0.5, %v638_v14  ;;  %v3925_v37 = vpop.eup %3924 }
 0x345   :  { %v634_v23 = vmul.f32 0.5, %v633_v19  ;;  %v645_v38 = vadd.f32 1.0, %v3925_v37 }
 0x346   :  { %v641_v24 = vmul.f32 %v3923_v21, %v639_v20 }
 0x347   :  { %v635_v28 = vmul.f32 %v634_v23, %v4449_v33  ;;  %v646_v43 = vmul.f32 0.5, %v645_v38  ;;  %v650_v33 = vld [vmem:[#allocation4 + $0x60] sm:$0xff] }
 0x349   :  { %v4487_v31 = vadd.f32 %v641_v24, %v635_v28 }
 0x34b   :  { %3926 = vtanh.f32 %v4487_v31 }
 0x355   :  { %v3927_v45 = vpop.eup %3926 }
 0x356   :  { %v648_v49 = vmul.f32 %v3927_v45, %v646_v43 }
 0x358   :  { %719 = vmatmul.mubr.f32.vlgmr.msra.gmra.mrb[6].mxu0 %v648_v49  ;;  %790 = vmatmul.mubr.f32.vlgmr.msra.gmra.mrb[6].mxu1 %v648_v49 }
 0x359   :  { %3125 = vmatpush1.bf16.msra.mxu0 %v4281_v8  ;;  %3157 = vmatpush1.bf16.msra.mxu1 %v4291_v18 }
 0x35a   :  { %3127 = vmatprep.subr.bf16.mxu0 %v4283_v9  ;;  %3159 = vmatprep.subr.bf16.mxu1 %v4297_v26 }
 0x35b   :  { %887 = vmatprep.mubr.f32.mxu0 %v4182_v0  ;;  %958 = vmatprep.mubr.f32.mxu1 %v4182_v0 }
 0x35d   :  { %3129 = vmatpush1.bf16.msra.mxu0 %v4287_v16  ;;  %3161 = vmatpush1.bf16.msra.mxu1 %v4300_v30 }
 0x35e   :  { %3131 = vmatprep.subr.bf16.mxu0 %v4294_v22  ;;  %3163 = vmatprep.subr.bf16.mxu1 %v4309_v39 }
 0x361   :  { %3133 = vmatpush1.bf16.msra.mxu0 %v4303_v32  ;;  %3165 = vmatpush1.bf16.msra.mxu1 %v4312_v44 }
 0x362   :  { %3135 = vmatprep.subr.bf16.mxu0 %v4307_v36  ;;  %3167 = vmatprep.subr.bf16.mxu1 %v4318_v48 }
 0x365   :  { %3137 = vmatpush1.bf16.msra.mxu0 %v4315_v46  ;;  %3169 = vmatpush1.bf16.msra.mxu1 %v4324_v57 }
 0x366   :  { %3139 = vmatprep.subr.bf16.mxu0 %v4321_v51  ;;  %3171 = vmatprep.subr.bf16.mxu1 %v4330_v60 }
 0x369   :  { %3141 = vmatpush1.bf16.msra.mxu0 %v4327_v58  ;;  %3173 = vmatpush1.bf16.msra.mxu1 %v4336_v7 }
 0x36a   :  { %3143 = vmatprep.subr.bf16.mxu0 %v4333_v63  ;;  %3175 = vmatprep.subr.bf16.mxu1 %v4342_v12 }
 0x36d   :  { %3145 = vmatpush1.bf16.msra.mxu0 %v4339_v10  ;;  %3177 = vmatpush1.bf16.msra.mxu1 %v4348_v25 }
 0x36e   :  { %3147 = vmatprep.subr.bf16.mxu0 %v4345_v15  ;;  %3179 = vmatprep.subr.bf16.mxu1 %v4354_v29 }
 0x371   :  { %3149 = vmatpush1.bf16.msra.mxu0 %v4351_v27  ;;  %3181 = vmatpush1.bf16.msra.mxu1 %v4360_v40 }
 0x372   :  { %3151 = vmatprep.subr.bf16.mxu0 %v4357_v34  ;;  %3183 = vmatprep.subr.bf16.mxu1 %v4366_v42 }
 0x375   :  { %3153 = vmatpush1.bf16.msra.mxu0 %v4363_v41  ;;  %3185 = vmatpush1.bf16.msra.mxu1 %v4370_v47 }
 0x376   :  { %3187 = vmatprep.subr.bf16.mxu0 %v4279_v4  ;;  %3219 = vmatprep.subr.bf16.mxu1 %v4289_v17 }
 0x42b   :  { %v720_v50 = vpop.f32.mrb[6].mxu0  ;;  %v791_v52 = vpop.f32.mrb[6].mxu1 }
 0x42c   :  { %v796_v53 = vadd.f32 %v720_v50, %v650_v33  ;;  %v722_v54 = vpop.f32.mrb[7].mxu0  ;;  %v793_v55 = vpop.f32.mrb[7].mxu1  ;;  %v798_v1 = vadd.f32 %v791_v52, %v652_v56  ;;  %v820_v33 = vld [vmem:[#allocation4 + $0x88] sm:$0xff] }
 0x42d   :  { %v797_v59 = vadd.f32 %v722_v54, %v651_v35  ;;  %v799_v3 = vadd.f32 %v793_v55, %v653_v2  ;;  %v821_v55 = vld [vmem:[#allocation4 + $0x90] sm:$0xff] }
 0x42e   :  { %v805_v61 = vmul.f32 0.5, %v796_v53 }
 0x42f   :  { %v800_v62 = vmul.f32 0.5, %v797_v59  ;;  %v812_v5 = vmul.f32 0.5, %v799_v3 }
 0x430   :  { %3928 = vtanh.f32 %v805_v61 }
 0x431   :  { %3930 = vtanh.f32 %v800_v62 }
 0x432   :  { %3932 = vtanh.f32 %v798_v1  ;;  %v822_v1 = vld [vmem:[#allocation4 + $0x98] sm:$0xff] }
 0x433   :  { %3934 = vtanh.f32 %v812_v5 }
 0x43a   :  { %v3929_v6 = vpop.eup %3928 }
 0x43b   :  { %v3931_v11 = vpop.eup %3930  ;;  %v807_v13 = vadd.f32 1.0, %v3929_v6 }
 0x43c   :  { %v802_v14 = vadd.f32 1.0, %v3931_v11  ;;  %v3933_v20 = vpop.eup %3932 }
 0x43d   :  { %v808_v19 = vmul.f32 0.5, %v807_v13  ;;  %v3935_v37 = vpop.eup %3934 }
 0x43e   :  { %v803_v21 = vmul.f32 0.5, %v802_v14  ;;  %v814_v38 = vadd.f32 1.0, %v3935_v37 }
 0x43f   :  { %v810_v23 = vmul.f32 %v3933_v20, %v808_v19 }
 0x440   :  { %v804_v24 = vmul.f32 %v803_v21, %v4487_v31  ;;  %v815_v43 = vmul.f32 0.5, %v814_v38  ;;  %v819_v31 = vld [vmem:[#allocation4 + $0x80] sm:$0xff] }
 0x442   :  { %v4525_v28 = vadd.f32 %v810_v23, %v804_v24 }
 0x444   :  { %3936 = vtanh.f32 %v4525_v28 }
 0x44e   :  { %v3937_v45 = vpop.eup %3936 }
 0x44f   :  { %v817_v49 = vmul.f32 %v3937_v45, %v815_v43 }
 0x451   :  { %888 = vmatmul.mubr.f32.vlgmr.msra.gmra.mrb[8].mxu0 %v817_v49  ;;  %959 = vmatmul.mubr.f32.vlgmr.msra.gmra.mrb[8].mxu1 %v817_v49 }
 0x452   :  { %3189 = vmatpush1.bf16.msra.mxu0 %v4281_v8  ;;  %3221 = vmatpush1.bf16.msra.mxu1 %v4291_v18 }
 0x453   :  { %3191 = vmatprep.subr.bf16.mxu0 %v4283_v9  ;;  %3223 = vmatprep.subr.bf16.mxu1 %v4297_v26 }
 0x454   :  { %1056 = vmatprep.mubr.f32.mxu0 %v4182_v0  ;;  %1127 = vmatprep.mubr.f32.mxu1 %v4182_v0 }
 0x456   :  { %3193 = vmatpush1.bf16.msra.mxu0 %v4287_v16  ;;  %3225 = vmatpush1.bf16.msra.mxu1 %v4300_v30 }
 0x457   :  { %3195 = vmatprep.subr.bf16.mxu0 %v4294_v22  ;;  %3227 = vmatprep.subr.bf16.mxu1 %v4309_v39 }
 0x45a   :  { %3197 = vmatpush1.bf16.msra.mxu0 %v4303_v32  ;;  %3229 = vmatpush1.bf16.msra.mxu1 %v4312_v44 }
 0x45b   :  { %3199 = vmatprep.subr.bf16.mxu0 %v4307_v36  ;;  %3231 = vmatprep.subr.bf16.mxu1 %v4318_v48 }
 0x45e   :  { %3201 = vmatpush1.bf16.msra.mxu0 %v4315_v46  ;;  %3233 = vmatpush1.bf16.msra.mxu1 %v4324_v57 }
 0x45f   :  { %3203 = vmatprep.subr.bf16.mxu0 %v4321_v51  ;;  %3235 = vmatprep.subr.bf16.mxu1 %v4330_v60 }
 0x462   :  { %3205 = vmatpush1.bf16.msra.mxu0 %v4327_v58  ;;  %3237 = vmatpush1.bf16.msra.mxu1 %v4336_v7 }
 0x463   :  { %3207 = vmatprep.subr.bf16.mxu0 %v4333_v63  ;;  %3239 = vmatprep.subr.bf16.mxu1 %v4342_v12 }
 0x466   :  { %3209 = vmatpush1.bf16.msra.mxu0 %v4339_v10  ;;  %3241 = vmatpush1.bf16.msra.mxu1 %v4348_v25 }
 0x467   :  { %3211 = vmatprep.subr.bf16.mxu0 %v4345_v15  ;;  %3243 = vmatprep.subr.bf16.mxu1 %v4354_v29 }
 0x46a   :  { %3213 = vmatpush1.bf16.msra.mxu0 %v4351_v27  ;;  %3245 = vmatpush1.bf16.msra.mxu1 %v4360_v40 }
 0x46b   :  { %3215 = vmatprep.subr.bf16.mxu0 %v4357_v34  ;;  %3247 = vmatprep.subr.bf16.mxu1 %v4366_v42 }
 0x46e   :  { %3217 = vmatpush1.bf16.msra.mxu0 %v4363_v41  ;;  %3249 = vmatpush1.bf16.msra.mxu1 %v4370_v47 }
 0x46f   :  { %3251 = vmatprep.subr.bf16.mxu0 %v4279_v4  ;;  %3283 = vmatprep.subr.bf16.mxu1 %v4289_v17 }
 0x524   :  { %v889_v35 = vpop.f32.mrb[8].mxu0  ;;  %v960_v50 = vpop.f32.mrb[8].mxu1 }
 0x525   :  { %v965_v52 = vadd.f32 %v889_v35, %v819_v31  ;;  %v891_v53 = vpop.f32.mrb[9].mxu0  ;;  %v962_v54 = vpop.f32.mrb[9].mxu1  ;;  %v967_v62 = vadd.f32 %v960_v50, %v821_v55  ;;  %v989_v31 = vld [vmem:[#allocation4 + $0xa8] sm:$0xff] }
 0x526   :  { %v966_v56 = vadd.f32 %v891_v53, %v820_v33  ;;  %v968_v2 = vadd.f32 %v962_v54, %v822_v1  ;;  %v990_v54 = vld [vmem:[#allocation4 + $0xb0] sm:$0xff] }
 0x527   :  { %v974_v59 = vmul.f32 0.5, %v965_v52 }
 0x528   :  { %v969_v61 = vmul.f32 0.5, %v966_v56  ;;  %v981_v3 = vmul.f32 0.5, %v968_v2 }
 0x529   :  { %3938 = vtanh.f32 %v974_v59 }
 0x52a   :  { %3940 = vtanh.f32 %v969_v61 }
 0x52b   :  { %3942 = vtanh.f32 %v967_v62  ;;  %v991_v62 = vld [vmem:[#allocation4 + $0xb8] sm:$0xff] }
 0x52c   :  { %3944 = vtanh.f32 %v981_v3 }
 0x533   :  { %v3939_v5 = vpop.eup %3938 }
 0x534   :  { %v3941_v6 = vpop.eup %3940  ;;  %v976_v11 = vadd.f32 1.0, %v3939_v5 }
 0x535   :  { %v971_v13 = vadd.f32 1.0, %v3941_v6  ;;  %v3943_v19 = vpop.eup %3942 }
 0x536   :  { %v977_v14 = vmul.f32 0.5, %v976_v11  ;;  %v3945_v37 = vpop.eup %3944 }
 0x537   :  { %v972_v20 = vmul.f32 0.5, %v971_v13  ;;  %v983_v38 = vadd.f32 1.0, %v3945_v37 }
 0x538   :  { %v979_v21 = vmul.f32 %v3943_v19, %v977_v14 }
 0x539   :  { %v973_v23 = vmul.f32 %v972_v20, %v4525_v28  ;;  %v984_v43 = vmul.f32 0.5, %v983_v38  ;;  %v988_v28 = vld [vmem:[#allocation4 + $0xa0] sm:$0xff] }
 0x53b   :  { %v4563_v24 = vadd.f32 %v979_v21, %v973_v23 }
 0x53d   :  { %3946 = vtanh.f32 %v4563_v24 }
 0x547   :  { %v3947_v45 = vpop.eup %3946 }
 0x548   :  { %v986_v49 = vmul.f32 %v3947_v45, %v984_v43 }
 0x54a   :  { %1057 = vmatmul.mubr.f32.vlgmr.msra.gmra.mrb[10].mxu0 %v986_v49  ;;  %1128 = vmatmul.mubr.f32.vlgmr.msra.gmra.mrb[10].mxu1 %v986_v49 }
 0x54b   :  { %3253 = vmatpush1.bf16.msra.mxu0 %v4281_v8  ;;  %3285 = vmatpush1.bf16.msra.mxu1 %v4291_v18 }
 0x54c   :  { %3255 = vmatprep.subr.bf16.mxu0 %v4283_v9  ;;  %3287 = vmatprep.subr.bf16.mxu1 %v4297_v26 }
 0x54d   :  { %1225 = vmatprep.mubr.f32.mxu0 %v4182_v0  ;;  %1296 = vmatprep.mubr.f32.mxu1 %v4182_v0 }
 0x54f   :  { %3257 = vmatpush1.bf16.msra.mxu0 %v4287_v16  ;;  %3289 = vmatpush1.bf16.msra.mxu1 %v4300_v30 }
 0x550   :  { %3259 = vmatprep.subr.bf16.mxu0 %v4294_v22  ;;  %3291 = vmatprep.subr.bf16.mxu1 %v4309_v39 }
 0x553   :  { %3261 = vmatpush1.bf16.msra.mxu0 %v4303_v32  ;;  %3293 = vmatpush1.bf16.msra.mxu1 %v4312_v44 }
 0x554   :  { %3263 = vmatprep.subr.bf16.mxu0 %v4307_v36  ;;  %3295 = vmatprep.subr.bf16.mxu1 %v4318_v48 }
 0x557   :  { %3265 = vmatpush1.bf16.msra.mxu0 %v4315_v46  ;;  %3297 = vmatpush1.bf16.msra.mxu1 %v4324_v57 }
 0x558   :  { %3267 = vmatprep.subr.bf16.mxu0 %v4321_v51  ;;  %3299 = vmatprep.subr.bf16.mxu1 %v4330_v60 }
 0x55b   :  { %3269 = vmatpush1.bf16.msra.mxu0 %v4327_v58  ;;  %3301 = vmatpush1.bf16.msra.mxu1 %v4336_v7 }
 0x55c   :  { %3271 = vmatprep.subr.bf16.mxu0 %v4333_v63  ;;  %3303 = vmatprep.subr.bf16.mxu1 %v4342_v12 }
 0x55f   :  { %3273 = vmatpush1.bf16.msra.mxu0 %v4339_v10  ;;  %3305 = vmatpush1.bf16.msra.mxu1 %v4348_v25 }
 0x560   :  { %3275 = vmatprep.subr.bf16.mxu0 %v4345_v15  ;;  %3307 = vmatprep.subr.bf16.mxu1 %v4354_v29 }
 0x563   :  { %3277 = vmatpush1.bf16.msra.mxu0 %v4351_v27  ;;  %3309 = vmatpush1.bf16.msra.mxu1 %v4360_v40 }
 0x564   :  { %3279 = vmatprep.subr.bf16.mxu0 %v4357_v34  ;;  %3311 = vmatprep.subr.bf16.mxu1 %v4366_v42 }
 0x567   :  { %3281 = vmatpush1.bf16.msra.mxu0 %v4363_v41  ;;  %3313 = vmatpush1.bf16.msra.mxu1 %v4370_v47 }
 0x568   :  { %3315 = vmatprep.subr.bf16.mxu0 %v4279_v4  ;;  %3347 = vmatprep.subr.bf16.mxu1 %v4289_v17 }
 0x61d   :  { %v1058_v33 = vpop.f32.mrb[10].mxu0  ;;  %v1129_v35 = vpop.f32.mrb[10].mxu1 }
 0x61e   :  { %v1134_v50 = vadd.f32 %v1058_v33, %v988_v28  ;;  %v1060_v52 = vpop.f32.mrb[11].mxu0  ;;  %v1131_v53 = vpop.f32.mrb[11].mxu1  ;;  %v1136_v61 = vadd.f32 %v1129_v35, %v990_v54  ;;  %v1158_v28 = vld [vmem:[#allocation4 + $0xc8] sm:$0xff] }
 0x61f   :  { %v1135_v55 = vadd.f32 %v1060_v52, %v989_v31  ;;  %v1137_v1 = vadd.f32 %v1131_v53, %v991_v62  ;;  %v1159_v53 = vld [vmem:[#allocation4 + $0xd0] sm:$0xff] }
 0x620   :  { %v1143_v56 = vmul.f32 0.5, %v1134_v50 }
 0x621   :  { %v1138_v59 = vmul.f32 0.5, %v1135_v55  ;;  %v1150_v2 = vmul.f32 0.5, %v1137_v1 }
 0x622   :  { %3948 = vtanh.f32 %v1143_v56 }
 0x623   :  { %3950 = vtanh.f32 %v1138_v59 }
 0x624   :  { %3952 = vtanh.f32 %v1136_v61  ;;  %v1160_v61 = vld [vmem:[#allocation4 + $0xd8] sm:$0xff] }
 0x625   :  { %3954 = vtanh.f32 %v1150_v2 }
 0x62c   :  { %v3949_v3 = vpop.eup %3948 }
 0x62d   :  { %v3951_v5 = vpop.eup %3950  ;;  %v1145_v6 = vadd.f32 1.0, %v3949_v3 }
 0x62e   :  { %v1140_v11 = vadd.f32 1.0, %v3951_v5  ;;  %v3953_v14 = vpop.eup %3952 }
 0x62f   :  { %v1146_v13 = vmul.f32 0.5, %v1145_v6  ;;  %v3955_v37 = vpop.eup %3954 }
 0x630   :  { %v1141_v19 = vmul.f32 0.5, %v1140_v11  ;;  %v1152_v38 = vadd.f32 1.0, %v3955_v37 }
 0x631   :  { %v1148_v20 = vmul.f32 %v3953_v14, %v1146_v13 }
 0x632   :  { %v1142_v21 = vmul.f32 %v1141_v19, %v4563_v24  ;;  %v1153_v43 = vmul.f32 0.5, %v1152_v38  ;;  %v1157_v24 = vld [vmem:[#allocation4 + $0xc0] sm:$0xff] }
 0x634   :  { %v4601_v23 = vadd.f32 %v1148_v20, %v1142_v21 }
 0x636   :  { %3956 = vtanh.f32 %v4601_v23 }
 0x640   :  { %v3957_v45 = vpop.eup %3956 }
 0x641   :  { %v1155_v49 = vmul.f32 %v3957_v45, %v1153_v43 }
 0x643   :  { %1226 = vmatmul.mubr.f32.vlgmr.msra.gmra.mrb[12].mxu0 %v1155_v49  ;;  %1297 = vmatmul.mubr.f32.vlgmr.msra.gmra.mrb[12].mxu1 %v1155_v49 }
 0x644   :  { %3317 = vmatpush1.bf16.msra.mxu0 %v4281_v8  ;;  %3349 = vmatpush1.bf16.msra.mxu1 %v4291_v18 }
 0x645   :  { %3319 = vmatprep.subr.bf16.mxu0 %v4283_v9  ;;  %3351 = vmatprep.subr.bf16.mxu1 %v4297_v26 }
 0x646   :  { %1394 = vmatprep.mubr.f32.mxu0 %v4182_v0  ;;  %1465 = vmatprep.mubr.f32.mxu1 %v4182_v0 }
 0x648   :  { %3321 = vmatpush1.bf16.msra.mxu0 %v4287_v16  ;;  %3353 = vmatpush1.bf16.msra.mxu1 %v4300_v30 }
 0x649   :  { %3323 = vmatprep.subr.bf16.mxu0 %v4294_v22  ;;  %3355 = vmatprep.subr.bf16.mxu1 %v4309_v39 }
 0x64c   :  { %3325 = vmatpush1.bf16.msra.mxu0 %v4303_v32  ;;  %3357 = vmatpush1.bf16.msra.mxu1 %v4312_v44 }
 0x64d   :  { %3327 = vmatprep.subr.bf16.mxu0 %v4307_v36  ;;  %3359 = vmatprep.subr.bf16.mxu1 %v4318_v48 }
 0x650   :  { %3329 = vmatpush1.bf16.msra.mxu0 %v4315_v46  ;;  %3361 = vmatpush1.bf16.msra.mxu1 %v4324_v57 }
 0x651   :  { %3331 = vmatprep.subr.bf16.mxu0 %v4321_v51  ;;  %3363 = vmatprep.subr.bf16.mxu1 %v4330_v60 }
 0x654   :  { %3333 = vmatpush1.bf16.msra.mxu0 %v4327_v58  ;;  %3365 = vmatpush1.bf16.msra.mxu1 %v4336_v7 }
 0x655   :  { %3335 = vmatprep.subr.bf16.mxu0 %v4333_v63  ;;  %3367 = vmatprep.subr.bf16.mxu1 %v4342_v12 }
 0x658   :  { %3337 = vmatpush1.bf16.msra.mxu0 %v4339_v10  ;;  %3369 = vmatpush1.bf16.msra.mxu1 %v4348_v25 }
 0x659   :  { %3339 = vmatprep.subr.bf16.mxu0 %v4345_v15  ;;  %3371 = vmatprep.subr.bf16.mxu1 %v4354_v29 }
 0x65c   :  { %3341 = vmatpush1.bf16.msra.mxu0 %v4351_v27  ;;  %3373 = vmatpush1.bf16.msra.mxu1 %v4360_v40 }
 0x65d   :  { %3343 = vmatprep.subr.bf16.mxu0 %v4357_v34  ;;  %3375 = vmatprep.subr.bf16.mxu1 %v4366_v42 }
 0x660   :  { %3345 = vmatpush1.bf16.msra.mxu0 %v4363_v41  ;;  %3377 = vmatpush1.bf16.msra.mxu1 %v4370_v47 }
 0x661   :  { %3379 = vmatprep.subr.bf16.mxu0 %v4279_v4  ;;  %3411 = vmatprep.subr.bf16.mxu1 %v4289_v17 }
 0x716   :  { %v1227_v31 = vpop.f32.mrb[12].mxu0  ;;  %v1298_v33 = vpop.f32.mrb[12].mxu1 }
 0x717   :  { %v1303_v35 = vadd.f32 %v1227_v31, %v1157_v24  ;;  %v1229_v50 = vpop.f32.mrb[13].mxu0  ;;  %v1300_v52 = vpop.f32.mrb[13].mxu1  ;;  %v1305_v59 = vadd.f32 %v1298_v33, %v1159_v53  ;;  %v1327_v24 = vld [vmem:[#allocation4 + $0xe8] sm:$0xff] }
 0x718   :  { %v1304_v54 = vadd.f32 %v1229_v50, %v1158_v28  ;;  %v1306_v62 = vadd.f32 %v1300_v52, %v1160_v61  ;;  %v1328_v52 = vld [vmem:[#allocation4 + $0xf0] sm:$0xff] }
 0x719   :  { %v1312_v55 = vmul.f32 0.5, %v1303_v35 }
 0x71a   :  { %v1307_v56 = vmul.f32 0.5, %v1304_v54  ;;  %v1319_v1 = vmul.f32 0.5, %v1306_v62 }
 0x71b   :  { %3958 = vtanh.f32 %v1312_v55 }
 0x71c   :  { %3960 = vtanh.f32 %v1307_v56 }
 0x71d   :  { %3962 = vtanh.f32 %v1305_v59  ;;  %v1329_v59 = vld [vmem:[#allocation4 + $0xf8] sm:$0xff] }
 0x71e   :  { %3964 = vtanh.f32 %v1319_v1 }
 0x725   :  { %v3959_v2 = vpop.eup %3958 }
 0x726   :  { %v3961_v3 = vpop.eup %3960  ;;  %v1314_v5 = vadd.f32 1.0, %v3959_v2 }
 0x727   :  { %v1309_v6 = vadd.f32 1.0, %v3961_v3  ;;  %v3963_v13 = vpop.eup %3962 }
 0x728   :  { %v1315_v11 = vmul.f32 0.5, %v1314_v5  ;;  %v3965_v37 = vpop.eup %3964 }
 0x729   :  { %v1310_v14 = vmul.f32 0.5, %v1309_v6  ;;  %v1321_v38 = vadd.f32 1.0, %v3965_v37 }
 0x72a   :  { %v1317_v19 = vmul.f32 %v3963_v13, %v1315_v11 }
 0x72b   :  { %v1311_v20 = vmul.f32 %v1310_v14, %v4601_v23  ;;  %v1322_v43 = vmul.f32 0.5, %v1321_v38  ;;  %v1326_v23 = vld [vmem:[#allocation4 + $0xe0] sm:$0xff] }
 0x72d   :  { %v4639_v21 = vadd.f32 %v1317_v19, %v1311_v20 }
 0x72f   :  { %3966 = vtanh.f32 %v4639_v21 }
 0x739   :  { %v3967_v45 = vpop.eup %3966 }
 0x73a   :  { %v1324_v49 = vmul.f32 %v3967_v45, %v1322_v43 }
 0x73c   :  { %1395 = vmatmul.mubr.f32.vlgmr.msra.gmra.mrb[14].mxu0 %v1324_v49  ;;  %1466 = vmatmul.mubr.f32.vlgmr.msra.gmra.mrb[14].mxu1 %v1324_v49 }
 0x73d   :  { %3381 = vmatpush1.bf16.msra.mxu0 %v4281_v8  ;;  %3413 = vmatpush1.bf16.msra.mxu1 %v4291_v18 }
 0x73e   :  { %3383 = vmatprep.subr.bf16.mxu0 %v4283_v9  ;;  %3415 = vmatprep.subr.bf16.mxu1 %v4297_v26 }
 0x73f   :  { %1563 = vmatprep.mubr.f32.mxu0 %v4182_v0  ;;  %1634 = vmatprep.mubr.f32.mxu1 %v4182_v0 }
 0x741   :  { %3385 = vmatpush1.bf16.msra.mxu0 %v4287_v16  ;;  %3417 = vmatpush1.bf16.msra.mxu1 %v4300_v30 }
 0x742   :  { %3387 = vmatprep.subr.bf16.mxu0 %v4294_v22  ;;  %3419 = vmatprep.subr.bf16.mxu1 %v4309_v39 }
 0x745   :  { %3389 = vmatpush1.bf16.msra.mxu0 %v4303_v32  ;;  %3421 = vmatpush1.bf16.msra.mxu1 %v4312_v44 }
 0x746   :  { %3391 = vmatprep.subr.bf16.mxu0 %v4307_v36  ;;  %3423 = vmatprep.subr.bf16.mxu1 %v4318_v48 }
 0x749   :  { %3393 = vmatpush1.bf16.msra.mxu0 %v4315_v46  ;;  %3425 = vmatpush1.bf16.msra.mxu1 %v4324_v57 }
 0x74a   :  { %3395 = vmatprep.subr.bf16.mxu0 %v4321_v51  ;;  %3427 = vmatprep.subr.bf16.mxu1 %v4330_v60 }
 0x74d   :  { %3397 = vmatpush1.bf16.msra.mxu0 %v4327_v58  ;;  %3429 = vmatpush1.bf16.msra.mxu1 %v4336_v7 }
 0x74e   :  { %3399 = vmatprep.subr.bf16.mxu0 %v4333_v63  ;;  %3431 = vmatprep.subr.bf16.mxu1 %v4342_v12 }
 0x751   :  { %3401 = vmatpush1.bf16.msra.mxu0 %v4339_v10  ;;  %3433 = vmatpush1.bf16.msra.mxu1 %v4348_v25 }
 0x752   :  { %3403 = vmatprep.subr.bf16.mxu0 %v4345_v15  ;;  %3435 = vmatprep.subr.bf16.mxu1 %v4354_v29 }
 0x755   :  { %3405 = vmatpush1.bf16.msra.mxu0 %v4351_v27  ;;  %3437 = vmatpush1.bf16.msra.mxu1 %v4360_v40 }
 0x756   :  { %3407 = vmatprep.subr.bf16.mxu0 %v4357_v34  ;;  %3439 = vmatprep.subr.bf16.mxu1 %v4366_v42 }
 0x759   :  { %3409 = vmatpush1.bf16.msra.mxu0 %v4363_v41  ;;  %3441 = vmatpush1.bf16.msra.mxu1 %v4370_v47 }
 0x75a   :  { %3443 = vmatprep.subr.bf16.mxu0 %v4279_v4  ;;  %3475 = vmatprep.subr.bf16.mxu1 %v4289_v17 }
 0x80f   :  { %v1396_v28 = vpop.f32.mrb[14].mxu0  ;;  %v1467_v31 = vpop.f32.mrb[14].mxu1 }
 0x810   :  { %v1472_v33 = vadd.f32 %v1396_v28, %v1326_v23  ;;  %v1398_v35 = vpop.f32.mrb[15].mxu0  ;;  %v1469_v50 = vpop.f32.mrb[15].mxu1  ;;  %v1474_v56 = vadd.f32 %v1467_v31, %v1328_v52  ;;  %v1496_v23 = vld [vmem:[#allocation4 + $0x108] sm:$0xff] }
 0x811   :  { %v1473_v53 = vadd.f32 %v1398_v35, %v1327_v24  ;;  %v1475_v61 = vadd.f32 %v1469_v50, %v1329_v59  ;;  %v1497_v50 = vld [vmem:[#allocation4 + $0x110] sm:$0xff] }
 0x812   :  { %v1481_v54 = vmul.f32 0.5, %v1472_v33 }
 0x813   :  { %v1476_v55 = vmul.f32 0.5, %v1473_v53  ;;  %v1488_v62 = vmul.f32 0.5, %v1475_v61 }
 0x814   :  { %3968 = vtanh.f32 %v1481_v54 }
 0x815   :  { %3970 = vtanh.f32 %v1476_v55 }
 0x816   :  { %3972 = vtanh.f32 %v1474_v56  ;;  %v1498_v56 = vld [vmem:[#allocation4 + $0x118] sm:$0xff] }
 0x817   :  { %3974 = vtanh.f32 %v1488_v62 }
 0x81e   :  { %v3969_v1 = vpop.eup %3968 }
 0x81f   :  { %v3971_v2 = vpop.eup %3970  ;;  %v1483_v3 = vadd.f32 1.0, %v3969_v1 }
 0x820   :  { %v1478_v5 = vadd.f32 1.0, %v3971_v2  ;;  %v3973_v11 = vpop.eup %3972 }
 0x821   :  { %v1484_v6 = vmul.f32 0.5, %v1483_v3  ;;  %v3975_v37 = vpop.eup %3974 }
 0x822   :  { %v1479_v13 = vmul.f32 0.5, %v1478_v5  ;;  %v1490_v38 = vadd.f32 1.0, %v3975_v37 }
 0x823   :  { %v1486_v14 = vmul.f32 %v3973_v11, %v1484_v6 }
 0x824   :  { %v1480_v19 = vmul.f32 %v1479_v13, %v4639_v21  ;;  %v1491_v43 = vmul.f32 0.5, %v1490_v38  ;;  %v1495_v21 = vld [vmem:[#allocation4 + $0x100] sm:$0xff] }
 0x826   :  { %v4677_v20 = vadd.f32 %v1486_v14, %v1480_v19 }
 0x828   :  { %3976 = vtanh.f32 %v4677_v20 }
 0x832   :  { %v3977_v45 = vpop.eup %3976 }
 0x833   :  { %v1493_v49 = vmul.f32 %v3977_v45, %v1491_v43 }
 0x835   :  { %1564 = vmatmul.mubr.f32.vlgmr.msra.gmra.mrb[16].mxu0 %v1493_v49  ;;  %1635 = vmatmul.mubr.f32.vlgmr.msra.gmra.mrb[16].mxu1 %v1493_v49 }
 0x836   :  { %3445 = vmatpush1.bf16.msra.mxu0 %v4281_v8  ;;  %3477 = vmatpush1.bf16.msra.mxu1 %v4291_v18 }
 0x837   :  { %3447 = vmatprep.subr.bf16.mxu0 %v4283_v9  ;;  %3479 = vmatprep.subr.bf16.mxu1 %v4297_v26 }
 0x838   :  { %1732 = vmatprep.mubr.f32.mxu0 %v4182_v0  ;;  %1803 = vmatprep.mubr.f32.mxu1 %v4182_v0 }
 0x83a   :  { %3449 = vmatpush1.bf16.msra.mxu0 %v4287_v16  ;;  %3481 = vmatpush1.bf16.msra.mxu1 %v4300_v30 }
 0x83b   :  { %3451 = vmatprep.subr.bf16.mxu0 %v4294_v22  ;;  %3483 = vmatprep.subr.bf16.mxu1 %v4309_v39 }
 0x83e   :  { %3453 = vmatpush1.bf16.msra.mxu0 %v4303_v32  ;;  %3485 = vmatpush1.bf16.msra.mxu1 %v4312_v44 }
 0x83f   :  { %3455 = vmatprep.subr.bf16.mxu0 %v4307_v36  ;;  %3487 = vmatprep.subr.bf16.mxu1 %v4318_v48 }
 0x842   :  { %3457 = vmatpush1.bf16.msra.mxu0 %v4315_v46  ;;  %3489 = vmatpush1.bf16.msra.mxu1 %v4324_v57 }
 0x843   :  { %3459 = vmatprep.subr.bf16.mxu0 %v4321_v51  ;;  %3491 = vmatprep.subr.bf16.mxu1 %v4330_v60 }
 0x846   :  { %3461 = vmatpush1.bf16.msra.mxu0 %v4327_v58  ;;  %3493 = vmatpush1.bf16.msra.mxu1 %v4336_v7 }
 0x847   :  { %3463 = vmatprep.subr.bf16.mxu0 %v4333_v63  ;;  %3495 = vmatprep.subr.bf16.mxu1 %v4342_v12 }
 0x84a   :  { %3465 = vmatpush1.bf16.msra.mxu0 %v4339_v10  ;;  %3497 = vmatpush1.bf16.msra.mxu1 %v4348_v25 }
 0x84b   :  { %3467 = vmatprep.subr.bf16.mxu0 %v4345_v15  ;;  %3499 = vmatprep.subr.bf16.mxu1 %v4354_v29 }
 0x84e   :  { %3469 = vmatpush1.bf16.msra.mxu0 %v4351_v27  ;;  %3501 = vmatpush1.bf16.msra.mxu1 %v4360_v40 }
 0x84f   :  { %3471 = vmatprep.subr.bf16.mxu0 %v4357_v34  ;;  %3503 = vmatprep.subr.bf16.mxu1 %v4366_v42 }
 0x852   :  { %3473 = vmatpush1.bf16.msra.mxu0 %v4363_v41  ;;  %3505 = vmatpush1.bf16.msra.mxu1 %v4370_v47 }
 0x853   :  { %3507 = vmatprep.subr.bf16.mxu0 %v4279_v4  ;;  %3539 = vmatprep.subr.bf16.mxu1 %v4289_v17 }
 0x908   :  { %v1565_v24 = vpop.f32.mrb[16].mxu0  ;;  %v1636_v28 = vpop.f32.mrb[16].mxu1 }
 0x909   :  { %v1641_v31 = vadd.f32 %v1565_v24, %v1495_v21  ;;  %v1567_v33 = vpop.f32.mrb[17].mxu0  ;;  %v1638_v35 = vpop.f32.mrb[17].mxu1  ;;  %v1643_v55 = vadd.f32 %v1636_v28, %v1497_v50  ;;  %v1665_v21 = vld [vmem:[#allocation4 + $0x128] sm:$0xff] }
 0x90a   :  { %v1642_v52 = vadd.f32 %v1567_v33, %v1496_v23  ;;  %v1644_v59 = vadd.f32 %v1638_v35, %v1498_v56  ;;  %v1666_v35 = vld [vmem:[#allocation4 + $0x130] sm:$0xff] }
 0x90b   :  { %v1650_v53 = vmul.f32 0.5, %v1641_v31 }
 0x90c   :  { %v1645_v54 = vmul.f32 0.5, %v1642_v52  ;;  %v1657_v61 = vmul.f32 0.5, %v1644_v59 }
 0x90d   :  { %3978 = vtanh.f32 %v1650_v53 }
 0x90e   :  { %3980 = vtanh.f32 %v1645_v54 }
 0x90f   :  { %3982 = vtanh.f32 %v1643_v55  ;;  %v1667_v55 = vld [vmem:[#allocation4 + $0x138] sm:$0xff] }
 0x910   :  { %3984 = vtanh.f32 %v1657_v61 }
 0x917   :  { %v3979_v62 = vpop.eup %3978 }
 0x918   :  { %v3981_v1 = vpop.eup %3980  ;;  %v1652_v2 = vadd.f32 1.0, %v3979_v62 }
 0x919   :  { %v1647_v3 = vadd.f32 1.0, %v3981_v1  ;;  %v3983_v6 = vpop.eup %3982 }
 0x91a   :  { %v1653_v5 = vmul.f32 0.5, %v1652_v2  ;;  %v3985_v37 = vpop.eup %3984 }
 0x91b   :  { %v1648_v11 = vmul.f32 0.5, %v1647_v3  ;;  %v1659_v38 = vadd.f32 1.0, %v3985_v37 }
 0x91c   :  { %v1655_v13 = vmul.f32 %v3983_v6, %v1653_v5 }
 0x91d   :  { %v1649_v14 = vmul.f32 %v1648_v11, %v4677_v20  ;;  %v1660_v43 = vmul.f32 0.5, %v1659_v38  ;;  %v1664_v20 = vld [vmem:[#allocation4 + $0x120] sm:$0xff] }
 0x91f   :  { %v4715_v19 = vadd.f32 %v1655_v13, %v1649_v14 }
 0x921   :  { %3986 = vtanh.f32 %v4715_v19 }
 0x92b   :  { %v3987_v45 = vpop.eup %3986 }
 0x92c   :  { %v1662_v49 = vmul.f32 %v3987_v45, %v1660_v43 }
 0x92e   :  { %1733 = vmatmul.mubr.f32.vlgmr.msra.gmra.mrb[18].mxu0 %v1662_v49  ;;  %1804 = vmatmul.mubr.f32.vlgmr.msra.gmra.mrb[18].mxu1 %v1662_v49 }
 0x92f   :  { %3509 = vmatpush1.bf16.msra.mxu0 %v4281_v8  ;;  %3541 = vmatpush1.bf16.msra.mxu1 %v4291_v18 }
 0x930   :  { %3511 = vmatprep.subr.bf16.mxu0 %v4283_v9  ;;  %3543 = vmatprep.subr.bf16.mxu1 %v4297_v26 }
 0x931   :  { %1901 = vmatprep.mubr.f32.mxu0 %v4182_v0  ;;  %1972 = vmatprep.mubr.f32.mxu1 %v4182_v0 }
 0x933   :  { %3513 = vmatpush1.bf16.msra.mxu0 %v4287_v16  ;;  %3545 = vmatpush1.bf16.msra.mxu1 %v4300_v30 }
 0x934   :  { %3515 = vmatprep.subr.bf16.mxu0 %v4294_v22  ;;  %3547 = vmatprep.subr.bf16.mxu1 %v4309_v39 }
 0x937   :  { %3517 = vmatpush1.bf16.msra.mxu0 %v4303_v32  ;;  %3549 = vmatpush1.bf16.msra.mxu1 %v4312_v44 }
 0x938   :  { %3519 = vmatprep.subr.bf16.mxu0 %v4307_v36  ;;  %3551 = vmatprep.subr.bf16.mxu1 %v4318_v48 }
 0x93b   :  { %3521 = vmatpush1.bf16.msra.mxu0 %v4315_v46  ;;  %3553 = vmatpush1.bf16.msra.mxu1 %v4324_v57 }
 0x93c   :  { %3523 = vmatprep.subr.bf16.mxu0 %v4321_v51  ;;  %3555 = vmatprep.subr.bf16.mxu1 %v4330_v60 }
 0x93f   :  { %3525 = vmatpush1.bf16.msra.mxu0 %v4327_v58  ;;  %3557 = vmatpush1.bf16.msra.mxu1 %v4336_v7 }
 0x940   :  { %3527 = vmatprep.subr.bf16.mxu0 %v4333_v63  ;;  %3559 = vmatprep.subr.bf16.mxu1 %v4342_v12 }
 0x943   :  { %3529 = vmatpush1.bf16.msra.mxu0 %v4339_v10  ;;  %3561 = vmatpush1.bf16.msra.mxu1 %v4348_v25 }
 0x944   :  { %3531 = vmatprep.subr.bf16.mxu0 %v4345_v15  ;;  %3563 = vmatprep.subr.bf16.mxu1 %v4354_v29 }
 0x947   :  { %3533 = vmatpush1.bf16.msra.mxu0 %v4351_v27  ;;  %3565 = vmatpush1.bf16.msra.mxu1 %v4360_v40 }
 0x948   :  { %3535 = vmatprep.subr.bf16.mxu0 %v4357_v34  ;;  %3567 = vmatprep.subr.bf16.mxu1 %v4366_v42 }
 0x94b   :  { %3537 = vmatpush1.bf16.msra.mxu0 %v4363_v41  ;;  %3569 = vmatpush1.bf16.msra.mxu1 %v4370_v47 }
 0x94c   :  { %3571 = vmatprep.subr.bf16.mxu0 %v4279_v4  ;;  %3603 = vmatprep.subr.bf16.mxu1 %v4289_v17 }
 0xa01   :  { %v1734_v23 = vpop.f32.mrb[18].mxu0  ;;  %v1805_v24 = vpop.f32.mrb[18].mxu1 }
 0xa02   :  { %v1810_v28 = vadd.f32 %v1734_v23, %v1664_v20  ;;  %v1736_v31 = vpop.f32.mrb[19].mxu0  ;;  %v1807_v33 = vpop.f32.mrb[19].mxu1  ;;  %v1812_v54 = vadd.f32 %v1805_v24, %v1666_v35  ;;  %v1834_v20 = vld [vmem:[#allocation4 + $0x148] sm:$0xff] }
 0xa03   :  { %v1811_v50 = vadd.f32 %v1736_v31, %v1665_v21  ;;  %v1813_v56 = vadd.f32 %v1807_v33, %v1667_v55  ;;  %v1835_v33 = vld [vmem:[#allocation4 + $0x150] sm:$0xff] }
 0xa04   :  { %v1819_v52 = vmul.f32 0.5, %v1810_v28 }
 0xa05   :  { %v1814_v53 = vmul.f32 0.5, %v1811_v50  ;;  %v1826_v59 = vmul.f32 0.5, %v1813_v56 }
 0xa06   :  { %3988 = vtanh.f32 %v1819_v52 }
 0xa07   :  { %3990 = vtanh.f32 %v1814_v53 }
 0xa08   :  { %3992 = vtanh.f32 %v1812_v54  ;;  %v1836_v54 = vld [vmem:[#allocation4 + $0x158] sm:$0xff] }
 0xa09   :  { %3994 = vtanh.f32 %v1826_v59 }
 0xa10   :  { %v3989_v61 = vpop.eup %3988 }
 0xa11   :  { %v3991_v62 = vpop.eup %3990  ;;  %v1821_v1 = vadd.f32 1.0, %v3989_v61 }
 0xa12   :  { %v1816_v2 = vadd.f32 1.0, %v3991_v62  ;;  %v3993_v5 = vpop.eup %3992 }
 0xa13   :  { %v1822_v3 = vmul.f32 0.5, %v1821_v1  ;;  %v3995_v37 = vpop.eup %3994 }
 0xa14   :  { %v1817_v6 = vmul.f32 0.5, %v1816_v2  ;;  %v1828_v38 = vadd.f32 1.0, %v3995_v37 }
 0xa15   :  { %v1824_v11 = vmul.f32 %v3993_v5, %v1822_v3 }
 0xa16   :  { %v1818_v13 = vmul.f32 %v1817_v6, %v4715_v19  ;;  %v1829_v43 = vmul.f32 0.5, %v1828_v38  ;;  %v1833_v19 = vld [vmem:[#allocation4 + $0x140] sm:$0xff] }
 0xa18   :  { %v4753_v14 = vadd.f32 %v1824_v11, %v1818_v13 }
 0xa1a   :  { %3996 = vtanh.f32 %v4753_v14 }
 0xa24   :  { %v3997_v45 = vpop.eup %3996 }
 0xa25   :  { %v1831_v49 = vmul.f32 %v3997_v45, %v1829_v43 }
 0xa27   :  { %1902 = vmatmul.mubr.f32.vlgmr.msra.gmra.mrb[20].mxu0 %v1831_v49  ;;  %1973 = vmatmul.mubr.f32.vlgmr.msra.gmra.mrb[20].mxu1 %v1831_v49 }
 0xa28   :  { %3573 = vmatpush1.bf16.msra.mxu0 %v4281_v8  ;;  %3605 = vmatpush1.bf16.msra.mxu1 %v4291_v18 }
 0xa29   :  { %3575 = vmatprep.subr.bf16.mxu0 %v4283_v9  ;;  %3607 = vmatprep.subr.bf16.mxu1 %v4297_v26 }
 0xa2a   :  { %2070 = vmatprep.mubr.f32.mxu0 %v4182_v0  ;;  %2141 = vmatprep.mubr.f32.mxu1 %v4182_v0 }
 0xa2c   :  { %3577 = vmatpush1.bf16.msra.mxu0 %v4287_v16  ;;  %3609 = vmatpush1.bf16.msra.mxu1 %v4300_v30 }
 0xa2d   :  { %3579 = vmatprep.subr.bf16.mxu0 %v4294_v22  ;;  %3611 = vmatprep.subr.bf16.mxu1 %v4309_v39 }
 0xa30   :  { %3581 = vmatpush1.bf16.msra.mxu0 %v4303_v32  ;;  %3613 = vmatpush1.bf16.msra.mxu1 %v4312_v44 }
 0xa31   :  { %3583 = vmatprep.subr.bf16.mxu0 %v4307_v36  ;;  %3615 = vmatprep.subr.bf16.mxu1 %v4318_v48 }
 0xa34   :  { %3585 = vmatpush1.bf16.msra.mxu0 %v4315_v46  ;;  %3617 = vmatpush1.bf16.msra.mxu1 %v4324_v57 }
 0xa35   :  { %3587 = vmatprep.subr.bf16.mxu0 %v4321_v51  ;;  %3619 = vmatprep.subr.bf16.mxu1 %v4330_v60 }
 0xa38   :  { %3589 = vmatpush1.bf16.msra.mxu0 %v4327_v58  ;;  %3621 = vmatpush1.bf16.msra.mxu1 %v4336_v7 }
 0xa39   :  { %3591 = vmatprep.subr.bf16.mxu0 %v4333_v63  ;;  %3623 = vmatprep.subr.bf16.mxu1 %v4342_v12 }
 0xa3c   :  { %3593 = vmatpush1.bf16.msra.mxu0 %v4339_v10  ;;  %3625 = vmatpush1.bf16.msra.mxu1 %v4348_v25 }
 0xa3d   :  { %3595 = vmatprep.subr.bf16.mxu0 %v4345_v15  ;;  %3627 = vmatprep.subr.bf16.mxu1 %v4354_v29 }
 0xa40   :  { %3597 = vmatpush1.bf16.msra.mxu0 %v4351_v27  ;;  %3629 = vmatpush1.bf16.msra.mxu1 %v4360_v40 }
 0xa41   :  { %3599 = vmatprep.subr.bf16.mxu0 %v4357_v34  ;;  %3631 = vmatprep.subr.bf16.mxu1 %v4366_v42 }
 0xa44   :  { %3601 = vmatpush1.bf16.msra.mxu0 %v4363_v41  ;;  %3633 = vmatpush1.bf16.msra.mxu1 %v4370_v47 }
 0xa45   :  { %3635 = vmatprep.subr.bf16.mxu0 %v4279_v4  ;;  %3667 = vmatprep.subr.bf16.mxu1 %v4289_v17 }
 0xafa   :  { %v1903_v21 = vpop.f32.mrb[20].mxu0  ;;  %v1974_v23 = vpop.f32.mrb[20].mxu1 }
 0xafb   :  { %v1979_v24 = vadd.f32 %v1903_v21, %v1833_v19  ;;  %v1905_v28 = vpop.f32.mrb[21].mxu0  ;;  %v1976_v31 = vpop.f32.mrb[21].mxu1  ;;  %v1981_v53 = vadd.f32 %v1974_v23, %v1835_v33  ;;  %v2003_v19 = vld [vmem:[#allocation4 + $0x168] sm:$0xff] }
 0xafc   :  { %v1980_v35 = vadd.f32 %v1905_v28, %v1834_v20  ;;  %v1982_v55 = vadd.f32 %v1976_v31, %v1836_v54  ;;  %v2004_v31 = vld [vmem:[#allocation4 + $0x170] sm:$0xff] }
 0xafd   :  { %v1988_v50 = vmul.f32 0.5, %v1979_v24 }
 0xafe   :  { %v1983_v52 = vmul.f32 0.5, %v1980_v35  ;;  %v1995_v56 = vmul.f32 0.5, %v1982_v55 }
 0xaff   :  { %3998 = vtanh.f32 %v1988_v50 }
 0xb00   :  { %4000 = vtanh.f32 %v1983_v52 }
 0xb01   :  { %4002 = vtanh.f32 %v1981_v53  ;;  %v2005_v53 = vld [vmem:[#allocation4 + $0x178] sm:$0xff] }
 0xb02   :  { %4004 = vtanh.f32 %v1995_v56 }
 0xb09   :  { %v3999_v59 = vpop.eup %3998 }
 0xb0a   :  { %v4001_v61 = vpop.eup %4000  ;;  %v1990_v62 = vadd.f32 1.0, %v3999_v59 }
 0xb0b   :  { %v1985_v1 = vadd.f32 1.0, %v4001_v61  ;;  %v4003_v3 = vpop.eup %4002 }
 0xb0c   :  { %v1991_v2 = vmul.f32 0.5, %v1990_v62  ;;  %v4005_v37 = vpop.eup %4004 }
 0xb0d   :  { %v1986_v5 = vmul.f32 0.5, %v1985_v1  ;;  %v1997_v38 = vadd.f32 1.0, %v4005_v37 }
 0xb0e   :  { %v1993_v6 = vmul.f32 %v4003_v3, %v1991_v2 }
 0xb0f   :  { %v1987_v11 = vmul.f32 %v1986_v5, %v4753_v14  ;;  %v1998_v43 = vmul.f32 0.5, %v1997_v38  ;;  %v2002_v14 = vld [vmem:[#allocation4 + $0x160] sm:$0xff] }
 0xb11   :  { %v4791_v13 = vadd.f32 %v1993_v6, %v1987_v11 }
 0xb13   :  { %4006 = vtanh.f32 %v4791_v13 }
 0xb1d   :  { %v4007_v45 = vpop.eup %4006 }
 0xb1e   :  { %v2000_v49 = vmul.f32 %v4007_v45, %v1998_v43 }
 0xb20   :  { %2071 = vmatmul.mubr.f32.vlgmr.msra.gmra.mrb[22].mxu0 %v2000_v49  ;;  %2142 = vmatmul.mubr.f32.vlgmr.msra.gmra.mrb[22].mxu1 %v2000_v49 }
 0xb21   :  { %3637 = vmatpush1.bf16.msra.mxu0 %v4281_v8  ;;  %3669 = vmatpush1.bf16.msra.mxu1 %v4291_v18 }
 0xb22   :  { %3639 = vmatprep.subr.bf16.mxu0 %v4283_v9  ;;  %3671 = vmatprep.subr.bf16.mxu1 %v4297_v26 }
 0xb23   :  { %2239 = vmatprep.mubr.f32.mxu0 %v4182_v0  ;;  %2310 = vmatprep.mubr.f32.mxu1 %v4182_v0 }
 0xb25   :  { %3641 = vmatpush1.bf16.msra.mxu0 %v4287_v16  ;;  %3673 = vmatpush1.bf16.msra.mxu1 %v4300_v30 }
 0xb26   :  { %3643 = vmatprep.subr.bf16.mxu0 %v4294_v22  ;;  %3675 = vmatprep.subr.bf16.mxu1 %v4309_v39 }
 0xb29   :  { %3645 = vmatpush1.bf16.msra.mxu0 %v4303_v32  ;;  %3677 = vmatpush1.bf16.msra.mxu1 %v4312_v44 }
 0xb2a   :  { %3647 = vmatprep.subr.bf16.mxu0 %v4307_v36  ;;  %3679 = vmatprep.subr.bf16.mxu1 %v4318_v48 }
 0xb2d   :  { %3649 = vmatpush1.bf16.msra.mxu0 %v4315_v46  ;;  %3681 = vmatpush1.bf16.msra.mxu1 %v4324_v57 }
 0xb2e   :  { %3651 = vmatprep.subr.bf16.mxu0 %v4321_v51  ;;  %3683 = vmatprep.subr.bf16.mxu1 %v4330_v60 }
 0xb31   :  { %3653 = vmatpush1.bf16.msra.mxu0 %v4327_v58  ;;  %3685 = vmatpush1.bf16.msra.mxu1 %v4336_v7 }
 0xb32   :  { %3655 = vmatprep.subr.bf16.mxu0 %v4333_v63  ;;  %3687 = vmatprep.subr.bf16.mxu1 %v4342_v12 }
 0xb35   :  { %3657 = vmatpush1.bf16.msra.mxu0 %v4339_v10  ;;  %3689 = vmatpush1.bf16.msra.mxu1 %v4348_v25 }
 0xb36   :  { %3659 = vmatprep.subr.bf16.mxu0 %v4345_v15  ;;  %3691 = vmatprep.subr.bf16.mxu1 %v4354_v29 }
 0xb39   :  { %3661 = vmatpush1.bf16.msra.mxu0 %v4351_v27  ;;  %3693 = vmatpush1.bf16.msra.mxu1 %v4360_v40 }
 0xb3a   :  { %3663 = vmatprep.subr.bf16.mxu0 %v4357_v34  ;;  %3695 = vmatprep.subr.bf16.mxu1 %v4366_v42 }
 0xb3d   :  { %3665 = vmatpush1.bf16.msra.mxu0 %v4363_v41  ;;  %3697 = vmatpush1.bf16.msra.mxu1 %v4370_v47 }
 0xb3e   :  { %3699 = vmatprep.subr.bf16.mxu0 %v4279_v4  ;;  %3731 = vmatprep.subr.bf16.mxu1 %v4289_v17 }
 0xbf3   :  { %v2072_v20 = vpop.f32.mrb[22].mxu0  ;;  %v2143_v21 = vpop.f32.mrb[22].mxu1 }
 0xbf4   :  { %v2148_v23 = vadd.f32 %v2072_v20, %v2002_v14  ;;  %v2074_v24 = vpop.f32.mrb[23].mxu0  ;;  %v2145_v28 = vpop.f32.mrb[23].mxu1  ;;  %v2150_v52 = vadd.f32 %v2143_v21, %v2004_v31  ;;  %v2172_v14 = vld [vmem:[#allocation4 + $0x188] sm:$0xff] }
 0xbf5   :  { %v2149_v33 = vadd.f32 %v2074_v24, %v2003_v19  ;;  %v2151_v54 = vadd.f32 %v2145_v28, %v2005_v53  ;;  %v2173_v28 = vld [vmem:[#allocation4 + $0x190] sm:$0xff] }
 0xbf6   :  { %v2157_v35 = vmul.f32 0.5, %v2148_v23 }
 0xbf7   :  { %v2152_v50 = vmul.f32 0.5, %v2149_v33  ;;  %v2164_v55 = vmul.f32 0.5, %v2151_v54 }
 0xbf8   :  { %4008 = vtanh.f32 %v2157_v35 }
 0xbf9   :  { %4010 = vtanh.f32 %v2152_v50 }
 0xbfa   :  { %4012 = vtanh.f32 %v2150_v52  ;;  %v2174_v52 = vld [vmem:[#allocation4 + $0x198] sm:$0xff] }
 0xbfb   :  { %4014 = vtanh.f32 %v2164_v55 }
 0xc02   :  { %v4009_v56 = vpop.eup %4008 }
 0xc03   :  { %v4011_v59 = vpop.eup %4010  ;;  %v2159_v61 = vadd.f32 1.0, %v4009_v56 }
 0xc04   :  { %v2154_v62 = vadd.f32 1.0, %v4011_v59  ;;  %v4013_v2 = vpop.eup %4012 }
 0xc05   :  { %v2160_v1 = vmul.f32 0.5, %v2159_v61  ;;  %v4015_v37 = vpop.eup %4014 }
 0xc06   :  { %v2155_v3 = vmul.f32 0.5, %v2154_v62  ;;  %v2166_v38 = vadd.f32 1.0, %v4015_v37 }
 0xc07   :  { %v2162_v5 = vmul.f32 %v4013_v2, %v2160_v1 }
 0xc08   :  { %v2156_v6 = vmul.f32 %v2155_v3, %v4791_v13  ;;  %v2167_v43 = vmul.f32 0.5, %v2166_v38  ;;  %v2171_v13 = vld [vmem:[#allocation4 + $0x180] sm:$0xff] }
 0xc0a   :  { %v4829_v11 = vadd.f32 %v2162_v5, %v2156_v6 }
 0xc0c   :  { %4016 = vtanh.f32 %v4829_v11 }
 0xc16   :  { %v4017_v45 = vpop.eup %4016 }
 0xc17   :  { %v2169_v49 = vmul.f32 %v4017_v45, %v2167_v43 }
 0xc19   :  { %2240 = vmatmul.mubr.f32.vlgmr.msra.gmra.mrb[24].mxu0 %v2169_v49  ;;  %2311 = vmatmul.mubr.f32.vlgmr.msra.gmra.mrb[24].mxu1 %v2169_v49 }
 0xc1a   :  { %3701 = vmatpush1.bf16.msra.mxu0 %v4281_v8  ;;  %3733 = vmatpush1.bf16.msra.mxu1 %v4291_v18 }
 0xc1b   :  { %3703 = vmatprep.subr.bf16.mxu0 %v4283_v9  ;;  %3735 = vmatprep.subr.bf16.mxu1 %v4297_v26 }
 0xc1c   :  { %2408 = vmatprep.mubr.f32.mxu0 %v4182_v0  ;;  %2479 = vmatprep.mubr.f32.mxu1 %v4182_v0 }
 0xc1e   :  { %3705 = vmatpush1.bf16.msra.mxu0 %v4287_v16  ;;  %3737 = vmatpush1.bf16.msra.mxu1 %v4300_v30 }
 0xc1f   :  { %3707 = vmatprep.subr.bf16.mxu0 %v4294_v22  ;;  %3739 = vmatprep.subr.bf16.mxu1 %v4309_v39 }
 0xc22   :  { %3709 = vmatpush1.bf16.msra.mxu0 %v4303_v32  ;;  %3741 = vmatpush1.bf16.msra.mxu1 %v4312_v44 }
 0xc23   :  { %3711 = vmatprep.subr.bf16.mxu0 %v4307_v36  ;;  %3743 = vmatprep.subr.bf16.mxu1 %v4318_v48 }
 0xc26   :  { %3713 = vmatpush1.bf16.msra.mxu0 %v4315_v46  ;;  %3745 = vmatpush1.bf16.msra.mxu1 %v4324_v57 }
 0xc27   :  { %3715 = vmatprep.subr.bf16.mxu0 %v4321_v51  ;;  %3747 = vmatprep.subr.bf16.mxu1 %v4330_v60 }
 0xc2a   :  { %3717 = vmatpush1.bf16.msra.mxu0 %v4327_v58  ;;  %3749 = vmatpush1.bf16.msra.mxu1 %v4336_v7 }
 0xc2b   :  { %3719 = vmatprep.subr.bf16.mxu0 %v4333_v63  ;;  %3751 = vmatprep.subr.bf16.mxu1 %v4342_v12 }
 0xc2e   :  { %3721 = vmatpush1.bf16.msra.mxu0 %v4339_v10  ;;  %3753 = vmatpush1.bf16.msra.mxu1 %v4348_v25 }
 0xc2f   :  { %3723 = vmatprep.subr.bf16.mxu0 %v4345_v15  ;;  %3755 = vmatprep.subr.bf16.mxu1 %v4354_v29 }
 0xc32   :  { %3725 = vmatpush1.bf16.msra.mxu0 %v4351_v27  ;;  %3757 = vmatpush1.bf16.msra.mxu1 %v4360_v40 }
 0xc33   :  { %3727 = vmatprep.subr.bf16.mxu0 %v4357_v34  ;;  %3759 = vmatprep.subr.bf16.mxu1 %v4366_v42 }
 0xc36   :  { %3729 = vmatpush1.bf16.msra.mxu0 %v4363_v41  ;;  %3761 = vmatpush1.bf16.msra.mxu1 %v4370_v47 }
 0xc37   :  { %3763 = vmatprep.subr.bf16.mxu0 %v4279_v4  ;;  %3795 = vmatprep.subr.bf16.mxu1 %v4289_v17 }
 0xcec   :  { %v2241_v19 = vpop.f32.mrb[24].mxu0  ;;  %v2312_v20 = vpop.f32.mrb[24].mxu1 }
 0xced   :  { %v2317_v21 = vadd.f32 %v2241_v19, %v2171_v13  ;;  %v2243_v23 = vpop.f32.mrb[25].mxu0  ;;  %v2314_v24 = vpop.f32.mrb[25].mxu1  ;;  %v2319_v50 = vadd.f32 %v2312_v20, %v2173_v28  ;;  %v2341_v13 = vld [vmem:[#allocation4 + $0x1a8] sm:$0xff] }
 0xcee   :  { %v2318_v31 = vadd.f32 %v2243_v23, %v2172_v14  ;;  %v2320_v53 = vadd.f32 %v2314_v24, %v2174_v52  ;;  %v2342_v24 = vld [vmem:[#allocation4 + $0x1b0] sm:$0xff] }
 0xcef   :  { %v2326_v33 = vmul.f32 0.5, %v2317_v21 }
 0xcf0   :  { %v2321_v35 = vmul.f32 0.5, %v2318_v31  ;;  %v2333_v54 = vmul.f32 0.5, %v2320_v53 }
 0xcf1   :  { %4018 = vtanh.f32 %v2326_v33 }
 0xcf2   :  { %4020 = vtanh.f32 %v2321_v35 }
 0xcf3   :  { %4022 = vtanh.f32 %v2319_v50  ;;  %v2343_v50 = vld [vmem:[#allocation4 + $0x1b8] sm:$0xff] }
 0xcf4   :  { %4024 = vtanh.f32 %v2333_v54 }
 0xcfb   :  { %v4019_v55 = vpop.eup %4018 }
 0xcfc   :  { %v4021_v56 = vpop.eup %4020  ;;  %v2328_v59 = vadd.f32 1.0, %v4019_v55 }
 0xcfd   :  { %v2323_v61 = vadd.f32 1.0, %v4021_v56  ;;  %v4023_v1 = vpop.eup %4022 }
 0xcfe   :  { %v2329_v62 = vmul.f32 0.5, %v2328_v59  ;;  %v4025_v37 = vpop.eup %4024 }
 0xcff   :  { %v2324_v2 = vmul.f32 0.5, %v2323_v61  ;;  %v2335_v38 = vadd.f32 1.0, %v4025_v37 }
 0xd00   :  { %v2331_v3 = vmul.f32 %v4023_v1, %v2329_v62 }
 0xd01   :  { %v2325_v5 = vmul.f32 %v2324_v2, %v4829_v11  ;;  %v2336_v43 = vmul.f32 0.5, %v2335_v38  ;;  %v2340_v11 = vld [vmem:[#allocation4 + $0x1a0] sm:$0xff] }
 0xd03   :  { %v4867_v6 = vadd.f32 %v2331_v3, %v2325_v5 }
 0xd05   :  { %4026 = vtanh.f32 %v4867_v6 }
 0xd0f   :  { %v4027_v45 = vpop.eup %4026 }
 0xd10   :  { %v2338_v49 = vmul.f32 %v4027_v45, %v2336_v43 }
 0xd12   :  { %2409 = vmatmul.mubr.f32.vlgmr.msra.gmra.mrb[26].mxu0 %v2338_v49  ;;  %2480 = vmatmul.mubr.f32.vlgmr.msra.gmra.mrb[26].mxu1 %v2338_v49 }
 0xd13   :  { %3765 = vmatpush1.bf16.msra.mxu0 %v4281_v8  ;;  %3797 = vmatpush1.bf16.msra.mxu1 %v4291_v18 }
 0xd14   :  { %3767 = vmatprep.subr.bf16.mxu0 %v4283_v9  ;;  %3799 = vmatprep.subr.bf16.mxu1 %v4297_v26 }
 0xd15   :  { %2577 = vmatprep.mubr.f32.mxu0 %v4182_v0  ;;  %2648 = vmatprep.mubr.f32.mxu1 %v4182_v0 }
 0xd17   :  { %3769 = vmatpush1.bf16.msra.mxu0 %v4287_v16  ;;  %3801 = vmatpush1.bf16.msra.mxu1 %v4300_v30 }
 0xd18   :  { %3771 = vmatprep.subr.bf16.mxu0 %v4294_v22  ;;  %3803 = vmatprep.subr.bf16.mxu1 %v4309_v39 }
 0xd1b   :  { %3773 = vmatpush1.bf16.msra.mxu0 %v4303_v32  ;;  %3805 = vmatpush1.bf16.msra.mxu1 %v4312_v44 }
 0xd1c   :  { %3775 = vmatprep.subr.bf16.mxu0 %v4307_v36  ;;  %3807 = vmatprep.subr.bf16.mxu1 %v4318_v48 }
 0xd1f   :  { %3777 = vmatpush1.bf16.msra.mxu0 %v4315_v46  ;;  %3809 = vmatpush1.bf16.msra.mxu1 %v4324_v57 }
 0xd20   :  { %3779 = vmatprep.subr.bf16.mxu0 %v4321_v51  ;;  %3811 = vmatprep.subr.bf16.mxu1 %v4330_v60 }
 0xd23   :  { %3781 = vmatpush1.bf16.msra.mxu0 %v4327_v58  ;;  %3813 = vmatpush1.bf16.msra.mxu1 %v4336_v7 }
 0xd24   :  { %3783 = vmatprep.subr.bf16.mxu0 %v4333_v63  ;;  %3815 = vmatprep.subr.bf16.mxu1 %v4342_v12 }
 0xd27   :  { %3785 = vmatpush1.bf16.msra.mxu0 %v4339_v10  ;;  %3817 = vmatpush1.bf16.msra.mxu1 %v4348_v25 }
 0xd28   :  { %3787 = vmatprep.subr.bf16.mxu0 %v4345_v15  ;;  %3819 = vmatprep.subr.bf16.mxu1 %v4354_v29 }
 0xd2b   :  { %3789 = vmatpush1.bf16.msra.mxu0 %v4351_v27  ;;  %3821 = vmatpush1.bf16.msra.mxu1 %v4360_v40 }
 0xd2c   :  { %3791 = vmatprep.subr.bf16.mxu0 %v4357_v34  ;;  %3823 = vmatprep.subr.bf16.mxu1 %v4366_v42 }
 0xd2f   :  { %3793 = vmatpush1.bf16.msra.mxu0 %v4363_v41  ;;  %3825 = vmatpush1.bf16.msra.mxu1 %v4370_v47 }
 0xd30   :  { %3827 = vmatprep.subr.bf16.mxu0 %v4279_v4  ;;  %3859 = vmatprep.subr.bf16.mxu1 %v4289_v17 }
 0xde5   :  { %v2410_v14 = vpop.f32.mrb[26].mxu0  ;;  %v2481_v19 = vpop.f32.mrb[26].mxu1 }
 0xde6   :  { %v2486_v20 = vadd.f32 %v2410_v14, %v2340_v11  ;;  %v2412_v21 = vpop.f32.mrb[27].mxu0  ;;  %v2483_v23 = vpop.f32.mrb[27].mxu1  ;;  %v2488_v35 = vadd.f32 %v2481_v19, %v2342_v24  ;;  %v2680_v19 = vld [vmem:[#allocation4 + $0x1f0] sm:$0xff] }
 0xde7   :  { %v2487_v28 = vadd.f32 %v2412_v21, %v2341_v13  ;;  %v2489_v52 = vadd.f32 %v2483_v23, %v2343_v50 }
 0xde8   :  { %v2495_v31 = vmul.f32 0.5, %v2486_v20 }
 0xde9   :  { %v2490_v33 = vmul.f32 0.5, %v2487_v28  ;;  %v2502_v4 = vmul.f32 0.5, %v2489_v52  ;;  %v2681_v28 = vld [vmem:[#allocation4 + $0x1f8] sm:$0xff] }
 0xdea   :  { %4028 = vtanh.f32 %v2495_v31 }
 0xdeb   :  { %4030 = vtanh.f32 %v2490_v33 }
 0xdec   :  { %4032 = vtanh.f32 %v2488_v35 }
 0xded   :  { %4034 = vtanh.f32 %v2502_v4 }
 0xdf4   :  { %v4029_v53 = vpop.eup %4028 }
 0xdf5   :  { %v4031_v17 = vpop.eup %4030  ;;  %v2497_v54 = vadd.f32 1.0, %v4029_v53 }
 0xdf6   :  { %v2492_v55 = vadd.f32 1.0, %v4031_v17  ;;  %v4033_v59 = vpop.eup %4032 }
 0xdf7   :  { %v2498_v56 = vmul.f32 0.5, %v2497_v54  ;;  %v4035_v3 = vpop.eup %4034 }
 0xdf8   :  { %v2493_v61 = vmul.f32 0.5, %v2492_v55  ;;  %v2504_v5 = vadd.f32 1.0, %v4035_v3 }
 0xdf9   :  { %v2500_v62 = vmul.f32 %v4033_v59, %v2498_v56 }
 0xdfa   :  { %v2494_v1 = vmul.f32 %v2493_v61, %v4867_v6  ;;  %v2505_v37 = vmul.f32 0.5, %v2504_v5  ;;  %v2679_v6 = vld [vmem:[#allocation4 + $0x1e8] sm:$0xff] }
 0xdfc   :  { %v4905_v2 = vadd.f32 %v2500_v62, %v2494_v1 }
 0xdfe   :  { %4036 = vtanh.f32 %v4905_v2 }
 0xe08   :  { %v4037_v38 = vpop.eup %4036 }
 0xe09   :  { %v2507_v43 = vmul.f32 %v4037_v38, %v2505_v37 }
 0xe0b   :  { %2578 = vmatmul.mubr.f32.vlgmr.msra.gmra.mrb[28].mxu0 %v2507_v43  ;;  %2649 = vmatmul.mubr.f32.vlgmr.msra.gmra.mrb[28].mxu1 %v2507_v43 }
 0xe0c   :  { %3829 = vmatpush1.bf16.msra.mxu0 %v4281_v8  ;;  %3861 = vmatpush1.bf16.msra.mxu1 %v4291_v18  ;;  %v2510_v8 = vld [vmem:[#allocation4 + $0x1c8] sm:$0xff] }
 0xe0d   :  { %3831 = vmatprep.subr.bf16.mxu0 %v4283_v9  ;;  %3863 = vmatprep.subr.bf16.mxu1 %v4297_v26 }
 0xe0e   :  { %2746 = vmatprep.mubr.f32.mxu0 %v4182_v0  ;;  %2817 = vmatprep.mubr.f32.mxu1 %v4182_v0  ;;  %v2509_v0 = vld [vmem:[#allocation4 + $0x1c0] sm:$0xff] }
 0xe10   :  { %3833 = vmatpush1.bf16.msra.mxu0 %v4287_v16  ;;  %3865 = vmatpush1.bf16.msra.mxu1 %v4300_v30  ;;  %v2511_v30 = vld [vmem:[#allocation4 + $0x1d0] sm:$0xff] }
 0xe11   :  { %3835 = vmatprep.subr.bf16.mxu0 %v4294_v22  ;;  %3867 = vmatprep.subr.bf16.mxu1 %v4309_v39 }
 0xe14   :  { %3837 = vmatpush1.bf16.msra.mxu0 %v4303_v32  ;;  %3869 = vmatpush1.bf16.msra.mxu1 %v4312_v44 }
 0xe15   :  { %3839 = vmatprep.subr.bf16.mxu0 %v4307_v36  ;;  %3871 = vmatprep.subr.bf16.mxu1 %v4318_v48 }
 0xe18   :  { %3841 = vmatpush1.bf16.msra.mxu0 %v4315_v46  ;;  %3873 = vmatpush1.bf16.msra.mxu1 %v4324_v57  ;;  %v2512_v46 = vld [vmem:[#allocation4 + $0x1d8] sm:$0xff] }
 0xe19   :  { %3843 = vmatprep.subr.bf16.mxu0 %v4321_v51  ;;  %3875 = vmatprep.subr.bf16.mxu1 %v4330_v60 }
 0xe1c   :  { %3845 = vmatpush1.bf16.msra.mxu0 %v4327_v58  ;;  %3877 = vmatpush1.bf16.msra.mxu1 %v4336_v7 }
 0xe1d   :  { %3847 = vmatprep.subr.bf16.mxu0 %v4333_v63  ;;  %3879 = vmatprep.subr.bf16.mxu1 %v4342_v12 }
 0xe20   :  { %3849 = vmatpush1.bf16.msra.mxu0 %v4339_v10  ;;  %3881 = vmatpush1.bf16.msra.mxu1 %v4348_v25 }
 0xe21   :  { %3851 = vmatprep.subr.bf16.mxu0 %v4345_v15  ;;  %3883 = vmatprep.subr.bf16.mxu1 %v4354_v29 }
 0xe24   :  { %3853 = vmatpush1.bf16.msra.mxu0 %v4351_v27  ;;  %3885 = vmatpush1.bf16.msra.mxu1 %v4360_v40 }
 0xe25   :  { %3855 = vmatprep.subr.bf16.mxu0 %v4357_v34  ;;  %3887 = vmatprep.subr.bf16.mxu1 %v4366_v42 }
 0xe28   :  { %3857 = vmatpush1.bf16.msra.mxu0 %v4363_v41  ;;  %3889 = vmatpush1.bf16.msra.mxu1 %v4370_v47  ;;  %v2678_v47 = vld [vmem:[#allocation4 + $0x1e0] sm:$0xff] }
 0xede   :  { %v2579_v9 = vpop.f32.mrb[28].mxu0  ;;  %v2650_v16 = vpop.f32.mrb[28].mxu1 }
 0xedf   :  { %v2655_v18 = vadd.f32 %v2579_v9, %v2509_v0  ;;  %v2581_v22 = vpop.f32.mrb[29].mxu0  ;;  %v2652_v26 = vpop.f32.mrb[29].mxu1  ;;  %v2657_v44 = vadd.f32 %v2650_v16, %v2511_v30 }
 0xee0   :  { %v2656_v32 = vadd.f32 %v2581_v22, %v2510_v8  ;;  %v2658_v48 = vadd.f32 %v2652_v26, %v2512_v46 }
 0xee1   :  { %v2664_v36 = vmul.f32 0.5, %v2655_v18 }
 0xee2   :  { %v2659_v39 = vmul.f32 0.5, %v2656_v32  ;;  %v2671_v51 = vmul.f32 0.5, %v2658_v48 }
 0xee3   :  { %4038 = vtanh.f32 %v2664_v36 }
 0xee4   :  { %4040 = vtanh.f32 %v2659_v39 }
 0xee5   :  { %4042 = vtanh.f32 %v2657_v44 }
 0xee6   :  { %4044 = vtanh.f32 %v2671_v51 }
 0xeed   :  { %v4039_v57 = vpop.eup %4038 }
 0xeee   :  { %v4041_v58 = vpop.eup %4040  ;;  %v2666_v60 = vadd.f32 1.0, %v4039_v57 }
 0xeef   :  { %v2661_v63 = vadd.f32 1.0, %v4041_v58  ;;  %v4043_v10 = vpop.eup %4042 }
 0xef0   :  { %v2667_v7 = vmul.f32 0.5, %v2666_v60  ;;  %v4045_v29 = vpop.eup %4044 }
 0xef1   :  { %v2662_v12 = vmul.f32 0.5, %v2661_v63  ;;  %v2673_v34 = vadd.f32 1.0, %v4045_v29 }
 0xef2   :  { %v2669_v15 = vmul.f32 %v4043_v10, %v2667_v7 }
 0xef3   :  { %v2663_v25 = vmul.f32 %v2662_v12, %v4905_v2  ;;  %v2674_v40 = vmul.f32 0.5, %v2673_v34 }
 0xef5   :  { %v2670_v27 = vadd.f32 %v2669_v15, %v2663_v25 }
 0xef7   :  { %4046 = vtanh.f32 %v2670_v27 }
 0xf01   :  { %v4047_v41 = vpop.eup %4046 }
 0xf02   :  { %v2676_v42 = vmul.f32 %v4047_v41, %v2674_v40 }
 0xf04   :  { %2747 = vmatmul.mubr.f32.vlgmr.msra.gmra.mrb[30].mxu0 %v2676_v42  ;;  %2818 = vmatmul.mubr.f32.vlgmr.msra.gmra.mrb[30].mxu1 %v2676_v42 }
 0xfd7   :  { %v2748_v45 = vpop.f32.mrb[30].mxu0  ;;  %v2819_v49 = vpop.f32.mrb[30].mxu1 }
 0xfd8   :  { %v2824_v11 = vadd.f32 %v2748_v45, %v2678_v47  ;;  %v2750_v13 = vpop.f32.mrb[31].mxu0  ;;  %v2821_v14 = vpop.f32.mrb[31].mxu1  ;;  %v2826_v24 = vadd.f32 %v2819_v49, %v2680_v19 }
 0xfd9   :  { %v2825_v20 = vadd.f32 %v2750_v13, %v2679_v6  ;;  %v2827_v31 = vadd.f32 %v2821_v14, %v2681_v28 }
 0xfda   :  { %v2833_v21 = vmul.f32 0.5, %v2824_v11 }
 0xfdb   :  { %v2828_v23 = vmul.f32 0.5, %v2825_v20  ;;  %v2840_v33 = vmul.f32 0.5, %v2827_v31 }
 0xfdc   :  { %4048 = vtanh.f32 %v2833_v21 }
 0xfdd   :  { %4050 = vtanh.f32 %v2828_v23 }
 0xfde   :  { %4052 = vtanh.f32 %v2826_v24 }
 0xfdf   :  { %4054 = vtanh.f32 %v2840_v33 }
 0xfe6   :  { %v4049_v35 = vpop.eup %4048 }
 0xfe7   :  { %v4051_v50 = vpop.eup %4050  ;;  %v2835_v52 = vadd.f32 1.0, %v4049_v35 }
 0xfe8   :  { %v2830_v4 = vadd.f32 1.0, %v4051_v50  ;;  %v4053_v17 = vpop.eup %4052 }
 0xfe9   :  { %v2836_v53 = vmul.f32 0.5, %v2835_v52  ;;  %v4055_v61 = vpop.eup %4054 }
 0xfea   :  { %v2831_v54 = vmul.f32 0.5, %v2830_v4  ;;  %v2842_v62 = vadd.f32 1.0, %v4055_v61 }
 0xfeb   :  { %v2838_v55 = vmul.f32 %v4053_v17, %v2836_v53 }
 0xfec   :  { %v2832_v56 = vmul.f32 %v2831_v54, %v2670_v27  ;;  %v2843_v1 = vmul.f32 0.5, %v2842_v62 }
 0xfee   :  { %v2839_v59 = vadd.f32 %v2838_v55, %v2832_v56 }
 0xff0   :  { %4056 = vtanh.f32 %v2839_v59 }
 0xffa   :  { %v4057_v2 = vpop.eup %4056 }
 0xffb   :  { %v2845_v3 = vmul.f32 %v4057_v2, %v2843_v1 }
 0xffd   :  { %2848 = vst [vmem:[#allocation12] sm:$0xff] %v2845_v3 }
 0xffe   :  { %4157 = shalt.err (!%p4154_p8)
}
 0xfff   :  { %s4158_s13 = scalar_lea.hbm %s4957_s4, 128 }
0x1000   :  { %p4159_p9 = scmp.ne.s32.totalorder %s4957_s4, %s4158_s13  ;;  %p4162_p10 = scmp.lt.u32.totalorder %s4158_s13, %s4957_s4 }
0x1002   :  { %p4164_p11 = pnand %p4162_p10, %p4159_p9 }
0x1004   :  { %4167 = shalt.err (!%p4164_p11)
}
0x1005   :  { %2858 = dma.vmem_to_hbm [thread:$0]  %s2856_s10, 128, %s4957_s4, [#allocation6]  }
0x1006   :  { %4174 = dma.done.wait [#allocation6], 128  }
0x1007   :  { %4175 = vsyncadd [#allocation6], 4294967168 }
0x1008   :  { %2862 = vsyncpa [#allocation5], 1 }
0x1009   :  { %2863 = vsyncpa [#allocation8], 1 }
0x100a   :  { %2864 = vsyncpa [#allocation11], 1 }
0x100b   :  { %2865 = vsyncpa [#allocation6], 1 }

</bundles_post_ra>
